<compile_context>
chip_gen: v5e
topology: v5e:2x2
jax: 0.10.0
libtpu: 0.0.40
codegen_flags: <defaults>
</compile_context>

<pallas_src>
import functools

import jax
import jax.numpy as jnp
from jax import lax
from jax.experimental import pallas as pl
from jax.experimental.pallas import tpu as pltpu

PAD = 128            # lane-dense padded feature width
NEG_INF = -9.0e15    # mask value used by the reference implementation


# ------------------------------ fused kernel --------------------------------

def _tf_kernel(x_ref, bias_ref,
               wh_ref, a1h_ref, a2h_ref,
               wo_ref, a1o_ref, a2o_ref,
               w1_ref, b1_ref, w2_ref, b2_ref,
               o_ref,
               *, num_blocks, num_heads, hid):
    """Fused forward of all `num_blocks` GraphAttentionNetwork blocks.

    Blocks are sequentially dependent, so they are unrolled as a static Python
    loop on a single TensorCore.  All feature axes are zero-padded to PAD=128;
    padded columns stay exactly zero through every op (zero weight rows/cols,
    ELU(0)=0, GELU(0)=0, zero-padded biases).
    """
    x = x_ref[...]                           # (N, PAD) f32 running activation
    mask_bias = bias_ref[...]                # (N, N)  0 where edge, -9e15 else

    # loop-invariant per-head column masks (built once, reused by all blocks)
    col = lax.broadcasted_iota(jnp.int32, (1, PAD), 1)
    hmasks = tuple(
        ((col >= h * hid) & (col < (h + 1) * hid)).astype(jnp.float32)
        for h in range(num_heads))

    def leaky_relu(v):                       # F.leaky_relu default slope 0.01
        return jnp.where(v > 0, v, 0.01 * v)

    def elu(v):                              # ELU(alpha=1); ELU(0) == 0
        return jnp.where(v > 0, v, jnp.exp(jnp.minimum(v, 0.0)) - 1.0)

    def gelu(v):                             # exact (erf) GELU, as nn.GELU()
        return 0.5 * v * (1.0 + lax.erf(v * 0.7071067811865476))

    def softmax_rows(e):                     # masked, numerically-stable
        att = e + mask_bias
        att = att - jnp.max(att, axis=1, keepdims=True)
        p = jnp.exp(att)
        inv = pl.reciprocal(jnp.sum(p, axis=1, keepdims=True), approx=False)
        return p * inv

    contract_last = (((1,), (1,)), ((), ()))

    for b in range(num_blocks):
        # ---- multi-head GAT: one concatenated X @ [W_h1 | W_h2] matmul -----
        hcat = jnp.dot(x.astype(jnp.bfloat16), wh_ref[b],
                       preferred_element_type=jnp.float32)          # (N, PAD)
        a1_blk = a1h_ref[b]                                          # (H, PAD)
        a2_blk = a2h_ref[b]                                          # (H, PAD)
        # merged per-head score dots: all heads in one MXU push each
        f1_all = lax.dot_general(hcat, a1_blk, contract_last,
                                 preferred_element_type=jnp.float32)  # (N, H)
        f2_all = lax.dot_general(a2_blk, hcat, contract_last,
                                 preferred_element_type=jnp.float32)  # (H, N)
        acc = jnp.zeros_like(hcat)
        for h in range(num_heads):
            e = leaky_relu(f1_all[:, h:h + 1] + f2_all[h:h + 1, :])   # (N, N)
            attw = softmax_rows(e)
            # disjoint per-head column ranges -> summing == concatenation
            acc = acc + jnp.dot(attw, hcat * hmasks[h],
                                preferred_element_type=jnp.float32)
        xcat = elu(acc)                                               # (N, PAD)

        # ---- output attention layer ----------------------------------------
        ho = jnp.dot(xcat.astype(jnp.bfloat16), wo_ref[b],
                     preferred_element_type=jnp.float32)             # (N, PAD)
        a1o = a1o_ref[b]                                              # (1, PAD)
        a2o = a2o_ref[b]                                              # (1, PAD)
        f1o = jnp.sum(ho * a1o, axis=-1, keepdims=True)               # (N, 1)
        f2o = lax.dot_general(a2o, ho, contract_last,
                              preferred_element_type=jnp.float32)     # (1, N)
        atto = softmax_rows(leaky_relu(f1o + f2o))
        xo = elu(jnp.dot(atto, ho, preferred_element_type=jnp.float32))

        # ---- fc1 -> GELU -> fc2 (dropout == identity at inference) ----------
        h1 = gelu(jnp.dot(xo.astype(jnp.bfloat16), w1_ref[b],
                          preferred_element_type=jnp.float32) + b1_ref[b])
        x = (jnp.dot(h1.astype(jnp.bfloat16), w2_ref[b],
                     preferred_element_type=jnp.float32) + b2_ref[b])
        # NOTE: the PyTorch block also computes x1 = x0 + x (and x2) but never
        # uses them in the returned value — dead code, intentionally dropped.

    o_ref[...] = x


def tf_forward(params, x, adj, *, num_heads, hid):
    """Run the whole TF model in a single pallas_call (jit this wrapper)."""
    n, f = x.shape
    num_blocks = params["WH"].shape[0]

    # zero-pad the input features to the lane-dense width; precompute the
    # additive adjacency mask bias once (fuses with the pallas_call under jit)
    xp = jnp.zeros((n, PAD), jnp.float32).at[:, :f].set(x)
    bias = jnp.where(adj > 0, 0.0, NEG_INF).astype(jnp.float32)

    kernel = functools.partial(_tf_kernel, num_blocks=num_blocks,
                               num_heads=num_heads, hid=hid)
    vmem = pl.BlockSpec(memory_space=pltpu.MemorySpace.VMEM)

    out = pl.pallas_call(
        kernel,
        in_specs=[vmem] * 12,
        out_specs=vmem,
        out_shape=jax.ShapeDtypeStruct((n, PAD), jnp.float32),
    )(xp, bias,
      params["WH"], params["A1H"], params["A2H"],
      params["WO"], params["A1O"], params["A2O"],
      params["W1"], params["B1"], params["W2"], params["B2"])

    # last block has pred=True -> fc2 width 1; valid output is column 0.
    # (torch .squeeze(0) is a no-op for N > 1.)
    return out[:, :1]


# --------------------------- parameter creation ------------------------------

def _xavier_uniform(key, shape, gain=1.414):
    fan_in, fan_out = shape[0], shape[1]
    bound = gain * (6.0 / (fan_in + fan_out)) ** 0.5
    return jax.random.uniform(key, shape, jnp.float32, -bound, bound)


def _linear_init(key, fan_in, fan_out):
    k1, k2 = jax.random.split(key)
    bound = 1.0 / (fan_in ** 0.5)
    W = jax.random.uniform(k1, (fan_in, fan_out), jnp.float32, -bound, bound)
    b = jax.random.uniform(k2, (1, fan_out), jnp.float32, -bound, bound)
    return W, b


def _init_gat_layer(key, in_f, out_f):
    k1, k2 = jax.random.split(key)
    W = _xavier_uniform(k1, (in_f, out_f))
    a = _xavier_uniform(k2, (2 * out_f, 1))
    a1 = a[:out_f, :]                       # (Fo, 1) — acts on h[i]
    a2 = a[out_f:, :].reshape(1, out_f)     # (1, Fo) — acts on h[j]
    return dict(W=W, a1=a1, a2=a2)


def _init_gan(key, in_f, hid, out_f, heads, pred):
    keys = jax.random.split(key, heads + 3)
    atts = [_init_gat_layer(keys[i], in_f, hid) for i in range(heads)]
    out_att = _init_gat_layer(keys[heads], heads * hid, out_f)
    fc1_w, fc1_b = _linear_init(keys[heads + 1], in_f, hid)
    fc2_out = 1 if pred else in_f
    fc2_w, fc2_b = _linear_init(keys[heads + 2], hid, fc2_out)
    return dict(atts=atts, out_att=out_att,
                fc1=(fc1_w, fc1_b), fc2=(fc2_w, fc2_b), pred=pred)


def init_tf(key, in_f, hid, heads):
    keys = jax.random.split(key, 8)
    blocks = [_init_gan(keys[i], in_f, hid, 41, heads, pred=False) for i in range(7)]
    blocks.append(_init_gan(keys[7], in_f, hid, 41, heads, pred=True))
    return blocks


def pack_tf_params(blocks, in_f, hid, out_f, heads):
    """Zero-pad every per-block weight to lane-dense 128-wide tiles and stack
    all blocks along a leading axis so one pallas_call sees the whole model.
    The four big matmul weight stacks are stored as bfloat16 (halves the
    exposed startup HBM->VMEM DMA; matmuls accumulate in f32)."""
    assert in_f <= PAD and out_f <= PAD and heads * hid <= PAD
    nb = len(blocks)
    WH = jnp.zeros((nb, PAD, PAD), jnp.float32)       # concat-head X@W weights
    A1H = jnp.zeros((nb, heads, PAD), jnp.float32)     # per-head a[:Fo] rows
    A2H = jnp.zeros((nb, heads, PAD), jnp.float32)     # per-head a[Fo:] rows
    WO = jnp.zeros((nb, PAD, PAD), jnp.float32)
    A1O = jnp.zeros((nb, 1, PAD), jnp.float32)
    A2O = jnp.zeros((nb, 1, PAD), jnp.float32)
    W1 = jnp.zeros((nb, PAD, PAD), jnp.float32)
    B1 = jnp.zeros((nb, 1, PAD), jnp.float32)
    W2 = jnp.zeros((nb, PAD, PAD), jnp.float32)
    B2 = jnp.zeros((nb, 1, PAD), jnp.float32)

    for b, p in enumerate(blocks):
        for h, att in enumerate(p["atts"]):
            c0, c1 = h * hid, (h + 1) * hid
            WH = WH.at[b, :in_f, c0:c1].set(att["W"])
            A1H = A1H.at[b, h, c0:c1].set(att["a1"][:, 0])
            A2H = A2H.at[b, h, c0:c1].set(att["a2"][0, :])
        oa = p["out_att"]
        WO = WO.at[b, :heads * hid, :out_f].set(oa["W"])
        A1O = A1O.at[b, 0, :out_f].set(oa["a1"][:, 0])
        A2O = A2O.at[b, 0, :out_f].set(oa["a2"][0, :])
        w1, b1 = p["fc1"]
        w2, b2 = p["fc2"]
        W1 = W1.at[b, :w1.shape[0], :w1.shape[1]].set(w1)
        B1 = B1.at[b, 0, :b1.shape[1]].set(b1[0])
        W2 = W2.at[b, :w2.shape[0], :w2.shape[1]].set(w2)
        B2 = B2.at[b, 0, :b2.shape[1]].set(b2[0])

    return dict(WH=WH.astype(jnp.bfloat16), A1H=A1H, A2H=A2H,
                WO=WO.astype(jnp.bfloat16), A1O=A1O, A2O=A2O,
                W1=W1.astype(jnp.bfloat16), B1=B1,
                W2=W2.astype(jnp.bfloat16), B2=B2)


# ----------------------------------- main ------------------------------------

if __name__ == "__main__":
    # in_features must be 41 (each block's out_att emits 41 features and the
    # next block consumes them as its input width).
    IN_F = 41
    HID = 8
    HEADS = 2
    OUT_F = 41
    N = 8            # number of graph nodes
    # dropout is a constructor arg but identity at inference.

    key = jax.random.PRNGKey(0)
    kx, kadj, kp = jax.random.split(key, 3)

    x = jax.random.normal(kx, (N, IN_F), jnp.float32)
    adj = (jax.random.uniform(kadj, (N, N)) > 0.5).astype(jnp.float32)
    adj = jnp.maximum(adj, jnp.eye(N, dtype=jnp.float32))   # self loops

    blocks = init_tf(kp, IN_F, HID, HEADS)
    packed = pack_tf_params(blocks, IN_F, HID, OUT_F, HEADS)

    fwd = jax.jit(functools.partial(tf_forward, num_heads=HEADS, hid=HID))
    out = jax.block_until_ready(fwd(packed, x, adj))

    assert out.shape == (N, 1), out.shape
    assert bool(jnp.all(jnp.isfinite(out)))
    print("KERNEL_OK")
</pallas_src>

<mosaic_0001>
module attributes {stable_mosaic.version = 11 : i64} {
  func.func @_tf_kernel(%arg0: memref<8x128xf32, #tpu.memory_space<vmem>>, %arg1: memref<8x8xf32, #tpu.memory_space<vmem>>, %arg2: memref<8x128x128xbf16, #tpu.memory_space<vmem>>, %arg3: memref<8x2x128xf32, #tpu.memory_space<vmem>>, %arg4: memref<8x2x128xf32, #tpu.memory_space<vmem>>, %arg5: memref<8x128x128xbf16, #tpu.memory_space<vmem>>, %arg6: memref<8x1x128xf32, #tpu.memory_space<vmem>>, %arg7: memref<8x1x128xf32, #tpu.memory_space<vmem>>, %arg8: memref<8x128x128xbf16, #tpu.memory_space<vmem>>, %arg9: memref<8x1x128xf32, #tpu.memory_space<vmem>>, %arg10: memref<8x128x128xbf16, #tpu.memory_space<vmem>>, %arg11: memref<8x1x128xf32, #tpu.memory_space<vmem>>, %arg12: memref<8x128xf32, #tpu.memory_space<vmem>>) attributes {dimension_semantics = [], scalar_prefetch = 0 : i64, scratch_operands = 0 : i64, tpu.core_type = #tpu.core_type<tc>} {
    %c0 = arith.constant 0 : index
    %c0_0 = arith.constant 0 : index
    %0 = vector.load %arg0[%c0, %c0_0] : memref<8x128xf32, #tpu.memory_space<vmem>>, vector<8x128xf32>
    %c0_1 = arith.constant 0 : index
    %c0_2 = arith.constant 0 : index
    %1 = vector.load %arg1[%c0_1, %c0_2] : memref<8x8xf32, #tpu.memory_space<vmem>>, vector<8x8xf32>
    %2 = tpu.iota {dimensions = array<i32: 1>} : vector<1x128xi32>
    %c0_i32 = arith.constant 0 : i32
    %3 = vector.broadcast %c0_i32 : i32 to vector<1x128xi32>
    %4 = arith.cmpi sge, %2, %3 : vector<1x128xi32>
    %c8_i32 = arith.constant 8 : i32
    %5 = vector.broadcast %c8_i32 : i32 to vector<1x128xi32>
    %6 = arith.cmpi slt, %2, %5 : vector<1x128xi32>
    %7 = arith.andi %4, %6 : vector<1x128xi1>
    %8 = arith.extui %7 : vector<1x128xi1> to vector<1x128xi32>
    %9 = arith.sitofp %8 : vector<1x128xi32> to vector<1x128xf32>
    %c8_i32_3 = arith.constant 8 : i32
    %10 = vector.broadcast %c8_i32_3 : i32 to vector<1x128xi32>
    %11 = arith.cmpi sge, %2, %10 : vector<1x128xi32>
    %c16_i32 = arith.constant 16 : i32
    %12 = vector.broadcast %c16_i32 : i32 to vector<1x128xi32>
    %13 = arith.cmpi slt, %2, %12 : vector<1x128xi32>
    %14 = arith.andi %11, %13 : vector<1x128xi1>
    %15 = arith.extui %14 : vector<1x128xi1> to vector<1x128xi32>
    %16 = arith.sitofp %15 : vector<1x128xi32> to vector<1x128xf32>
    %17 = arith.truncf %0 : vector<8x128xf32> to vector<8x128xbf16>
    %c0_4 = arith.constant 0 : index
    %c0_5 = arith.constant 0 : index
    %c0_6 = arith.constant 0 : index
    %18 = vector.load %arg2[%c0_4, %c0_5, %c0_6] : memref<8x128x128xbf16, #tpu.memory_space<vmem>>, vector<1x128x128xbf16>
    %19 = vector.shape_cast %18 : vector<1x128x128xbf16> to vector<128x128xbf16>
    %cst = arith.constant dense<0.000000e+00> : vector<8x128xf32>
    %20 = tpu.matmul %17, %19, %cst {dimension_numbers = #tpu.dot_dimension_numbers<[1], [0], [0], [1], [0, 0, 1, 1], [], []>} : vector<8x128xbf16>, vector<128x128xbf16>, vector<8x128xf32> -> vector<8x128xf32>
    %c0_7 = arith.constant 0 : index
    %c0_8 = arith.constant 0 : index
    %c0_9 = arith.constant 0 : index
    %21 = vector.load %arg3[%c0_7, %c0_8, %c0_9] : memref<8x2x128xf32, #tpu.memory_space<vmem>>, vector<1x2x128xf32>
    %22 = vector.shape_cast %21 : vector<1x2x128xf32> to vector<2x128xf32>
    %c0_10 = arith.constant 0 : index
    %c0_11 = arith.constant 0 : index
    %c0_12 = arith.constant 0 : index
    %23 = vector.load %arg4[%c0_10, %c0_11, %c0_12] : memref<8x2x128xf32, #tpu.memory_space<vmem>>, vector<1x2x128xf32>
    %24 = vector.shape_cast %23 : vector<1x2x128xf32> to vector<2x128xf32>
    %cst_13 = arith.constant dense<0.000000e+00> : vector<8x2xf32>
    %25 = tpu.matmul %20, %22, %cst_13 {dimension_numbers = #tpu.dot_dimension_numbers<[1], [1], [0], [0], [0, 0, 1, 0], [], []>} : vector<8x128xf32>, vector<2x128xf32>, vector<8x2xf32> -> vector<8x2xf32>
    %cst_14 = arith.constant dense<0.000000e+00> : vector<2x8xf32>
    %26 = tpu.matmul %24, %20, %cst_14 {dimension_numbers = #tpu.dot_dimension_numbers<[1], [1], [0], [0], [0, 0, 1, 0], [], []>} : vector<2x128xf32>, vector<8x128xf32>, vector<2x8xf32> -> vector<2x8xf32>
    %cst_15 = arith.constant 0.000000e+00 : f32
    %27 = vector.broadcast %cst_15 : f32 to vector<8x128xf32>
    %28 = vector.extract_strided_slice %25 {offsets = [0, 0], sizes = [8, 1], strides = [1, 1]} : vector<8x2xf32> to vector<8x1xf32>
    %29 = vector.extract_strided_slice %26 {offsets = [0, 0], sizes = [1, 8], strides = [1, 1]} : vector<2x8xf32> to vector<1x8xf32>
    %30 = vector.broadcast %28 : vector<8x1xf32> to vector<8x8xf32>
    %31 = vector.broadcast %29 : vector<1x8xf32> to vector<8x8xf32>
    %32 = arith.addf %30, %31 : vector<8x8xf32>
    %cst_16 = arith.constant 0.000000e+00 : f32
    %33 = vector.broadcast %cst_16 : f32 to vector<8x8xf32>
    %34 = arith.cmpf ogt, %32, %33 : vector<8x8xf32>
    %cst_17 = arith.constant 0.00999999977 : f32
    %35 = vector.broadcast %cst_17 : f32 to vector<8x8xf32>
    %36 = arith.mulf %35, %32 : vector<8x8xf32>
    %37 = arith.select %34, %32, %36 : vector<8x8xi1>, vector<8x8xf32>
    %38 = arith.addf %37, %1 : vector<8x8xf32>
    %cst_18 = arith.constant dense<0xFF800000> : vector<8xf32>
    %39 = vector.multi_reduction <maximumf>, %38, %cst_18 [1] : vector<8x8xf32> to vector<8xf32>
    %40 = vector.shape_cast %39 : vector<8xf32> to vector<8x1xf32>
    %41 = vector.broadcast %40 : vector<8x1xf32> to vector<8x8xf32>
    %42 = arith.subf %38, %41 : vector<8x8xf32>
    %43 = math.exp %42 : vector<8x8xf32>
    %cst_19 = arith.constant dense<0.000000e+00> : vector<8xf32>
    %44 = vector.multi_reduction <add>, %43, %cst_19 [1] : vector<8x8xf32> to vector<8xf32>
    %45 = vector.shape_cast %44 : vector<8xf32> to vector<8x1xf32>
    %46 = tpu.reciprocal %45 : vector<8x1xf32> -> vector<8x1xf32>
    %47 = vector.broadcast %46 : vector<8x1xf32> to vector<8x8xf32>
    %48 = arith.mulf %43, %47 : vector<8x8xf32>
    %49 = vector.broadcast %9 : vector<1x128xf32> to vector<8x128xf32>
    %50 = arith.mulf %20, %49 : vector<8x128xf32>
    %cst_20 = arith.constant dense<0.000000e+00> : vector<8x128xf32>
    %51 = tpu.matmul %48, %50, %cst_20 {dimension_numbers = #tpu.dot_dimension_numbers<[1], [0], [0], [1], [0, 0, 1, 1], [], []>} : vector<8x8xf32>, vector<8x128xf32>, vector<8x128xf32> -> vector<8x128xf32>
    %52 = arith.addf %27, %51 : vector<8x128xf32>
    %53 = vector.extract_strided_slice %25 {offsets = [0, 1], sizes = [8, 1], strides = [1, 1]} : vector<8x2xf32> to vector<8x1xf32>
    %54 = vector.extract_strided_slice %26 {offsets = [1, 0], sizes = [1, 8], strides = [1, 1]} : vector<2x8xf32> to vector<1x8xf32>
    %55 = vector.broadcast %53 : vector<8x1xf32> to vector<8x8xf32>
    %56 = vector.broadcast %54 : vector<1x8xf32> to vector<8x8xf32>
    %57 = arith.addf %55, %56 : vector<8x8xf32>
    %cst_21 = arith.constant 0.000000e+00 : f32
    %58 = vector.broadcast %cst_21 : f32 to vector<8x8xf32>
    %59 = arith.cmpf ogt, %57, %58 : vector<8x8xf32>
    %cst_22 = arith.constant 0.00999999977 : f32
    %60 = vector.broadcast %cst_22 : f32 to vector<8x8xf32>
    %61 = arith.mulf %60, %57 : vector<8x8xf32>
    %62 = arith.select %59, %57, %61 : vector<8x8xi1>, vector<8x8xf32>
    %63 = arith.addf %62, %1 : vector<8x8xf32>
    %cst_23 = arith.constant dense<0xFF800000> : vector<8xf32>
    %64 = vector.multi_reduction <maximumf>, %63, %cst_23 [1] : vector<8x8xf32> to vector<8xf32>
    %65 = vector.shape_cast %64 : vector<8xf32> to vector<8x1xf32>
    %66 = vector.broadcast %65 : vector<8x1xf32> to vector<8x8xf32>
    %67 = arith.subf %63, %66 : vector<8x8xf32>
    %68 = math.exp %67 : vector<8x8xf32>
    %cst_24 = arith.constant dense<0.000000e+00> : vector<8xf32>
    %69 = vector.multi_reduction <add>, %68, %cst_24 [1] : vector<8x8xf32> to vector<8xf32>
    %70 = vector.shape_cast %69 : vector<8xf32> to vector<8x1xf32>
    %71 = tpu.reciprocal %70 : vector<8x1xf32> -> vector<8x1xf32>
    %72 = vector.broadcast %71 : vector<8x1xf32> to vector<8x8xf32>
    %73 = arith.mulf %68, %72 : vector<8x8xf32>
    %74 = vector.broadcast %16 : vector<1x128xf32> to vector<8x128xf32>
    %75 = arith.mulf %20, %74 : vector<8x128xf32>
    %cst_25 = arith.constant dense<0.000000e+00> : vector<8x128xf32>
    %76 = tpu.matmul %73, %75, %cst_25 {dimension_numbers = #tpu.dot_dimension_numbers<[1], [0], [0], [1], [0, 0, 1, 1], [], []>} : vector<8x8xf32>, vector<8x128xf32>, vector<8x128xf32> -> vector<8x128xf32>
    %77 = arith.addf %52, %76 : vector<8x128xf32>
    %cst_26 = arith.constant 0.000000e+00 : f32
    %78 = vector.broadcast %cst_26 : f32 to vector<8x128xf32>
    %79 = arith.cmpf ogt, %77, %78 : vector<8x128xf32>
    %cst_27 = arith.constant 0.000000e+00 : f32
    %80 = vector.broadcast %cst_27 : f32 to vector<8x128xf32>
    %81 = arith.minimumf %77, %80 : vector<8x128xf32>
    %82 = math.exp %81 : vector<8x128xf32>
    %cst_28 = arith.constant 1.000000e+00 : f32
    %83 = vector.broadcast %cst_28 : f32 to vector<8x128xf32>
    %84 = arith.subf %82, %83 : vector<8x128xf32>
    %85 = arith.select %79, %77, %84 : vector<8x128xi1>, vector<8x128xf32>
    %86 = arith.truncf %85 : vector<8x128xf32> to vector<8x128xbf16>
    %c0_29 = arith.constant 0 : index
    %c0_30 = arith.constant 0 : index
    %c0_31 = arith.constant 0 : index
    %87 = vector.load %arg5[%c0_29, %c0_30, %c0_31] : memref<8x128x128xbf16, #tpu.memory_space<vmem>>, vector<1x128x128xbf16>
    %88 = vector.shape_cast %87 : vector<1x128x128xbf16> to vector<128x128xbf16>
    %cst_32 = arith.constant dense<0.000000e+00> : vector<8x128xf32>
    %89 = tpu.matmul %86, %88, %cst_32 {dimension_numbers = #tpu.dot_dimension_numbers<[1], [0], [0], [1], [0, 0, 1, 1], [], []>} : vector<8x128xbf16>, vector<128x128xbf16>, vector<8x128xf32> -> vector<8x128xf32>
    %c0_33 = arith.constant 0 : index
    %c0_34 = arith.constant 0 : index
    %c0_35 = arith.constant 0 : index
    %90 = vector.load %arg6[%c0_33, %c0_34, %c0_35] : memref<8x1x128xf32, #tpu.memory_space<vmem>>, vector<1x1x128xf32>
    %91 = vector.shape_cast %90 : vector<1x1x128xf32> to vector<1x128xf32>
    %c0_36 = arith.constant 0 : index
    %c0_37 = arith.constant 0 : index
    %c0_38 = arith.constant 0 : index
    %92 = vector.load %arg7[%c0_36, %c0_37, %c0_38] : memref<8x1x128xf32, #tpu.memory_space<vmem>>, vector<1x1x128xf32>
    %93 = vector.shape_cast %92 : vector<1x1x128xf32> to vector<1x128xf32>
    %94 = vector.broadcast %91 : vector<1x128xf32> to vector<8x128xf32>
    %95 = arith.mulf %89, %94 : vector<8x128xf32>
    %cst_39 = arith.constant dense<0.000000e+00> : vector<8xf32>
    %96 = vector.multi_reduction <add>, %95, %cst_39 [1] : vector<8x128xf32> to vector<8xf32>
    %97 = vector.shape_cast %96 : vector<8xf32> to vector<8x1xf32>
    %cst_40 = arith.constant dense<0.000000e+00> : vector<1x8xf32>
    %98 = tpu.matmul %93, %89, %cst_40 {dimension_numbers = #tpu.dot_dimension_numbers<[1], [1], [0], [0], [0, 0, 1, 0], [], []>} : vector<1x128xf32>, vector<8x128xf32>, vector<1x8xf32> -> vector<1x8xf32>
    %99 = vector.broadcast %97 : vector<8x1xf32> to vector<8x8xf32>
    %100 = vector.broadcast %98 : vector<1x8xf32> to vector<8x8xf32>
    %101 = arith.addf %99, %100 : vector<8x8xf32>
    %cst_41 = arith.constant 0.000000e+00 : f32
    %102 = vector.broadcast %cst_41 : f32 to vector<8x8xf32>
    %103 = arith.cmpf ogt, %101, %102 : vector<8x8xf32>
    %cst_42 = arith.constant 0.00999999977 : f32
    %104 = vector.broadcast %cst_42 : f32 to vector<8x8xf32>
    %105 = arith.mulf %104, %101 : vector<8x8xf32>
    %106 = arith.select %103, %101, %105 : vector<8x8xi1>, vector<8x8xf32>
    %107 = arith.addf %106, %1 : vector<8x8xf32>
    %cst_43 = arith.constant dense<0xFF800000> : vector<8xf32>
    %108 = vector.multi_reduction <maximumf>, %107, %cst_43 [1] : vector<8x8xf32> to vector<8xf32>
    %109 = vector.shape_cast %108 : vector<8xf32> to vector<8x1xf32>
    %110 = vector.broadcast %109 : vector<8x1xf32> to vector<8x8xf32>
    %111 = arith.subf %107, %110 : vector<8x8xf32>
    %112 = math.exp %111 : vector<8x8xf32>
    %cst_44 = arith.constant dense<0.000000e+00> : vector<8xf32>
    %113 = vector.multi_reduction <add>, %112, %cst_44 [1] : vector<8x8xf32> to vector<8xf32>
    %114 = vector.shape_cast %113 : vector<8xf32> to vector<8x1xf32>
    %115 = tpu.reciprocal %114 : vector<8x1xf32> -> vector<8x1xf32>
    %116 = vector.broadcast %115 : vector<8x1xf32> to vector<8x8xf32>
    %117 = arith.mulf %112, %116 : vector<8x8xf32>
    %cst_45 = arith.constant dense<0.000000e+00> : vector<8x128xf32>
    %118 = tpu.matmul %117, %89, %cst_45 {dimension_numbers = #tpu.dot_dimension_numbers<[1], [0], [0], [1], [0, 0, 1, 1], [], []>} : vector<8x8xf32>, vector<8x128xf32>, vector<8x128xf32> -> vector<8x128xf32>
    %cst_46 = arith.constant 0.000000e+00 : f32
    %119 = vector.broadcast %cst_46 : f32 to vector<8x128xf32>
    %120 = arith.cmpf ogt, %118, %119 : vector<8x128xf32>
    %cst_47 = arith.constant 0.000000e+00 : f32
    %121 = vector.broadcast %cst_47 : f32 to vector<8x128xf32>
    %122 = arith.minimumf %118, %121 : vector<8x128xf32>
    %123 = math.exp %122 : vector<8x128xf32>
    %cst_48 = arith.constant 1.000000e+00 : f32
    %124 = vector.broadcast %cst_48 : f32 to vector<8x128xf32>
    %125 = arith.subf %123, %124 : vector<8x128xf32>
    %126 = arith.select %120, %118, %125 : vector<8x128xi1>, vector<8x128xf32>
    %127 = arith.truncf %126 : vector<8x128xf32> to vector<8x128xbf16>
    %c0_49 = arith.constant 0 : index
    %c0_50 = arith.constant 0 : index
    %c0_51 = arith.constant 0 : index
    %128 = vector.load %arg8[%c0_49, %c0_50, %c0_51] : memref<8x128x128xbf16, #tpu.memory_space<vmem>>, vector<1x128x128xbf16>
    %129 = vector.shape_cast %128 : vector<1x128x128xbf16> to vector<128x128xbf16>
    %cst_52 = arith.constant dense<0.000000e+00> : vector<8x128xf32>
    %130 = tpu.matmul %127, %129, %cst_52 {dimension_numbers = #tpu.dot_dimension_numbers<[1], [0], [0], [1], [0, 0, 1, 1], [], []>} : vector<8x128xbf16>, vector<128x128xbf16>, vector<8x128xf32> -> vector<8x128xf32>
    %c0_53 = arith.constant 0 : index
    %c0_54 = arith.constant 0 : index
    %c0_55 = arith.constant 0 : index
    %131 = vector.load %arg9[%c0_53, %c0_54, %c0_55] : memref<8x1x128xf32, #tpu.memory_space<vmem>>, vector<1x1x128xf32>
    %132 = vector.shape_cast %131 : vector<1x1x128xf32> to vector<1x128xf32>
    %133 = vector.broadcast %132 : vector<1x128xf32> to vector<8x128xf32>
    %134 = arith.addf %130, %133 : vector<8x128xf32>
    %cst_56 = arith.constant 5.000000e-01 : f32
    %135 = vector.broadcast %cst_56 : f32 to vector<8x128xf32>
    %136 = arith.mulf %135, %134 : vector<8x128xf32>
    %cst_57 = arith.constant 0.707106769 : f32
    %137 = vector.broadcast %cst_57 : f32 to vector<8x128xf32>
    %138 = arith.mulf %134, %137 : vector<8x128xf32>
    %139 = math.erf %138 : vector<8x128xf32>
    %cst_58 = arith.constant 1.000000e+00 : f32
    %140 = vector.broadcast %cst_58 : f32 to vector<8x128xf32>
    %141 = arith.addf %140, %139 : vector<8x128xf32>
    %142 = arith.mulf %136, %141 : vector<8x128xf32>
    %143 = arith.truncf %142 : vector<8x128xf32> to vector<8x128xbf16>
    %c0_59 = arith.constant 0 : index
    %c0_60 = arith.constant 0 : index
    %c0_61 = arith.constant 0 : index
    %144 = vector.load %arg10[%c0_59, %c0_60, %c0_61] : memref<8x128x128xbf16, #tpu.memory_space<vmem>>, vector<1x128x128xbf16>
    %145 = vector.shape_cast %144 : vector<1x128x128xbf16> to vector<128x128xbf16>
    %cst_62 = arith.constant dense<0.000000e+00> : vector<8x128xf32>
    %146 = tpu.matmul %143, %145, %cst_62 {dimension_numbers = #tpu.dot_dimension_numbers<[1], [0], [0], [1], [0, 0, 1, 1], [], []>} : vector<8x128xbf16>, vector<128x128xbf16>, vector<8x128xf32> -> vector<8x128xf32>
    %c0_63 = arith.constant 0 : index
    %c0_64 = arith.constant 0 : index
    %c0_65 = arith.constant 0 : index
    %147 = vector.load %arg11[%c0_63, %c0_64, %c0_65] : memref<8x1x128xf32, #tpu.memory_space<vmem>>, vector<1x1x128xf32>
    %148 = vector.shape_cast %147 : vector<1x1x128xf32> to vector<1x128xf32>
    %149 = vector.broadcast %148 : vector<1x128xf32> to vector<8x128xf32>
    %150 = arith.addf %146, %149 : vector<8x128xf32>
    %151 = arith.truncf %150 : vector<8x128xf32> to vector<8x128xbf16>
    %c1 = arith.constant 1 : index
    %c0_66 = arith.constant 0 : index
    %c0_67 = arith.constant 0 : index
    %152 = vector.load %arg2[%c1, %c0_66, %c0_67] : memref<8x128x128xbf16, #tpu.memory_space<vmem>>, vector<1x128x128xbf16>
    %153 = vector.shape_cast %152 : vector<1x128x128xbf16> to vector<128x128xbf16>
    %cst_68 = arith.constant dense<0.000000e+00> : vector<8x128xf32>
    %154 = tpu.matmul %151, %153, %cst_68 {dimension_numbers = #tpu.dot_dimension_numbers<[1], [0], [0], [1], [0, 0, 1, 1], [], []>} : vector<8x128xbf16>, vector<128x128xbf16>, vector<8x128xf32> -> vector<8x128xf32>
    %c1_69 = arith.constant 1 : index
    %c0_70 = arith.constant 0 : index
    %c0_71 = arith.constant 0 : index
    %155 = vector.load %arg3[%c1_69, %c0_70, %c0_71] : memref<8x2x128xf32, #tpu.memory_space<vmem>>, vector<1x2x128xf32>
    %156 = vector.shape_cast %155 : vector<1x2x128xf32> to vector<2x128xf32>
    %c1_72 = arith.constant 1 : index
    %c0_73 = arith.constant 0 : index
    %c0_74 = arith.constant 0 : index
    %157 = vector.load %arg4[%c1_72, %c0_73, %c0_74] : memref<8x2x128xf32, #tpu.memory_space<vmem>>, vector<1x2x128xf32>
    %158 = vector.shape_cast %157 : vector<1x2x128xf32> to vector<2x128xf32>
    %cst_75 = arith.constant dense<0.000000e+00> : vector<8x2xf32>
    %159 = tpu.matmul %154, %156, %cst_75 {dimension_numbers = #tpu.dot_dimension_numbers<[1], [1], [0], [0], [0, 0, 1, 0], [], []>} : vector<8x128xf32>, vector<2x128xf32>, vector<8x2xf32> -> vector<8x2xf32>
    %cst_76 = arith.constant dense<0.000000e+00> : vector<2x8xf32>
    %160 = tpu.matmul %158, %154, %cst_76 {dimension_numbers = #tpu.dot_dimension_numbers<[1], [1], [0], [0], [0, 0, 1, 0], [], []>} : vector<2x128xf32>, vector<8x128xf32>, vector<2x8xf32> -> vector<2x8xf32>
    %cst_77 = arith.constant 0.000000e+00 : f32
    %161 = vector.broadcast %cst_77 : f32 to vector<8x128xf32>
    %162 = vector.extract_strided_slice %159 {offsets = [0, 0], sizes = [8, 1], strides = [1, 1]} : vector<8x2xf32> to vector<8x1xf32>
    %163 = vector.extract_strided_slice %160 {offsets = [0, 0], sizes = [1, 8], strides = [1, 1]} : vector<2x8xf32> to vector<1x8xf32>
    %164 = vector.broadcast %162 : vector<8x1xf32> to vector<8x8xf32>
    %165 = vector.broadcast %163 : vector<1x8xf32> to vector<8x8xf32>
    %166 = arith.addf %164, %165 : vector<8x8xf32>
    %cst_78 = arith.constant 0.000000e+00 : f32
    %167 = vector.broadcast %cst_78 : f32 to vector<8x8xf32>
    %168 = arith.cmpf ogt, %166, %167 : vector<8x8xf32>
    %cst_79 = arith.constant 0.00999999977 : f32
    %169 = vector.broadcast %cst_79 : f32 to vector<8x8xf32>
    %170 = arith.mulf %169, %166 : vector<8x8xf32>
    %171 = arith.select %168, %166, %170 : vector<8x8xi1>, vector<8x8xf32>
    %172 = arith.addf %171, %1 : vector<8x8xf32>
    %cst_80 = arith.constant dense<0xFF800000> : vector<8xf32>
    %173 = vector.multi_reduction <maximumf>, %172, %cst_80 [1] : vector<8x8xf32> to vector<8xf32>
    %174 = vector.shape_cast %173 : vector<8xf32> to vector<8x1xf32>
    %175 = vector.broadcast %174 : vector<8x1xf32> to vector<8x8xf32>
    %176 = arith.subf %172, %175 : vector<8x8xf32>
    %177 = math.exp %176 : vector<8x8xf32>
    %cst_81 = arith.constant dense<0.000000e+00> : vector<8xf32>
    %178 = vector.multi_reduction <add>, %177, %cst_81 [1] : vector<8x8xf32> to vector<8xf32>
    %179 = vector.shape_cast %178 : vector<8xf32> to vector<8x1xf32>
    %180 = tpu.reciprocal %179 : vector<8x1xf32> -> vector<8x1xf32>
    %181 = vector.broadcast %180 : vector<8x1xf32> to vector<8x8xf32>
    %182 = arith.mulf %177, %181 : vector<8x8xf32>
    %183 = vector.broadcast %9 : vector<1x128xf32> to vector<8x128xf32>
    %184 = arith.mulf %154, %183 : vector<8x128xf32>
    %cst_82 = arith.constant dense<0.000000e+00> : vector<8x128xf32>
    %185 = tpu.matmul %182, %184, %cst_82 {dimension_numbers = #tpu.dot_dimension_numbers<[1], [0], [0], [1], [0, 0, 1, 1], [], []>} : vector<8x8xf32>, vector<8x128xf32>, vector<8x128xf32> -> vector<8x128xf32>
    %186 = arith.addf %161, %185 : vector<8x128xf32>
    %187 = vector.extract_strided_slice %159 {offsets = [0, 1], sizes = [8, 1], strides = [1, 1]} : vector<8x2xf32> to vector<8x1xf32>
    %188 = vector.extract_strided_slice %160 {offsets = [1, 0], sizes = [1, 8], strides = [1, 1]} : vector<2x8xf32> to vector<1x8xf32>
    %189 = vector.broadcast %187 : vector<8x1xf32> to vector<8x8xf32>
    %190 = vector.broadcast %188 : vector<1x8xf32> to vector<8x8xf32>
    %191 = arith.addf %189, %190 : vector<8x8xf32>
    %cst_83 = arith.constant 0.000000e+00 : f32
    %192 = vector.broadcast %cst_83 : f32 to vector<8x8xf32>
    %193 = arith.cmpf ogt, %191, %192 : vector<8x8xf32>
    %cst_84 = arith.constant 0.00999999977 : f32
    %194 = vector.broadcast %cst_84 : f32 to vector<8x8xf32>
    %195 = arith.mulf %194, %191 : vector<8x8xf32>
    %196 = arith.select %193, %191, %195 : vector<8x8xi1>, vector<8x8xf32>
    %197 = arith.addf %196, %1 : vector<8x8xf32>
    %cst_85 = arith.constant dense<0xFF800000> : vector<8xf32>
    %198 = vector.multi_reduction <maximumf>, %197, %cst_85 [1] : vector<8x8xf32> to vector<8xf32>
    %199 = vector.shape_cast %198 : vector<8xf32> to vector<8x1xf32>
    %200 = vector.broadcast %199 : vector<8x1xf32> to vector<8x8xf32>
    %201 = arith.subf %197, %200 : vector<8x8xf32>
    %202 = math.exp %201 : vector<8x8xf32>
    %cst_86 = arith.constant dense<0.000000e+00> : vector<8xf32>
    %203 = vector.multi_reduction <add>, %202, %cst_86 [1] : vector<8x8xf32> to vector<8xf32>
    %204 = vector.shape_cast %203 : vector<8xf32> to vector<8x1xf32>
    %205 = tpu.reciprocal %204 : vector<8x1xf32> -> vector<8x1xf32>
    %206 = vector.broadcast %205 : vector<8x1xf32> to vector<8x8xf32>
    %207 = arith.mulf %202, %206 : vector<8x8xf32>
    %208 = vector.broadcast %16 : vector<1x128xf32> to vector<8x128xf32>
    %209 = arith.mulf %154, %208 : vector<8x128xf32>
    %cst_87 = arith.constant dense<0.000000e+00> : vector<8x128xf32>
    %210 = tpu.matmul %207, %209, %cst_87 {dimension_numbers = #tpu.dot_dimension_numbers<[1], [0], [0], [1], [0, 0, 1, 1], [], []>} : vector<8x8xf32>, vector<8x128xf32>, vector<8x128xf32> -> vector<8x128xf32>
    %211 = arith.addf %186, %210 : vector<8x128xf32>
    %cst_88 = arith.constant 0.000000e+00 : f32
    %212 = vector.broadcast %cst_88 : f32 to vector<8x128xf32>
    %213 = arith.cmpf ogt, %211, %212 : vector<8x128xf32>
    %cst_89 = arith.constant 0.000000e+00 : f32
    %214 = vector.broadcast %cst_89 : f32 to vector<8x128xf32>
    %215 = arith.minimumf %211, %214 : vector<8x128xf32>
    %216 = math.exp %215 : vector<8x128xf32>
    %cst_90 = arith.constant 1.000000e+00 : f32
    %217 = vector.broadcast %cst_90 : f32 to vector<8x128xf32>
    %218 = arith.subf %216, %217 : vector<8x128xf32>
    %219 = arith.select %213, %211, %218 : vector<8x128xi1>, vector<8x128xf32>
    %220 = arith.truncf %219 : vector<8x128xf32> to vector<8x128xbf16>
    %c1_91 = arith.constant 1 : index
    %c0_92 = arith.constant 0 : index
    %c0_93 = arith.constant 0 : index
    %221 = vector.load %arg5[%c1_91, %c0_92, %c0_93] : memref<8x128x128xbf16, #tpu.memory_space<vmem>>, vector<1x128x128xbf16>
    %222 = vector.shape_cast %221 : vector<1x128x128xbf16> to vector<128x128xbf16>
    %cst_94 = arith.constant dense<0.000000e+00> : vector<8x128xf32>
    %223 = tpu.matmul %220, %222, %cst_94 {dimension_numbers = #tpu.dot_dimension_numbers<[1], [0], [0], [1], [0, 0, 1, 1], [], []>} : vector<8x128xbf16>, vector<128x128xbf16>, vector<8x128xf32> -> vector<8x128xf32>
    %c1_95 = arith.constant 1 : index
    %c0_96 = arith.constant 0 : index
    %c0_97 = arith.constant 0 : index
    %224 = vector.load %arg6[%c1_95, %c0_96, %c0_97] : memref<8x1x128xf32, #tpu.memory_space<vmem>>, vector<1x1x128xf32>
    %225 = vector.shape_cast %224 : vector<1x1x128xf32> to vector<1x128xf32>
    %c1_98 = arith.constant 1 : index
    %c0_99 = arith.constant 0 : index
    %c0_100 = arith.constant 0 : index
    %226 = vector.load %arg7[%c1_98, %c0_99, %c0_100] : memref<8x1x128xf32, #tpu.memory_space<vmem>>, vector<1x1x128xf32>
    %227 = vector.shape_cast %226 : vector<1x1x128xf32> to vector<1x128xf32>
    %228 = vector.broadcast %225 : vector<1x128xf32> to vector<8x128xf32>
    %229 = arith.mulf %223, %228 : vector<8x128xf32>
    %cst_101 = arith.constant dense<0.000000e+00> : vector<8xf32>
    %230 = vector.multi_reduction <add>, %229, %cst_101 [1] : vector<8x128xf32> to vector<8xf32>
    %231 = vector.shape_cast %230 : vector<8xf32> to vector<8x1xf32>
    %cst_102 = arith.constant dense<0.000000e+00> : vector<1x8xf32>
    %232 = tpu.matmul %227, %223, %cst_102 {dimension_numbers = #tpu.dot_dimension_numbers<[1], [1], [0], [0], [0, 0, 1, 0], [], []>} : vector<1x128xf32>, vector<8x128xf32>, vector<1x8xf32> -> vector<1x8xf32>
    %233 = vector.broadcast %231 : vector<8x1xf32> to vector<8x8xf32>
    %234 = vector.broadcast %232 : vector<1x8xf32> to vector<8x8xf32>
    %235 = arith.addf %233, %234 : vector<8x8xf32>
    %cst_103 = arith.constant 0.000000e+00 : f32
    %236 = vector.broadcast %cst_103 : f32 to vector<8x8xf32>
    %237 = arith.cmpf ogt, %235, %236 : vector<8x8xf32>
    %cst_104 = arith.constant 0.00999999977 : f32
    %238 = vector.broadcast %cst_104 : f32 to vector<8x8xf32>
    %239 = arith.mulf %238, %235 : vector<8x8xf32>
    %240 = arith.select %237, %235, %239 : vector<8x8xi1>, vector<8x8xf32>
    %241 = arith.addf %240, %1 : vector<8x8xf32>
    %cst_105 = arith.constant dense<0xFF800000> : vector<8xf32>
    %242 = vector.multi_reduction <maximumf>, %241, %cst_105 [1] : vector<8x8xf32> to vector<8xf32>
    %243 = vector.shape_cast %242 : vector<8xf32> to vector<8x1xf32>
    %244 = vector.broadcast %243 : vector<8x1xf32> to vector<8x8xf32>
    %245 = arith.subf %241, %244 : vector<8x8xf32>
    %246 = math.exp %245 : vector<8x8xf32>
    %cst_106 = arith.constant dense<0.000000e+00> : vector<8xf32>
    %247 = vector.multi_reduction <add>, %246, %cst_106 [1] : vector<8x8xf32> to vector<8xf32>
    %248 = vector.shape_cast %247 : vector<8xf32> to vector<8x1xf32>
    %249 = tpu.reciprocal %248 : vector<8x1xf32> -> vector<8x1xf32>
    %250 = vector.broadcast %249 : vector<8x1xf32> to vector<8x8xf32>
    %251 = arith.mulf %246, %250 : vector<8x8xf32>
    %cst_107 = arith.constant dense<0.000000e+00> : vector<8x128xf32>
    %252 = tpu.matmul %251, %223, %cst_107 {dimension_numbers = #tpu.dot_dimension_numbers<[1], [0], [0], [1], [0, 0, 1, 1], [], []>} : vector<8x8xf32>, vector<8x128xf32>, vector<8x128xf32> -> vector<8x128xf32>
    %cst_108 = arith.constant 0.000000e+00 : f32
    %253 = vector.broadcast %cst_108 : f32 to vector<8x128xf32>
    %254 = arith.cmpf ogt, %252, %253 : vector<8x128xf32>
    %cst_109 = arith.constant 0.000000e+00 : f32
    %255 = vector.broadcast %cst_109 : f32 to vector<8x128xf32>
    %256 = arith.minimumf %252, %255 : vector<8x128xf32>
    %257 = math.exp %256 : vector<8x128xf32>
    %cst_110 = arith.constant 1.000000e+00 : f32
    %258 = vector.broadcast %cst_110 : f32 to vector<8x128xf32>
    %259 = arith.subf %257, %258 : vector<8x128xf32>
    %260 = arith.select %254, %252, %259 : vector<8x128xi1>, vector<8x128xf32>
    %261 = arith.truncf %260 : vector<8x128xf32> to vector<8x128xbf16>
    %c1_111 = arith.constant 1 : index
    %c0_112 = arith.constant 0 : index
    %c0_113 = arith.constant 0 : index
    %262 = vector.load %arg8[%c1_111, %c0_112, %c0_113] : memref<8x128x128xbf16, #tpu.memory_space<vmem>>, vector<1x128x128xbf16>
    %263 = vector.shape_cast %262 : vector<1x128x128xbf16> to vector<128x128xbf16>
    %cst_114 = arith.constant dense<0.000000e+00> : vector<8x128xf32>
    %264 = tpu.matmul %261, %263, %cst_114 {dimension_numbers = #tpu.dot_dimension_numbers<[1], [0], [0], [1], [0, 0, 1, 1], [], []>} : vector<8x128xbf16>, vector<128x128xbf16>, vector<8x128xf32> -> vector<8x128xf32>
    %c1_115 = arith.constant 1 : index
    %c0_116 = arith.constant 0 : index
    %c0_117 = arith.constant 0 : index
    %265 = vector.load %arg9[%c1_115, %c0_116, %c0_117] : memref<8x1x128xf32, #tpu.memory_space<vmem>>, vector<1x1x128xf32>
    %266 = vector.shape_cast %265 : vector<1x1x128xf32> to vector<1x128xf32>
    %267 = vector.broadcast %266 : vector<1x128xf32> to vector<8x128xf32>
    %268 = arith.addf %264, %267 : vector<8x128xf32>
    %cst_118 = arith.constant 5.000000e-01 : f32
    %269 = vector.broadcast %cst_118 : f32 to vector<8x128xf32>
    %270 = arith.mulf %269, %268 : vector<8x128xf32>
    %cst_119 = arith.constant 0.707106769 : f32
    %271 = vector.broadcast %cst_119 : f32 to vector<8x128xf32>
    %272 = arith.mulf %268, %271 : vector<8x128xf32>
    %273 = math.erf %272 : vector<8x128xf32>
    %cst_120 = arith.constant 1.000000e+00 : f32
    %274 = vector.broadcast %cst_120 : f32 to vector<8x128xf32>
    %275 = arith.addf %274, %273 : vector<8x128xf32>
    %276 = arith.mulf %270, %275 : vector<8x128xf32>
    %277 = arith.truncf %276 : vector<8x128xf32> to vector<8x128xbf16>
    %c1_121 = arith.constant 1 : index
    %c0_122 = arith.constant 0 : index
    %c0_123 = arith.constant 0 : index
    %278 = vector.load %arg10[%c1_121, %c0_122, %c0_123] : memref<8x128x128xbf16, #tpu.memory_space<vmem>>, vector<1x128x128xbf16>
    %279 = vector.shape_cast %278 : vector<1x128x128xbf16> to vector<128x128xbf16>
    %cst_124 = arith.constant dense<0.000000e+00> : vector<8x128xf32>
    %280 = tpu.matmul %277, %279, %cst_124 {dimension_numbers = #tpu.dot_dimension_numbers<[1], [0], [0], [1], [0, 0, 1, 1], [], []>} : vector<8x128xbf16>, vector<128x128xbf16>, vector<8x128xf32> -> vector<8x128xf32>
    %c1_125 = arith.constant 1 : index
    %c0_126 = arith.constant 0 : index
    %c0_127 = arith.constant 0 : index
    %281 = vector.load %arg11[%c1_125, %c0_126, %c0_127] : memref<8x1x128xf32, #tpu.memory_space<vmem>>, vector<1x1x128xf32>
    %282 = vector.shape_cast %281 : vector<1x1x128xf32> to vector<1x128xf32>
    %283 = vector.broadcast %282 : vector<1x128xf32> to vector<8x128xf32>
    %284 = arith.addf %280, %283 : vector<8x128xf32>
    %285 = arith.truncf %284 : vector<8x128xf32> to vector<8x128xbf16>
    %c2 = arith.constant 2 : index
    %c0_128 = arith.constant 0 : index
    %c0_129 = arith.constant 0 : index
    %286 = vector.load %arg2[%c2, %c0_128, %c0_129] : memref<8x128x128xbf16, #tpu.memory_space<vmem>>, vector<1x128x128xbf16>
    %287 = vector.shape_cast %286 : vector<1x128x128xbf16> to vector<128x128xbf16>
    %cst_130 = arith.constant dense<0.000000e+00> : vector<8x128xf32>
    %288 = tpu.matmul %285, %287, %cst_130 {dimension_numbers = #tpu.dot_dimension_numbers<[1], [0], [0], [1], [0, 0, 1, 1], [], []>} : vector<8x128xbf16>, vector<128x128xbf16>, vector<8x128xf32> -> vector<8x128xf32>
    %c2_131 = arith.constant 2 : index
    %c0_132 = arith.constant 0 : index
    %c0_133 = arith.constant 0 : index
    %289 = vector.load %arg3[%c2_131, %c0_132, %c0_133] : memref<8x2x128xf32, #tpu.memory_space<vmem>>, vector<1x2x128xf32>
    %290 = vector.shape_cast %289 : vector<1x2x128xf32> to vector<2x128xf32>
    %c2_134 = arith.constant 2 : index
    %c0_135 = arith.constant 0 : index
    %c0_136 = arith.constant 0 : index
    %291 = vector.load %arg4[%c2_134, %c0_135, %c0_136] : memref<8x2x128xf32, #tpu.memory_space<vmem>>, vector<1x2x128xf32>
    %292 = vector.shape_cast %291 : vector<1x2x128xf32> to vector<2x128xf32>
    %cst_137 = arith.constant dense<0.000000e+00> : vector<8x2xf32>
    %293 = tpu.matmul %288, %290, %cst_137 {dimension_numbers = #tpu.dot_dimension_numbers<[1], [1], [0], [0], [0, 0, 1, 0], [], []>} : vector<8x128xf32>, vector<2x128xf32>, vector<8x2xf32> -> vector<8x2xf32>
    %cst_138 = arith.constant dense<0.000000e+00> : vector<2x8xf32>
    %294 = tpu.matmul %292, %288, %cst_138 {dimension_numbers = #tpu.dot_dimension_numbers<[1], [1], [0], [0], [0, 0, 1, 0], [], []>} : vector<2x128xf32>, vector<8x128xf32>, vector<2x8xf32> -> vector<2x8xf32>
    %cst_139 = arith.constant 0.000000e+00 : f32
    %295 = vector.broadcast %cst_139 : f32 to vector<8x128xf32>
    %296 = vector.extract_strided_slice %293 {offsets = [0, 0], sizes = [8, 1], strides = [1, 1]} : vector<8x2xf32> to vector<8x1xf32>
    %297 = vector.extract_strided_slice %294 {offsets = [0, 0], sizes = [1, 8], strides = [1, 1]} : vector<2x8xf32> to vector<1x8xf32>
    %298 = vector.broadcast %296 : vector<8x1xf32> to vector<8x8xf32>
    %299 = vector.broadcast %297 : vector<1x8xf32> to vector<8x8xf32>
    %300 = arith.addf %298, %299 : vector<8x8xf32>
    %cst_140 = arith.constant 0.000000e+00 : f32
    %301 = vector.broadcast %cst_140 : f32 to vector<8x8xf32>
    %302 = arith.cmpf ogt, %300, %301 : vector<8x8xf32>
    %cst_141 = arith.constant 0.00999999977 : f32
    %303 = vector.broadcast %cst_141 : f32 to vector<8x8xf32>
    %304 = arith.mulf %303, %300 : vector<8x8xf32>
    %305 = arith.select %302, %300, %304 : vector<8x8xi1>, vector<8x8xf32>
    %306 = arith.addf %305, %1 : vector<8x8xf32>
    %cst_142 = arith.constant dense<0xFF800000> : vector<8xf32>
    %307 = vector.multi_reduction <maximumf>, %306, %cst_142 [1] : vector<8x8xf32> to vector<8xf32>
    %308 = vector.shape_cast %307 : vector<8xf32> to vector<8x1xf32>
    %309 = vector.broadcast %308 : vector<8x1xf32> to vector<8x8xf32>
    %310 = arith.subf %306, %309 : vector<8x8xf32>
    %311 = math.exp %310 : vector<8x8xf32>
    %cst_143 = arith.constant dense<0.000000e+00> : vector<8xf32>
    %312 = vector.multi_reduction <add>, %311, %cst_143 [1] : vector<8x8xf32> to vector<8xf32>
    %313 = vector.shape_cast %312 : vector<8xf32> to vector<8x1xf32>
    %314 = tpu.reciprocal %313 : vector<8x1xf32> -> vector<8x1xf32>
    %315 = vector.broadcast %314 : vector<8x1xf32> to vector<8x8xf32>
    %316 = arith.mulf %311, %315 : vector<8x8xf32>
    %317 = vector.broadcast %9 : vector<1x128xf32> to vector<8x128xf32>
    %318 = arith.mulf %288, %317 : vector<8x128xf32>
    %cst_144 = arith.constant dense<0.000000e+00> : vector<8x128xf32>
    %319 = tpu.matmul %316, %318, %cst_144 {dimension_numbers = #tpu.dot_dimension_numbers<[1], [0], [0], [1], [0, 0, 1, 1], [], []>} : vector<8x8xf32>, vector<8x128xf32>, vector<8x128xf32> -> vector<8x128xf32>
    %320 = arith.addf %295, %319 : vector<8x128xf32>
    %321 = vector.extract_strided_slice %293 {offsets = [0, 1], sizes = [8, 1], strides = [1, 1]} : vector<8x2xf32> to vector<8x1xf32>
    %322 = vector.extract_strided_slice %294 {offsets = [1, 0], sizes = [1, 8], strides = [1, 1]} : vector<2x8xf32> to vector<1x8xf32>
    %323 = vector.broadcast %321 : vector<8x1xf32> to vector<8x8xf32>
    %324 = vector.broadcast %322 : vector<1x8xf32> to vector<8x8xf32>
    %325 = arith.addf %323, %324 : vector<8x8xf32>
    %cst_145 = arith.constant 0.000000e+00 : f32
    %326 = vector.broadcast %cst_145 : f32 to vector<8x8xf32>
    %327 = arith.cmpf ogt, %325, %326 : vector<8x8xf32>
    %cst_146 = arith.constant 0.00999999977 : f32
    %328 = vector.broadcast %cst_146 : f32 to vector<8x8xf32>
    %329 = arith.mulf %328, %325 : vector<8x8xf32>
    %330 = arith.select %327, %325, %329 : vector<8x8xi1>, vector<8x8xf32>
    %331 = arith.addf %330, %1 : vector<8x8xf32>
    %cst_147 = arith.constant dense<0xFF800000> : vector<8xf32>
    %332 = vector.multi_reduction <maximumf>, %331, %cst_147 [1] : vector<8x8xf32> to vector<8xf32>
    %333 = vector.shape_cast %332 : vector<8xf32> to vector<8x1xf32>
    %334 = vector.broadcast %333 : vector<8x1xf32> to vector<8x8xf32>
    %335 = arith.subf %331, %334 : vector<8x8xf32>
    %336 = math.exp %335 : vector<8x8xf32>
    %cst_148 = arith.constant dense<0.000000e+00> : vector<8xf32>
    %337 = vector.multi_reduction <add>, %336, %cst_148 [1] : vector<8x8xf32> to vector<8xf32>
    %338 = vector.shape_cast %337 : vector<8xf32> to vector<8x1xf32>
    %339 = tpu.reciprocal %338 : vector<8x1xf32> -> vector<8x1xf32>
    %340 = vector.broadcast %339 : vector<8x1xf32> to vector<8x8xf32>
    %341 = arith.mulf %336, %340 : vector<8x8xf32>
    %342 = vector.broadcast %16 : vector<1x128xf32> to vector<8x128xf32>
    %343 = arith.mulf %288, %342 : vector<8x128xf32>
    %cst_149 = arith.constant dense<0.000000e+00> : vector<8x128xf32>
    %344 = tpu.matmul %341, %343, %cst_149 {dimension_numbers = #tpu.dot_dimension_numbers<[1], [0], [0], [1], [0, 0, 1, 1], [], []>} : vector<8x8xf32>, vector<8x128xf32>, vector<8x128xf32> -> vector<8x128xf32>
    %345 = arith.addf %320, %344 : vector<8x128xf32>
    %cst_150 = arith.constant 0.000000e+00 : f32
    %346 = vector.broadcast %cst_150 : f32 to vector<8x128xf32>
    %347 = arith.cmpf ogt, %345, %346 : vector<8x128xf32>
    %cst_151 = arith.constant 0.000000e+00 : f32
    %348 = vector.broadcast %cst_151 : f32 to vector<8x128xf32>
    %349 = arith.minimumf %345, %348 : vector<8x128xf32>
    %350 = math.exp %349 : vector<8x128xf32>
    %cst_152 = arith.constant 1.000000e+00 : f32
    %351 = vector.broadcast %cst_152 : f32 to vector<8x128xf32>
    %352 = arith.subf %350, %351 : vector<8x128xf32>
    %353 = arith.select %347, %345, %352 : vector<8x128xi1>, vector<8x128xf32>
    %354 = arith.truncf %353 : vector<8x128xf32> to vector<8x128xbf16>
    %c2_153 = arith.constant 2 : index
    %c0_154 = arith.constant 0 : index
    %c0_155 = arith.constant 0 : index
    %355 = vector.load %arg5[%c2_153, %c0_154, %c0_155] : memref<8x128x128xbf16, #tpu.memory_space<vmem>>, vector<1x128x128xbf16>
    %356 = vector.shape_cast %355 : vector<1x128x128xbf16> to vector<128x128xbf16>
    %cst_156 = arith.constant dense<0.000000e+00> : vector<8x128xf32>
    %357 = tpu.matmul %354, %356, %cst_156 {dimension_numbers = #tpu.dot_dimension_numbers<[1], [0], [0], [1], [0, 0, 1, 1], [], []>} : vector<8x128xbf16>, vector<128x128xbf16>, vector<8x128xf32> -> vector<8x128xf32>
    %c2_157 = arith.constant 2 : index
    %c0_158 = arith.constant 0 : index
    %c0_159 = arith.constant 0 : index
    %358 = vector.load %arg6[%c2_157, %c0_158, %c0_159] : memref<8x1x128xf32, #tpu.memory_space<vmem>>, vector<1x1x128xf32>
    %359 = vector.shape_cast %358 : vector<1x1x128xf32> to vector<1x128xf32>
    %c2_160 = arith.constant 2 : index
    %c0_161 = arith.constant 0 : index
    %c0_162 = arith.constant 0 : index
    %360 = vector.load %arg7[%c2_160, %c0_161, %c0_162] : memref<8x1x128xf32, #tpu.memory_space<vmem>>, vector<1x1x128xf32>
    %361 = vector.shape_cast %360 : vector<1x1x128xf32> to vector<1x128xf32>
    %362 = vector.broadcast %359 : vector<1x128xf32> to vector<8x128xf32>
    %363 = arith.mulf %357, %362 : vector<8x128xf32>
    %cst_163 = arith.constant dense<0.000000e+00> : vector<8xf32>
    %364 = vector.multi_reduction <add>, %363, %cst_163 [1] : vector<8x128xf32> to vector<8xf32>
    %365 = vector.shape_cast %364 : vector<8xf32> to vector<8x1xf32>
    %cst_164 = arith.constant dense<0.000000e+00> : vector<1x8xf32>
    %366 = tpu.matmul %361, %357, %cst_164 {dimension_numbers = #tpu.dot_dimension_numbers<[1], [1], [0], [0], [0, 0, 1, 0], [], []>} : vector<1x128xf32>, vector<8x128xf32>, vector<1x8xf32> -> vector<1x8xf32>
    %367 = vector.broadcast %365 : vector<8x1xf32> to vector<8x8xf32>
    %368 = vector.broadcast %366 : vector<1x8xf32> to vector<8x8xf32>
    %369 = arith.addf %367, %368 : vector<8x8xf32>
    %cst_165 = arith.constant 0.000000e+00 : f32
    %370 = vector.broadcast %cst_165 : f32 to vector<8x8xf32>
    %371 = arith.cmpf ogt, %369, %370 : vector<8x8xf32>
    %cst_166 = arith.constant 0.00999999977 : f32
    %372 = vector.broadcast %cst_166 : f32 to vector<8x8xf32>
    %373 = arith.mulf %372, %369 : vector<8x8xf32>
    %374 = arith.select %371, %369, %373 : vector<8x8xi1>, vector<8x8xf32>
    %375 = arith.addf %374, %1 : vector<8x8xf32>
    %cst_167 = arith.constant dense<0xFF800000> : vector<8xf32>
    %376 = vector.multi_reduction <maximumf>, %375, %cst_167 [1] : vector<8x8xf32> to vector<8xf32>
    %377 = vector.shape_cast %376 : vector<8xf32> to vector<8x1xf32>
    %378 = vector.broadcast %377 : vector<8x1xf32> to vector<8x8xf32>
    %379 = arith.subf %375, %378 : vector<8x8xf32>
    %380 = math.exp %379 : vector<8x8xf32>
    %cst_168 = arith.constant dense<0.000000e+00> : vector<8xf32>
    %381 = vector.multi_reduction <add>, %380, %cst_168 [1] : vector<8x8xf32> to vector<8xf32>
    %382 = vector.shape_cast %381 : vector<8xf32> to vector<8x1xf32>
    %383 = tpu.reciprocal %382 : vector<8x1xf32> -> vector<8x1xf32>
    %384 = vector.broadcast %383 : vector<8x1xf32> to vector<8x8xf32>
    %385 = arith.mulf %380, %384 : vector<8x8xf32>
    %cst_169 = arith.constant dense<0.000000e+00> : vector<8x128xf32>
    %386 = tpu.matmul %385, %357, %cst_169 {dimension_numbers = #tpu.dot_dimension_numbers<[1], [0], [0], [1], [0, 0, 1, 1], [], []>} : vector<8x8xf32>, vector<8x128xf32>, vector<8x128xf32> -> vector<8x128xf32>
    %cst_170 = arith.constant 0.000000e+00 : f32
    %387 = vector.broadcast %cst_170 : f32 to vector<8x128xf32>
    %388 = arith.cmpf ogt, %386, %387 : vector<8x128xf32>
    %cst_171 = arith.constant 0.000000e+00 : f32
    %389 = vector.broadcast %cst_171 : f32 to vector<8x128xf32>
    %390 = arith.minimumf %386, %389 : vector<8x128xf32>
    %391 = math.exp %390 : vector<8x128xf32>
    %cst_172 = arith.constant 1.000000e+00 : f32
    %392 = vector.broadcast %cst_172 : f32 to vector<8x128xf32>
    %393 = arith.subf %391, %392 : vector<8x128xf32>
    %394 = arith.select %388, %386, %393 : vector<8x128xi1>, vector<8x128xf32>
    %395 = arith.truncf %394 : vector<8x128xf32> to vector<8x128xbf16>
    %c2_173 = arith.constant 2 : index
    %c0_174 = arith.constant 0 : index
    %c0_175 = arith.constant 0 : index
    %396 = vector.load %arg8[%c2_173, %c0_174, %c0_175] : memref<8x128x128xbf16, #tpu.memory_space<vmem>>, vector<1x128x128xbf16>
    %397 = vector.shape_cast %396 : vector<1x128x128xbf16> to vector<128x128xbf16>
    %cst_176 = arith.constant dense<0.000000e+00> : vector<8x128xf32>
    %398 = tpu.matmul %395, %397, %cst_176 {dimension_numbers = #tpu.dot_dimension_numbers<[1], [0], [0], [1], [0, 0, 1, 1], [], []>} : vector<8x128xbf16>, vector<128x128xbf16>, vector<8x128xf32> -> vector<8x128xf32>
    %c2_177 = arith.constant 2 : index
    %c0_178 = arith.constant 0 : index
    %c0_179 = arith.constant 0 : index
    %399 = vector.load %arg9[%c2_177, %c0_178, %c0_179] : memref<8x1x128xf32, #tpu.memory_space<vmem>>, vector<1x1x128xf32>
    %400 = vector.shape_cast %399 : vector<1x1x128xf32> to vector<1x128xf32>
    %401 = vector.broadcast %400 : vector<1x128xf32> to vector<8x128xf32>
    %402 = arith.addf %398, %401 : vector<8x128xf32>
    %cst_180 = arith.constant 5.000000e-01 : f32
    %403 = vector.broadcast %cst_180 : f32 to vector<8x128xf32>
    %404 = arith.mulf %403, %402 : vector<8x128xf32>
    %cst_181 = arith.constant 0.707106769 : f32
    %405 = vector.broadcast %cst_181 : f32 to vector<8x128xf32>
    %406 = arith.mulf %402, %405 : vector<8x128xf32>
    %407 = math.erf %406 : vector<8x128xf32>
    %cst_182 = arith.constant 1.000000e+00 : f32
    %408 = vector.broadcast %cst_182 : f32 to vector<8x128xf32>
    %409 = arith.addf %408, %407 : vector<8x128xf32>
    %410 = arith.mulf %404, %409 : vector<8x128xf32>
    %411 = arith.truncf %410 : vector<8x128xf32> to vector<8x128xbf16>
    %c2_183 = arith.constant 2 : index
    %c0_184 = arith.constant 0 : index
    %c0_185 = arith.constant 0 : index
    %412 = vector.load %arg10[%c2_183, %c0_184, %c0_185] : memref<8x128x128xbf16, #tpu.memory_space<vmem>>, vector<1x128x128xbf16>
    %413 = vector.shape_cast %412 : vector<1x128x128xbf16> to vector<128x128xbf16>
    %cst_186 = arith.constant dense<0.000000e+00> : vector<8x128xf32>
    %414 = tpu.matmul %411, %413, %cst_186 {dimension_numbers = #tpu.dot_dimension_numbers<[1], [0], [0], [1], [0, 0, 1, 1], [], []>} : vector<8x128xbf16>, vector<128x128xbf16>, vector<8x128xf32> -> vector<8x128xf32>
    %c2_187 = arith.constant 2 : index
    %c0_188 = arith.constant 0 : index
    %c0_189 = arith.constant 0 : index
    %415 = vector.load %arg11[%c2_187, %c0_188, %c0_189] : memref<8x1x128xf32, #tpu.memory_space<vmem>>, vector<1x1x128xf32>
    %416 = vector.shape_cast %415 : vector<1x1x128xf32> to vector<1x128xf32>
    %417 = vector.broadcast %416 : vector<1x128xf32> to vector<8x128xf32>
    %418 = arith.addf %414, %417 : vector<8x128xf32>
    %419 = arith.truncf %418 : vector<8x128xf32> to vector<8x128xbf16>
    %c3 = arith.constant 3 : index
    %c0_190 = arith.constant 0 : index
    %c0_191 = arith.constant 0 : index
    %420 = vector.load %arg2[%c3, %c0_190, %c0_191] : memref<8x128x128xbf16, #tpu.memory_space<vmem>>, vector<1x128x128xbf16>
    %421 = vector.shape_cast %420 : vector<1x128x128xbf16> to vector<128x128xbf16>
    %cst_192 = arith.constant dense<0.000000e+00> : vector<8x128xf32>
    %422 = tpu.matmul %419, %421, %cst_192 {dimension_numbers = #tpu.dot_dimension_numbers<[1], [0], [0], [1], [0, 0, 1, 1], [], []>} : vector<8x128xbf16>, vector<128x128xbf16>, vector<8x128xf32> -> vector<8x128xf32>
    %c3_193 = arith.constant 3 : index
    %c0_194 = arith.constant 0 : index
    %c0_195 = arith.constant 0 : index
    %423 = vector.load %arg3[%c3_193, %c0_194, %c0_195] : memref<8x2x128xf32, #tpu.memory_space<vmem>>, vector<1x2x128xf32>
    %424 = vector.shape_cast %423 : vector<1x2x128xf32> to vector<2x128xf32>
    %c3_196 = arith.constant 3 : index
    %c0_197 = arith.constant 0 : index
    %c0_198 = arith.constant 0 : index
    %425 = vector.load %arg4[%c3_196, %c0_197, %c0_198] : memref<8x2x128xf32, #tpu.memory_space<vmem>>, vector<1x2x128xf32>
    %426 = vector.shape_cast %425 : vector<1x2x128xf32> to vector<2x128xf32>
    %cst_199 = arith.constant dense<0.000000e+00> : vector<8x2xf32>
    %427 = tpu.matmul %422, %424, %cst_199 {dimension_numbers = #tpu.dot_dimension_numbers<[1], [1], [0], [0], [0, 0, 1, 0], [], []>} : vector<8x128xf32>, vector<2x128xf32>, vector<8x2xf32> -> vector<8x2xf32>
    %cst_200 = arith.constant dense<0.000000e+00> : vector<2x8xf32>
    %428 = tpu.matmul %426, %422, %cst_200 {dimension_numbers = #tpu.dot_dimension_numbers<[1], [1], [0], [0], [0, 0, 1, 0], [], []>} : vector<2x128xf32>, vector<8x128xf32>, vector<2x8xf32> -> vector<2x8xf32>
    %cst_201 = arith.constant 0.000000e+00 : f32
    %429 = vector.broadcast %cst_201 : f32 to vector<8x128xf32>
    %430 = vector.extract_strided_slice %427 {offsets = [0, 0], sizes = [8, 1], strides = [1, 1]} : vector<8x2xf32> to vector<8x1xf32>
    %431 = vector.extract_strided_slice %428 {offsets = [0, 0], sizes = [1, 8], strides = [1, 1]} : vector<2x8xf32> to vector<1x8xf32>
    %432 = vector.broadcast %430 : vector<8x1xf32> to vector<8x8xf32>
    %433 = vector.broadcast %431 : vector<1x8xf32> to vector<8x8xf32>
    %434 = arith.addf %432, %433 : vector<8x8xf32>
    %cst_202 = arith.constant 0.000000e+00 : f32
    %435 = vector.broadcast %cst_202 : f32 to vector<8x8xf32>
    %436 = arith.cmpf ogt, %434, %435 : vector<8x8xf32>
    %cst_203 = arith.constant 0.00999999977 : f32
    %437 = vector.broadcast %cst_203 : f32 to vector<8x8xf32>
    %438 = arith.mulf %437, %434 : vector<8x8xf32>
    %439 = arith.select %436, %434, %438 : vector<8x8xi1>, vector<8x8xf32>
    %440 = arith.addf %439, %1 : vector<8x8xf32>
    %cst_204 = arith.constant dense<0xFF800000> : vector<8xf32>
    %441 = vector.multi_reduction <maximumf>, %440, %cst_204 [1] : vector<8x8xf32> to vector<8xf32>
    %442 = vector.shape_cast %441 : vector<8xf32> to vector<8x1xf32>
    %443 = vector.broadcast %442 : vector<8x1xf32> to vector<8x8xf32>
    %444 = arith.subf %440, %443 : vector<8x8xf32>
    %445 = math.exp %444 : vector<8x8xf32>
    %cst_205 = arith.constant dense<0.000000e+00> : vector<8xf32>
    %446 = vector.multi_reduction <add>, %445, %cst_205 [1] : vector<8x8xf32> to vector<8xf32>
    %447 = vector.shape_cast %446 : vector<8xf32> to vector<8x1xf32>
    %448 = tpu.reciprocal %447 : vector<8x1xf32> -> vector<8x1xf32>
    %449 = vector.broadcast %448 : vector<8x1xf32> to vector<8x8xf32>
    %450 = arith.mulf %445, %449 : vector<8x8xf32>
    %451 = vector.broadcast %9 : vector<1x128xf32> to vector<8x128xf32>
    %452 = arith.mulf %422, %451 : vector<8x128xf32>
    %cst_206 = arith.constant dense<0.000000e+00> : vector<8x128xf32>
    %453 = tpu.matmul %450, %452, %cst_206 {dimension_numbers = #tpu.dot_dimension_numbers<[1], [0], [0], [1], [0, 0, 1, 1], [], []>} : vector<8x8xf32>, vector<8x128xf32>, vector<8x128xf32> -> vector<8x128xf32>
    %454 = arith.addf %429, %453 : vector<8x128xf32>
    %455 = vector.extract_strided_slice %427 {offsets = [0, 1], sizes = [8, 1], strides = [1, 1]} : vector<8x2xf32> to vector<8x1xf32>
    %456 = vector.extract_strided_slice %428 {offsets = [1, 0], sizes = [1, 8], strides = [1, 1]} : vector<2x8xf32> to vector<1x8xf32>
    %457 = vector.broadcast %455 : vector<8x1xf32> to vector<8x8xf32>
    %458 = vector.broadcast %456 : vector<1x8xf32> to vector<8x8xf32>
    %459 = arith.addf %457, %458 : vector<8x8xf32>
    %cst_207 = arith.constant 0.000000e+00 : f32
    %460 = vector.broadcast %cst_207 : f32 to vector<8x8xf32>
    %461 = arith.cmpf ogt, %459, %460 : vector<8x8xf32>
    %cst_208 = arith.constant 0.00999999977 : f32
    %462 = vector.broadcast %cst_208 : f32 to vector<8x8xf32>
    %463 = arith.mulf %462, %459 : vector<8x8xf32>
    %464 = arith.select %461, %459, %463 : vector<8x8xi1>, vector<8x8xf32>
    %465 = arith.addf %464, %1 : vector<8x8xf32>
    %cst_209 = arith.constant dense<0xFF800000> : vector<8xf32>
    %466 = vector.multi_reduction <maximumf>, %465, %cst_209 [1] : vector<8x8xf32> to vector<8xf32>
    %467 = vector.shape_cast %466 : vector<8xf32> to vector<8x1xf32>
    %468 = vector.broadcast %467 : vector<8x1xf32> to vector<8x8xf32>
    %469 = arith.subf %465, %468 : vector<8x8xf32>
    %470 = math.exp %469 : vector<8x8xf32>
    %cst_210 = arith.constant dense<0.000000e+00> : vector<8xf32>
    %471 = vector.multi_reduction <add>, %470, %cst_210 [1] : vector<8x8xf32> to vector<8xf32>
    %472 = vector.shape_cast %471 : vector<8xf32> to vector<8x1xf32>
    %473 = tpu.reciprocal %472 : vector<8x1xf32> -> vector<8x1xf32>
    %474 = vector.broadcast %473 : vector<8x1xf32> to vector<8x8xf32>
    %475 = arith.mulf %470, %474 : vector<8x8xf32>
    %476 = vector.broadcast %16 : vector<1x128xf32> to vector<8x128xf32>
    %477 = arith.mulf %422, %476 : vector<8x128xf32>
    %cst_211 = arith.constant dense<0.000000e+00> : vector<8x128xf32>
    %478 = tpu.matmul %475, %477, %cst_211 {dimension_numbers = #tpu.dot_dimension_numbers<[1], [0], [0], [1], [0, 0, 1, 1], [], []>} : vector<8x8xf32>, vector<8x128xf32>, vector<8x128xf32> -> vector<8x128xf32>
    %479 = arith.addf %454, %478 : vector<8x128xf32>
    %cst_212 = arith.constant 0.000000e+00 : f32
    %480 = vector.broadcast %cst_212 : f32 to vector<8x128xf32>
    %481 = arith.cmpf ogt, %479, %480 : vector<8x128xf32>
    %cst_213 = arith.constant 0.000000e+00 : f32
    %482 = vector.broadcast %cst_213 : f32 to vector<8x128xf32>
    %483 = arith.minimumf %479, %482 : vector<8x128xf32>
    %484 = math.exp %483 : vector<8x128xf32>
    %cst_214 = arith.constant 1.000000e+00 : f32
    %485 = vector.broadcast %cst_214 : f32 to vector<8x128xf32>
    %486 = arith.subf %484, %485 : vector<8x128xf32>
    %487 = arith.select %481, %479, %486 : vector<8x128xi1>, vector<8x128xf32>
    %488 = arith.truncf %487 : vector<8x128xf32> to vector<8x128xbf16>
    %c3_215 = arith.constant 3 : index
    %c0_216 = arith.constant 0 : index
    %c0_217 = arith.constant 0 : index
    %489 = vector.load %arg5[%c3_215, %c0_216, %c0_217] : memref<8x128x128xbf16, #tpu.memory_space<vmem>>, vector<1x128x128xbf16>
    %490 = vector.shape_cast %489 : vector<1x128x128xbf16> to vector<128x128xbf16>
    %cst_218 = arith.constant dense<0.000000e+00> : vector<8x128xf32>
    %491 = tpu.matmul %488, %490, %cst_218 {dimension_numbers = #tpu.dot_dimension_numbers<[1], [0], [0], [1], [0, 0, 1, 1], [], []>} : vector<8x128xbf16>, vector<128x128xbf16>, vector<8x128xf32> -> vector<8x128xf32>
    %c3_219 = arith.constant 3 : index
    %c0_220 = arith.constant 0 : index
    %c0_221 = arith.constant 0 : index
    %492 = vector.load %arg6[%c3_219, %c0_220, %c0_221] : memref<8x1x128xf32, #tpu.memory_space<vmem>>, vector<1x1x128xf32>
    %493 = vector.shape_cast %492 : vector<1x1x128xf32> to vector<1x128xf32>
    %c3_222 = arith.constant 3 : index
    %c0_223 = arith.constant 0 : index
    %c0_224 = arith.constant 0 : index
    %494 = vector.load %arg7[%c3_222, %c0_223, %c0_224] : memref<8x1x128xf32, #tpu.memory_space<vmem>>, vector<1x1x128xf32>
    %495 = vector.shape_cast %494 : vector<1x1x128xf32> to vector<1x128xf32>
    %496 = vector.broadcast %493 : vector<1x128xf32> to vector<8x128xf32>
    %497 = arith.mulf %491, %496 : vector<8x128xf32>
    %cst_225 = arith.constant dense<0.000000e+00> : vector<8xf32>
    %498 = vector.multi_reduction <add>, %497, %cst_225 [1] : vector<8x128xf32> to vector<8xf32>
    %499 = vector.shape_cast %498 : vector<8xf32> to vector<8x1xf32>
    %cst_226 = arith.constant dense<0.000000e+00> : vector<1x8xf32>
    %500 = tpu.matmul %495, %491, %cst_226 {dimension_numbers = #tpu.dot_dimension_numbers<[1], [1], [0], [0], [0, 0, 1, 0], [], []>} : vector<1x128xf32>, vector<8x128xf32>, vector<1x8xf32> -> vector<1x8xf32>
    %501 = vector.broadcast %499 : vector<8x1xf32> to vector<8x8xf32>
    %502 = vector.broadcast %500 : vector<1x8xf32> to vector<8x8xf32>
    %503 = arith.addf %501, %502 : vector<8x8xf32>
    %cst_227 = arith.constant 0.000000e+00 : f32
    %504 = vector.broadcast %cst_227 : f32 to vector<8x8xf32>
    %505 = arith.cmpf ogt, %503, %504 : vector<8x8xf32>
    %cst_228 = arith.constant 0.00999999977 : f32
    %506 = vector.broadcast %cst_228 : f32 to vector<8x8xf32>
    %507 = arith.mulf %506, %503 : vector<8x8xf32>
    %508 = arith.select %505, %503, %507 : vector<8x8xi1>, vector<8x8xf32>
    %509 = arith.addf %508, %1 : vector<8x8xf32>
    %cst_229 = arith.constant dense<0xFF800000> : vector<8xf32>
    %510 = vector.multi_reduction <maximumf>, %509, %cst_229 [1] : vector<8x8xf32> to vector<8xf32>
    %511 = vector.shape_cast %510 : vector<8xf32> to vector<8x1xf32>
    %512 = vector.broadcast %511 : vector<8x1xf32> to vector<8x8xf32>
    %513 = arith.subf %509, %512 : vector<8x8xf32>
    %514 = math.exp %513 : vector<8x8xf32>
    %cst_230 = arith.constant dense<0.000000e+00> : vector<8xf32>
    %515 = vector.multi_reduction <add>, %514, %cst_230 [1] : vector<8x8xf32> to vector<8xf32>
    %516 = vector.shape_cast %515 : vector<8xf32> to vector<8x1xf32>
    %517 = tpu.reciprocal %516 : vector<8x1xf32> -> vector<8x1xf32>
    %518 = vector.broadcast %517 : vector<8x1xf32> to vector<8x8xf32>
    %519 = arith.mulf %514, %518 : vector<8x8xf32>
    %cst_231 = arith.constant dense<0.000000e+00> : vector<8x128xf32>
    %520 = tpu.matmul %519, %491, %cst_231 {dimension_numbers = #tpu.dot_dimension_numbers<[1], [0], [0], [1], [0, 0, 1, 1], [], []>} : vector<8x8xf32>, vector<8x128xf32>, vector<8x128xf32> -> vector<8x128xf32>
    %cst_232 = arith.constant 0.000000e+00 : f32
    %521 = vector.broadcast %cst_232 : f32 to vector<8x128xf32>
    %522 = arith.cmpf ogt, %520, %521 : vector<8x128xf32>
    %cst_233 = arith.constant 0.000000e+00 : f32
    %523 = vector.broadcast %cst_233 : f32 to vector<8x128xf32>
    %524 = arith.minimumf %520, %523 : vector<8x128xf32>
    %525 = math.exp %524 : vector<8x128xf32>
    %cst_234 = arith.constant 1.000000e+00 : f32
    %526 = vector.broadcast %cst_234 : f32 to vector<8x128xf32>
    %527 = arith.subf %525, %526 : vector<8x128xf32>
    %528 = arith.select %522, %520, %527 : vector<8x128xi1>, vector<8x128xf32>
    %529 = arith.truncf %528 : vector<8x128xf32> to vector<8x128xbf16>
    %c3_235 = arith.constant 3 : index
    %c0_236 = arith.constant 0 : index
    %c0_237 = arith.constant 0 : index
    %530 = vector.load %arg8[%c3_235, %c0_236, %c0_237] : memref<8x128x128xbf16, #tpu.memory_space<vmem>>, vector<1x128x128xbf16>
    %531 = vector.shape_cast %530 : vector<1x128x128xbf16> to vector<128x128xbf16>
    %cst_238 = arith.constant dense<0.000000e+00> : vector<8x128xf32>
    %532 = tpu.matmul %529, %531, %cst_238 {dimension_numbers = #tpu.dot_dimension_numbers<[1], [0], [0], [1], [0, 0, 1, 1], [], []>} : vector<8x128xbf16>, vector<128x128xbf16>, vector<8x128xf32> -> vector<8x128xf32>
    %c3_239 = arith.constant 3 : index
    %c0_240 = arith.constant 0 : index
    %c0_241 = arith.constant 0 : index
    %533 = vector.load %arg9[%c3_239, %c0_240, %c0_241] : memref<8x1x128xf32, #tpu.memory_space<vmem>>, vector<1x1x128xf32>
    %534 = vector.shape_cast %533 : vector<1x1x128xf32> to vector<1x128xf32>
    %535 = vector.broadcast %534 : vector<1x128xf32> to vector<8x128xf32>
    %536 = arith.addf %532, %535 : vector<8x128xf32>
    %cst_242 = arith.constant 5.000000e-01 : f32
    %537 = vector.broadcast %cst_242 : f32 to vector<8x128xf32>
    %538 = arith.mulf %537, %536 : vector<8x128xf32>
    %cst_243 = arith.constant 0.707106769 : f32
    %539 = vector.broadcast %cst_243 : f32 to vector<8x128xf32>
    %540 = arith.mulf %536, %539 : vector<8x128xf32>
    %541 = math.erf %540 : vector<8x128xf32>
    %cst_244 = arith.constant 1.000000e+00 : f32
    %542 = vector.broadcast %cst_244 : f32 to vector<8x128xf32>
    %543 = arith.addf %542, %541 : vector<8x128xf32>
    %544 = arith.mulf %538, %543 : vector<8x128xf32>
    %545 = arith.truncf %544 : vector<8x128xf32> to vector<8x128xbf16>
    %c3_245 = arith.constant 3 : index
    %c0_246 = arith.constant 0 : index
    %c0_247 = arith.constant 0 : index
    %546 = vector.load %arg10[%c3_245, %c0_246, %c0_247] : memref<8x128x128xbf16, #tpu.memory_space<vmem>>, vector<1x128x128xbf16>
    %547 = vector.shape_cast %546 : vector<1x128x128xbf16> to vector<128x128xbf16>
    %cst_248 = arith.constant dense<0.000000e+00> : vector<8x128xf32>
    %548 = tpu.matmul %545, %547, %cst_248 {dimension_numbers = #tpu.dot_dimension_numbers<[1], [0], [0], [1], [0, 0, 1, 1], [], []>} : vector<8x128xbf16>, vector<128x128xbf16>, vector<8x128xf32> -> vector<8x128xf32>
    %c3_249 = arith.constant 3 : index
    %c0_250 = arith.constant 0 : index
    %c0_251 = arith.constant 0 : index
    %549 = vector.load %arg11[%c3_249, %c0_250, %c0_251] : memref<8x1x128xf32, #tpu.memory_space<vmem>>, vector<1x1x128xf32>
    %550 = vector.shape_cast %549 : vector<1x1x128xf32> to vector<1x128xf32>
    %551 = vector.broadcast %550 : vector<1x128xf32> to vector<8x128xf32>
    %552 = arith.addf %548, %551 : vector<8x128xf32>
    %553 = arith.truncf %552 : vector<8x128xf32> to vector<8x128xbf16>
    %c4 = arith.constant 4 : index
    %c0_252 = arith.constant 0 : index
    %c0_253 = arith.constant 0 : index
    %554 = vector.load %arg2[%c4, %c0_252, %c0_253] : memref<8x128x128xbf16, #tpu.memory_space<vmem>>, vector<1x128x128xbf16>
    %555 = vector.shape_cast %554 : vector<1x128x128xbf16> to vector<128x128xbf16>
    %cst_254 = arith.constant dense<0.000000e+00> : vector<8x128xf32>
    %556 = tpu.matmul %553, %555, %cst_254 {dimension_numbers = #tpu.dot_dimension_numbers<[1], [0], [0], [1], [0, 0, 1, 1], [], []>} : vector<8x128xbf16>, vector<128x128xbf16>, vector<8x128xf32> -> vector<8x128xf32>
    %c4_255 = arith.constant 4 : index
    %c0_256 = arith.constant 0 : index
    %c0_257 = arith.constant 0 : index
    %557 = vector.load %arg3[%c4_255, %c0_256, %c0_257] : memref<8x2x128xf32, #tpu.memory_space<vmem>>, vector<1x2x128xf32>
    %558 = vector.shape_cast %557 : vector<1x2x128xf32> to vector<2x128xf32>
    %c4_258 = arith.constant 4 : index
    %c0_259 = arith.constant 0 : index
    %c0_260 = arith.constant 0 : index
    %559 = vector.load %arg4[%c4_258, %c0_259, %c0_260] : memref<8x2x128xf32, #tpu.memory_space<vmem>>, vector<1x2x128xf32>
    %560 = vector.shape_cast %559 : vector<1x2x128xf32> to vector<2x128xf32>
    %cst_261 = arith.constant dense<0.000000e+00> : vector<8x2xf32>
    %561 = tpu.matmul %556, %558, %cst_261 {dimension_numbers = #tpu.dot_dimension_numbers<[1], [1], [0], [0], [0, 0, 1, 0], [], []>} : vector<8x128xf32>, vector<2x128xf32>, vector<8x2xf32> -> vector<8x2xf32>
    %cst_262 = arith.constant dense<0.000000e+00> : vector<2x8xf32>
    %562 = tpu.matmul %560, %556, %cst_262 {dimension_numbers = #tpu.dot_dimension_numbers<[1], [1], [0], [0], [0, 0, 1, 0], [], []>} : vector<2x128xf32>, vector<8x128xf32>, vector<2x8xf32> -> vector<2x8xf32>
    %cst_263 = arith.constant 0.000000e+00 : f32
    %563 = vector.broadcast %cst_263 : f32 to vector<8x128xf32>
    %564 = vector.extract_strided_slice %561 {offsets = [0, 0], sizes = [8, 1], strides = [1, 1]} : vector<8x2xf32> to vector<8x1xf32>
    %565 = vector.extract_strided_slice %562 {offsets = [0, 0], sizes = [1, 8], strides = [1, 1]} : vector<2x8xf32> to vector<1x8xf32>
    %566 = vector.broadcast %564 : vector<8x1xf32> to vector<8x8xf32>
    %567 = vector.broadcast %565 : vector<1x8xf32> to vector<8x8xf32>
    %568 = arith.addf %566, %567 : vector<8x8xf32>
    %cst_264 = arith.constant 0.000000e+00 : f32
    %569 = vector.broadcast %cst_264 : f32 to vector<8x8xf32>
    %570 = arith.cmpf ogt, %568, %569 : vector<8x8xf32>
    %cst_265 = arith.constant 0.00999999977 : f32
    %571 = vector.broadcast %cst_265 : f32 to vector<8x8xf32>
    %572 = arith.mulf %571, %568 : vector<8x8xf32>
    %573 = arith.select %570, %568, %572 : vector<8x8xi1>, vector<8x8xf32>
    %574 = arith.addf %573, %1 : vector<8x8xf32>
    %cst_266 = arith.constant dense<0xFF800000> : vector<8xf32>
    %575 = vector.multi_reduction <maximumf>, %574, %cst_266 [1] : vector<8x8xf32> to vector<8xf32>
    %576 = vector.shape_cast %575 : vector<8xf32> to vector<8x1xf32>
    %577 = vector.broadcast %576 : vector<8x1xf32> to vector<8x8xf32>
    %578 = arith.subf %574, %577 : vector<8x8xf32>
    %579 = math.exp %578 : vector<8x8xf32>
    %cst_267 = arith.constant dense<0.000000e+00> : vector<8xf32>
    %580 = vector.multi_reduction <add>, %579, %cst_267 [1] : vector<8x8xf32> to vector<8xf32>
    %581 = vector.shape_cast %580 : vector<8xf32> to vector<8x1xf32>
    %582 = tpu.reciprocal %581 : vector<8x1xf32> -> vector<8x1xf32>
    %583 = vector.broadcast %582 : vector<8x1xf32> to vector<8x8xf32>
    %584 = arith.mulf %579, %583 : vector<8x8xf32>
    %585 = vector.broadcast %9 : vector<1x128xf32> to vector<8x128xf32>
    %586 = arith.mulf %556, %585 : vector<8x128xf32>
    %cst_268 = arith.constant dense<0.000000e+00> : vector<8x128xf32>
    %587 = tpu.matmul %584, %586, %cst_268 {dimension_numbers = #tpu.dot_dimension_numbers<[1], [0], [0], [1], [0, 0, 1, 1], [], []>} : vector<8x8xf32>, vector<8x128xf32>, vector<8x128xf32> -> vector<8x128xf32>
    %588 = arith.addf %563, %587 : vector<8x128xf32>
    %589 = vector.extract_strided_slice %561 {offsets = [0, 1], sizes = [8, 1], strides = [1, 1]} : vector<8x2xf32> to vector<8x1xf32>
    %590 = vector.extract_strided_slice %562 {offsets = [1, 0], sizes = [1, 8], strides = [1, 1]} : vector<2x8xf32> to vector<1x8xf32>
    %591 = vector.broadcast %589 : vector<8x1xf32> to vector<8x8xf32>
    %592 = vector.broadcast %590 : vector<1x8xf32> to vector<8x8xf32>
    %593 = arith.addf %591, %592 : vector<8x8xf32>
    %cst_269 = arith.constant 0.000000e+00 : f32
    %594 = vector.broadcast %cst_269 : f32 to vector<8x8xf32>
    %595 = arith.cmpf ogt, %593, %594 : vector<8x8xf32>
    %cst_270 = arith.constant 0.00999999977 : f32
    %596 = vector.broadcast %cst_270 : f32 to vector<8x8xf32>
    %597 = arith.mulf %596, %593 : vector<8x8xf32>
    %598 = arith.select %595, %593, %597 : vector<8x8xi1>, vector<8x8xf32>
    %599 = arith.addf %598, %1 : vector<8x8xf32>
    %cst_271 = arith.constant dense<0xFF800000> : vector<8xf32>
    %600 = vector.multi_reduction <maximumf>, %599, %cst_271 [1] : vector<8x8xf32> to vector<8xf32>
    %601 = vector.shape_cast %600 : vector<8xf32> to vector<8x1xf32>
    %602 = vector.broadcast %601 : vector<8x1xf32> to vector<8x8xf32>
    %603 = arith.subf %599, %602 : vector<8x8xf32>
    %604 = math.exp %603 : vector<8x8xf32>
    %cst_272 = arith.constant dense<0.000000e+00> : vector<8xf32>
    %605 = vector.multi_reduction <add>, %604, %cst_272 [1] : vector<8x8xf32> to vector<8xf32>
    %606 = vector.shape_cast %605 : vector<8xf32> to vector<8x1xf32>
    %607 = tpu.reciprocal %606 : vector<8x1xf32> -> vector<8x1xf32>
    %608 = vector.broadcast %607 : vector<8x1xf32> to vector<8x8xf32>
    %609 = arith.mulf %604, %608 : vector<8x8xf32>
    %610 = vector.broadcast %16 : vector<1x128xf32> to vector<8x128xf32>
    %611 = arith.mulf %556, %610 : vector<8x128xf32>
    %cst_273 = arith.constant dense<0.000000e+00> : vector<8x128xf32>
    %612 = tpu.matmul %609, %611, %cst_273 {dimension_numbers = #tpu.dot_dimension_numbers<[1], [0], [0], [1], [0, 0, 1, 1], [], []>} : vector<8x8xf32>, vector<8x128xf32>, vector<8x128xf32> -> vector<8x128xf32>
    %613 = arith.addf %588, %612 : vector<8x128xf32>
    %cst_274 = arith.constant 0.000000e+00 : f32
    %614 = vector.broadcast %cst_274 : f32 to vector<8x128xf32>
    %615 = arith.cmpf ogt, %613, %614 : vector<8x128xf32>
    %cst_275 = arith.constant 0.000000e+00 : f32
    %616 = vector.broadcast %cst_275 : f32 to vector<8x128xf32>
    %617 = arith.minimumf %613, %616 : vector<8x128xf32>
    %618 = math.exp %617 : vector<8x128xf32>
    %cst_276 = arith.constant 1.000000e+00 : f32
    %619 = vector.broadcast %cst_276 : f32 to vector<8x128xf32>
    %620 = arith.subf %618, %619 : vector<8x128xf32>
    %621 = arith.select %615, %613, %620 : vector<8x128xi1>, vector<8x128xf32>
    %622 = arith.truncf %621 : vector<8x128xf32> to vector<8x128xbf16>
    %c4_277 = arith.constant 4 : index
    %c0_278 = arith.constant 0 : index
    %c0_279 = arith.constant 0 : index
    %623 = vector.load %arg5[%c4_277, %c0_278, %c0_279] : memref<8x128x128xbf16, #tpu.memory_space<vmem>>, vector<1x128x128xbf16>
    %624 = vector.shape_cast %623 : vector<1x128x128xbf16> to vector<128x128xbf16>
    %cst_280 = arith.constant dense<0.000000e+00> : vector<8x128xf32>
    %625 = tpu.matmul %622, %624, %cst_280 {dimension_numbers = #tpu.dot_dimension_numbers<[1], [0], [0], [1], [0, 0, 1, 1], [], []>} : vector<8x128xbf16>, vector<128x128xbf16>, vector<8x128xf32> -> vector<8x128xf32>
    %c4_281 = arith.constant 4 : index
    %c0_282 = arith.constant 0 : index
    %c0_283 = arith.constant 0 : index
    %626 = vector.load %arg6[%c4_281, %c0_282, %c0_283] : memref<8x1x128xf32, #tpu.memory_space<vmem>>, vector<1x1x128xf32>
    %627 = vector.shape_cast %626 : vector<1x1x128xf32> to vector<1x128xf32>
    %c4_284 = arith.constant 4 : index
    %c0_285 = arith.constant 0 : index
    %c0_286 = arith.constant 0 : index
    %628 = vector.load %arg7[%c4_284, %c0_285, %c0_286] : memref<8x1x128xf32, #tpu.memory_space<vmem>>, vector<1x1x128xf32>
    %629 = vector.shape_cast %628 : vector<1x1x128xf32> to vector<1x128xf32>
    %630 = vector.broadcast %627 : vector<1x128xf32> to vector<8x128xf32>
    %631 = arith.mulf %625, %630 : vector<8x128xf32>
    %cst_287 = arith.constant dense<0.000000e+00> : vector<8xf32>
    %632 = vector.multi_reduction <add>, %631, %cst_287 [1] : vector<8x128xf32> to vector<8xf32>
    %633 = vector.shape_cast %632 : vector<8xf32> to vector<8x1xf32>
    %cst_288 = arith.constant dense<0.000000e+00> : vector<1x8xf32>
    %634 = tpu.matmul %629, %625, %cst_288 {dimension_numbers = #tpu.dot_dimension_numbers<[1], [1], [0], [0], [0, 0, 1, 0], [], []>} : vector<1x128xf32>, vector<8x128xf32>, vector<1x8xf32> -> vector<1x8xf32>
    %635 = vector.broadcast %633 : vector<8x1xf32> to vector<8x8xf32>
    %636 = vector.broadcast %634 : vector<1x8xf32> to vector<8x8xf32>
    %637 = arith.addf %635, %636 : vector<8x8xf32>
    %cst_289 = arith.constant 0.000000e+00 : f32
    %638 = vector.broadcast %cst_289 : f32 to vector<8x8xf32>
    %639 = arith.cmpf ogt, %637, %638 : vector<8x8xf32>
    %cst_290 = arith.constant 0.00999999977 : f32
    %640 = vector.broadcast %cst_290 : f32 to vector<8x8xf32>
    %641 = arith.mulf %640, %637 : vector<8x8xf32>
    %642 = arith.select %639, %637, %641 : vector<8x8xi1>, vector<8x8xf32>
    %643 = arith.addf %642, %1 : vector<8x8xf32>
    %cst_291 = arith.constant dense<0xFF800000> : vector<8xf32>
    %644 = vector.multi_reduction <maximumf>, %643, %cst_291 [1] : vector<8x8xf32> to vector<8xf32>
    %645 = vector.shape_cast %644 : vector<8xf32> to vector<8x1xf32>
    %646 = vector.broadcast %645 : vector<8x1xf32> to vector<8x8xf32>
    %647 = arith.subf %643, %646 : vector<8x8xf32>
    %648 = math.exp %647 : vector<8x8xf32>
    %cst_292 = arith.constant dense<0.000000e+00> : vector<8xf32>
    %649 = vector.multi_reduction <add>, %648, %cst_292 [1] : vector<8x8xf32> to vector<8xf32>
    %650 = vector.shape_cast %649 : vector<8xf32> to vector<8x1xf32>
    %651 = tpu.reciprocal %650 : vector<8x1xf32> -> vector<8x1xf32>
    %652 = vector.broadcast %651 : vector<8x1xf32> to vector<8x8xf32>
    %653 = arith.mulf %648, %652 : vector<8x8xf32>
    %cst_293 = arith.constant dense<0.000000e+00> : vector<8x128xf32>
    %654 = tpu.matmul %653, %625, %cst_293 {dimension_numbers = #tpu.dot_dimension_numbers<[1], [0], [0], [1], [0, 0, 1, 1], [], []>} : vector<8x8xf32>, vector<8x128xf32>, vector<8x128xf32> -> vector<8x128xf32>
    %cst_294 = arith.constant 0.000000e+00 : f32
    %655 = vector.broadcast %cst_294 : f32 to vector<8x128xf32>
    %656 = arith.cmpf ogt, %654, %655 : vector<8x128xf32>
    %cst_295 = arith.constant 0.000000e+00 : f32
    %657 = vector.broadcast %cst_295 : f32 to vector<8x128xf32>
    %658 = arith.minimumf %654, %657 : vector<8x128xf32>
    %659 = math.exp %658 : vector<8x128xf32>
    %cst_296 = arith.constant 1.000000e+00 : f32
    %660 = vector.broadcast %cst_296 : f32 to vector<8x128xf32>
    %661 = arith.subf %659, %660 : vector<8x128xf32>
    %662 = arith.select %656, %654, %661 : vector<8x128xi1>, vector<8x128xf32>
    %663 = arith.truncf %662 : vector<8x128xf32> to vector<8x128xbf16>
    %c4_297 = arith.constant 4 : index
    %c0_298 = arith.constant 0 : index
    %c0_299 = arith.constant 0 : index
    %664 = vector.load %arg8[%c4_297, %c0_298, %c0_299] : memref<8x128x128xbf16, #tpu.memory_space<vmem>>, vector<1x128x128xbf16>
    %665 = vector.shape_cast %664 : vector<1x128x128xbf16> to vector<128x128xbf16>
    %cst_300 = arith.constant dense<0.000000e+00> : vector<8x128xf32>
    %666 = tpu.matmul %663, %665, %cst_300 {dimension_numbers = #tpu.dot_dimension_numbers<[1], [0], [0], [1], [0, 0, 1, 1], [], []>} : vector<8x128xbf16>, vector<128x128xbf16>, vector<8x128xf32> -> vector<8x128xf32>
    %c4_301 = arith.constant 4 : index
    %c0_302 = arith.constant 0 : index
    %c0_303 = arith.constant 0 : index
    %667 = vector.load %arg9[%c4_301, %c0_302, %c0_303] : memref<8x1x128xf32, #tpu.memory_space<vmem>>, vector<1x1x128xf32>
    %668 = vector.shape_cast %667 : vector<1x1x128xf32> to vector<1x128xf32>
    %669 = vector.broadcast %668 : vector<1x128xf32> to vector<8x128xf32>
    %670 = arith.addf %666, %669 : vector<8x128xf32>
    %cst_304 = arith.constant 5.000000e-01 : f32
    %671 = vector.broadcast %cst_304 : f32 to vector<8x128xf32>
    %672 = arith.mulf %671, %670 : vector<8x128xf32>
    %cst_305 = arith.constant 0.707106769 : f32
    %673 = vector.broadcast %cst_305 : f32 to vector<8x128xf32>
    %674 = arith.mulf %670, %673 : vector<8x128xf32>
    %675 = math.erf %674 : vector<8x128xf32>
    %cst_306 = arith.constant 1.000000e+00 : f32
    %676 = vector.broadcast %cst_306 : f32 to vector<8x128xf32>
    %677 = arith.addf %676, %675 : vector<8x128xf32>
    %678 = arith.mulf %672, %677 : vector<8x128xf32>
    %679 = arith.truncf %678 : vector<8x128xf32> to vector<8x128xbf16>
    %c4_307 = arith.constant 4 : index
    %c0_308 = arith.constant 0 : index
    %c0_309 = arith.constant 0 : index
    %680 = vector.load %arg10[%c4_307, %c0_308, %c0_309] : memref<8x128x128xbf16, #tpu.memory_space<vmem>>, vector<1x128x128xbf16>
    %681 = vector.shape_cast %680 : vector<1x128x128xbf16> to vector<128x128xbf16>
    %cst_310 = arith.constant dense<0.000000e+00> : vector<8x128xf32>
    %682 = tpu.matmul %679, %681, %cst_310 {dimension_numbers = #tpu.dot_dimension_numbers<[1], [0], [0], [1], [0, 0, 1, 1], [], []>} : vector<8x128xbf16>, vector<128x128xbf16>, vector<8x128xf32> -> vector<8x128xf32>
    %c4_311 = arith.constant 4 : index
    %c0_312 = arith.constant 0 : index
    %c0_313 = arith.constant 0 : index
    %683 = vector.load %arg11[%c4_311, %c0_312, %c0_313] : memref<8x1x128xf32, #tpu.memory_space<vmem>>, vector<1x1x128xf32>
    %684 = vector.shape_cast %683 : vector<1x1x128xf32> to vector<1x128xf32>
    %685 = vector.broadcast %684 : vector<1x128xf32> to vector<8x128xf32>
    %686 = arith.addf %682, %685 : vector<8x128xf32>
    %687 = arith.truncf %686 : vector<8x128xf32> to vector<8x128xbf16>
    %c5 = arith.constant 5 : index
    %c0_314 = arith.constant 0 : index
    %c0_315 = arith.constant 0 : index
    %688 = vector.load %arg2[%c5, %c0_314, %c0_315] : memref<8x128x128xbf16, #tpu.memory_space<vmem>>, vector<1x128x128xbf16>
    %689 = vector.shape_cast %688 : vector<1x128x128xbf16> to vector<128x128xbf16>
    %cst_316 = arith.constant dense<0.000000e+00> : vector<8x128xf32>
    %690 = tpu.matmul %687, %689, %cst_316 {dimension_numbers = #tpu.dot_dimension_numbers<[1], [0], [0], [1], [0, 0, 1, 1], [], []>} : vector<8x128xbf16>, vector<128x128xbf16>, vector<8x128xf32> -> vector<8x128xf32>
    %c5_317 = arith.constant 5 : index
    %c0_318 = arith.constant 0 : index
    %c0_319 = arith.constant 0 : index
    %691 = vector.load %arg3[%c5_317, %c0_318, %c0_319] : memref<8x2x128xf32, #tpu.memory_space<vmem>>, vector<1x2x128xf32>
    %692 = vector.shape_cast %691 : vector<1x2x128xf32> to vector<2x128xf32>
    %c5_320 = arith.constant 5 : index
    %c0_321 = arith.constant 0 : index
    %c0_322 = arith.constant 0 : index
    %693 = vector.load %arg4[%c5_320, %c0_321, %c0_322] : memref<8x2x128xf32, #tpu.memory_space<vmem>>, vector<1x2x128xf32>
    %694 = vector.shape_cast %693 : vector<1x2x128xf32> to vector<2x128xf32>
    %cst_323 = arith.constant dense<0.000000e+00> : vector<8x2xf32>
    %695 = tpu.matmul %690, %692, %cst_323 {dimension_numbers = #tpu.dot_dimension_numbers<[1], [1], [0], [0], [0, 0, 1, 0], [], []>} : vector<8x128xf32>, vector<2x128xf32>, vector<8x2xf32> -> vector<8x2xf32>
    %cst_324 = arith.constant dense<0.000000e+00> : vector<2x8xf32>
    %696 = tpu.matmul %694, %690, %cst_324 {dimension_numbers = #tpu.dot_dimension_numbers<[1], [1], [0], [0], [0, 0, 1, 0], [], []>} : vector<2x128xf32>, vector<8x128xf32>, vector<2x8xf32> -> vector<2x8xf32>
    %cst_325 = arith.constant 0.000000e+00 : f32
    %697 = vector.broadcast %cst_325 : f32 to vector<8x128xf32>
    %698 = vector.extract_strided_slice %695 {offsets = [0, 0], sizes = [8, 1], strides = [1, 1]} : vector<8x2xf32> to vector<8x1xf32>
    %699 = vector.extract_strided_slice %696 {offsets = [0, 0], sizes = [1, 8], strides = [1, 1]} : vector<2x8xf32> to vector<1x8xf32>
    %700 = vector.broadcast %698 : vector<8x1xf32> to vector<8x8xf32>
    %701 = vector.broadcast %699 : vector<1x8xf32> to vector<8x8xf32>
    %702 = arith.addf %700, %701 : vector<8x8xf32>
    %cst_326 = arith.constant 0.000000e+00 : f32
    %703 = vector.broadcast %cst_326 : f32 to vector<8x8xf32>
    %704 = arith.cmpf ogt, %702, %703 : vector<8x8xf32>
    %cst_327 = arith.constant 0.00999999977 : f32
    %705 = vector.broadcast %cst_327 : f32 to vector<8x8xf32>
    %706 = arith.mulf %705, %702 : vector<8x8xf32>
    %707 = arith.select %704, %702, %706 : vector<8x8xi1>, vector<8x8xf32>
    %708 = arith.addf %707, %1 : vector<8x8xf32>
    %cst_328 = arith.constant dense<0xFF800000> : vector<8xf32>
    %709 = vector.multi_reduction <maximumf>, %708, %cst_328 [1] : vector<8x8xf32> to vector<8xf32>
    %710 = vector.shape_cast %709 : vector<8xf32> to vector<8x1xf32>
    %711 = vector.broadcast %710 : vector<8x1xf32> to vector<8x8xf32>
    %712 = arith.subf %708, %711 : vector<8x8xf32>
    %713 = math.exp %712 : vector<8x8xf32>
    %cst_329 = arith.constant dense<0.000000e+00> : vector<8xf32>
    %714 = vector.multi_reduction <add>, %713, %cst_329 [1] : vector<8x8xf32> to vector<8xf32>
    %715 = vector.shape_cast %714 : vector<8xf32> to vector<8x1xf32>
    %716 = tpu.reciprocal %715 : vector<8x1xf32> -> vector<8x1xf32>
    %717 = vector.broadcast %716 : vector<8x1xf32> to vector<8x8xf32>
    %718 = arith.mulf %713, %717 : vector<8x8xf32>
    %719 = vector.broadcast %9 : vector<1x128xf32> to vector<8x128xf32>
    %720 = arith.mulf %690, %719 : vector<8x128xf32>
    %cst_330 = arith.constant dense<0.000000e+00> : vector<8x128xf32>
    %721 = tpu.matmul %718, %720, %cst_330 {dimension_numbers = #tpu.dot_dimension_numbers<[1], [0], [0], [1], [0, 0, 1, 1], [], []>} : vector<8x8xf32>, vector<8x128xf32>, vector<8x128xf32> -> vector<8x128xf32>
    %722 = arith.addf %697, %721 : vector<8x128xf32>
    %723 = vector.extract_strided_slice %695 {offsets = [0, 1], sizes = [8, 1], strides = [1, 1]} : vector<8x2xf32> to vector<8x1xf32>
    %724 = vector.extract_strided_slice %696 {offsets = [1, 0], sizes = [1, 8], strides = [1, 1]} : vector<2x8xf32> to vector<1x8xf32>
    %725 = vector.broadcast %723 : vector<8x1xf32> to vector<8x8xf32>
    %726 = vector.broadcast %724 : vector<1x8xf32> to vector<8x8xf32>
    %727 = arith.addf %725, %726 : vector<8x8xf32>
    %cst_331 = arith.constant 0.000000e+00 : f32
    %728 = vector.broadcast %cst_331 : f32 to vector<8x8xf32>
    %729 = arith.cmpf ogt, %727, %728 : vector<8x8xf32>
    %cst_332 = arith.constant 0.00999999977 : f32
    %730 = vector.broadcast %cst_332 : f32 to vector<8x8xf32>
    %731 = arith.mulf %730, %727 : vector<8x8xf32>
    %732 = arith.select %729, %727, %731 : vector<8x8xi1>, vector<8x8xf32>
    %733 = arith.addf %732, %1 : vector<8x8xf32>
    %cst_333 = arith.constant dense<0xFF800000> : vector<8xf32>
    %734 = vector.multi_reduction <maximumf>, %733, %cst_333 [1] : vector<8x8xf32> to vector<8xf32>
    %735 = vector.shape_cast %734 : vector<8xf32> to vector<8x1xf32>
    %736 = vector.broadcast %735 : vector<8x1xf32> to vector<8x8xf32>
    %737 = arith.subf %733, %736 : vector<8x8xf32>
    %738 = math.exp %737 : vector<8x8xf32>
    %cst_334 = arith.constant dense<0.000000e+00> : vector<8xf32>
    %739 = vector.multi_reduction <add>, %738, %cst_334 [1] : vector<8x8xf32> to vector<8xf32>
    %740 = vector.shape_cast %739 : vector<8xf32> to vector<8x1xf32>
    %741 = tpu.reciprocal %740 : vector<8x1xf32> -> vector<8x1xf32>
    %742 = vector.broadcast %741 : vector<8x1xf32> to vector<8x8xf32>
    %743 = arith.mulf %738, %742 : vector<8x8xf32>
    %744 = vector.broadcast %16 : vector<1x128xf32> to vector<8x128xf32>
    %745 = arith.mulf %690, %744 : vector<8x128xf32>
    %cst_335 = arith.constant dense<0.000000e+00> : vector<8x128xf32>
    %746 = tpu.matmul %743, %745, %cst_335 {dimension_numbers = #tpu.dot_dimension_numbers<[1], [0], [0], [1], [0, 0, 1, 1], [], []>} : vector<8x8xf32>, vector<8x128xf32>, vector<8x128xf32> -> vector<8x128xf32>
    %747 = arith.addf %722, %746 : vector<8x128xf32>
    %cst_336 = arith.constant 0.000000e+00 : f32
    %748 = vector.broadcast %cst_336 : f32 to vector<8x128xf32>
    %749 = arith.cmpf ogt, %747, %748 : vector<8x128xf32>
    %cst_337 = arith.constant 0.000000e+00 : f32
    %750 = vector.broadcast %cst_337 : f32 to vector<8x128xf32>
    %751 = arith.minimumf %747, %750 : vector<8x128xf32>
    %752 = math.exp %751 : vector<8x128xf32>
    %cst_338 = arith.constant 1.000000e+00 : f32
    %753 = vector.broadcast %cst_338 : f32 to vector<8x128xf32>
    %754 = arith.subf %752, %753 : vector<8x128xf32>
    %755 = arith.select %749, %747, %754 : vector<8x128xi1>, vector<8x128xf32>
    %756 = arith.truncf %755 : vector<8x128xf32> to vector<8x128xbf16>
    %c5_339 = arith.constant 5 : index
    %c0_340 = arith.constant 0 : index
    %c0_341 = arith.constant 0 : index
    %757 = vector.load %arg5[%c5_339, %c0_340, %c0_341] : memref<8x128x128xbf16, #tpu.memory_space<vmem>>, vector<1x128x128xbf16>
    %758 = vector.shape_cast %757 : vector<1x128x128xbf16> to vector<128x128xbf16>
    %cst_342 = arith.constant dense<0.000000e+00> : vector<8x128xf32>
    %759 = tpu.matmul %756, %758, %cst_342 {dimension_numbers = #tpu.dot_dimension_numbers<[1], [0], [0], [1], [0, 0, 1, 1], [], []>} : vector<8x128xbf16>, vector<128x128xbf16>, vector<8x128xf32> -> vector<8x128xf32>
    %c5_343 = arith.constant 5 : index
    %c0_344 = arith.constant 0 : index
    %c0_345 = arith.constant 0 : index
    %760 = vector.load %arg6[%c5_343, %c0_344, %c0_345] : memref<8x1x128xf32, #tpu.memory_space<vmem>>, vector<1x1x128xf32>
    %761 = vector.shape_cast %760 : vector<1x1x128xf32> to vector<1x128xf32>
    %c5_346 = arith.constant 5 : index
    %c0_347 = arith.constant 0 : index
    %c0_348 = arith.constant 0 : index
    %762 = vector.load %arg7[%c5_346, %c0_347, %c0_348] : memref<8x1x128xf32, #tpu.memory_space<vmem>>, vector<1x1x128xf32>
    %763 = vector.shape_cast %762 : vector<1x1x128xf32> to vector<1x128xf32>
    %764 = vector.broadcast %761 : vector<1x128xf32> to vector<8x128xf32>
    %765 = arith.mulf %759, %764 : vector<8x128xf32>
    %cst_349 = arith.constant dense<0.000000e+00> : vector<8xf32>
    %766 = vector.multi_reduction <add>, %765, %cst_349 [1] : vector<8x128xf32> to vector<8xf32>
    %767 = vector.shape_cast %766 : vector<8xf32> to vector<8x1xf32>
    %cst_350 = arith.constant dense<0.000000e+00> : vector<1x8xf32>
    %768 = tpu.matmul %763, %759, %cst_350 {dimension_numbers = #tpu.dot_dimension_numbers<[1], [1], [0], [0], [0, 0, 1, 0], [], []>} : vector<1x128xf32>, vector<8x128xf32>, vector<1x8xf32> -> vector<1x8xf32>
    %769 = vector.broadcast %767 : vector<8x1xf32> to vector<8x8xf32>
    %770 = vector.broadcast %768 : vector<1x8xf32> to vector<8x8xf32>
    %771 = arith.addf %769, %770 : vector<8x8xf32>
    %cst_351 = arith.constant 0.000000e+00 : f32
    %772 = vector.broadcast %cst_351 : f32 to vector<8x8xf32>
    %773 = arith.cmpf ogt, %771, %772 : vector<8x8xf32>
    %cst_352 = arith.constant 0.00999999977 : f32
    %774 = vector.broadcast %cst_352 : f32 to vector<8x8xf32>
    %775 = arith.mulf %774, %771 : vector<8x8xf32>
    %776 = arith.select %773, %771, %775 : vector<8x8xi1>, vector<8x8xf32>
    %777 = arith.addf %776, %1 : vector<8x8xf32>
    %cst_353 = arith.constant dense<0xFF800000> : vector<8xf32>
    %778 = vector.multi_reduction <maximumf>, %777, %cst_353 [1] : vector<8x8xf32> to vector<8xf32>
    %779 = vector.shape_cast %778 : vector<8xf32> to vector<8x1xf32>
    %780 = vector.broadcast %779 : vector<8x1xf32> to vector<8x8xf32>
    %781 = arith.subf %777, %780 : vector<8x8xf32>
    %782 = math.exp %781 : vector<8x8xf32>
    %cst_354 = arith.constant dense<0.000000e+00> : vector<8xf32>
    %783 = vector.multi_reduction <add>, %782, %cst_354 [1] : vector<8x8xf32> to vector<8xf32>
    %784 = vector.shape_cast %783 : vector<8xf32> to vector<8x1xf32>
    %785 = tpu.reciprocal %784 : vector<8x1xf32> -> vector<8x1xf32>
    %786 = vector.broadcast %785 : vector<8x1xf32> to vector<8x8xf32>
    %787 = arith.mulf %782, %786 : vector<8x8xf32>
    %cst_355 = arith.constant dense<0.000000e+00> : vector<8x128xf32>
    %788 = tpu.matmul %787, %759, %cst_355 {dimension_numbers = #tpu.dot_dimension_numbers<[1], [0], [0], [1], [0, 0, 1, 1], [], []>} : vector<8x8xf32>, vector<8x128xf32>, vector<8x128xf32> -> vector<8x128xf32>
    %cst_356 = arith.constant 0.000000e+00 : f32
    %789 = vector.broadcast %cst_356 : f32 to vector<8x128xf32>
    %790 = arith.cmpf ogt, %788, %789 : vector<8x128xf32>
    %cst_357 = arith.constant 0.000000e+00 : f32
    %791 = vector.broadcast %cst_357 : f32 to vector<8x128xf32>
    %792 = arith.minimumf %788, %791 : vector<8x128xf32>
    %793 = math.exp %792 : vector<8x128xf32>
    %cst_358 = arith.constant 1.000000e+00 : f32
    %794 = vector.broadcast %cst_358 : f32 to vector<8x128xf32>
    %795 = arith.subf %793, %794 : vector<8x128xf32>
    %796 = arith.select %790, %788, %795 : vector<8x128xi1>, vector<8x128xf32>
    %797 = arith.truncf %796 : vector<8x128xf32> to vector<8x128xbf16>
    %c5_359 = arith.constant 5 : index
    %c0_360 = arith.constant 0 : index
    %c0_361 = arith.constant 0 : index
    %798 = vector.load %arg8[%c5_359, %c0_360, %c0_361] : memref<8x128x128xbf16, #tpu.memory_space<vmem>>, vector<1x128x128xbf16>
    %799 = vector.shape_cast %798 : vector<1x128x128xbf16> to vector<128x128xbf16>
    %cst_362 = arith.constant dense<0.000000e+00> : vector<8x128xf32>
    %800 = tpu.matmul %797, %799, %cst_362 {dimension_numbers = #tpu.dot_dimension_numbers<[1], [0], [0], [1], [0, 0, 1, 1], [], []>} : vector<8x128xbf16>, vector<128x128xbf16>, vector<8x128xf32> -> vector<8x128xf32>
    %c5_363 = arith.constant 5 : index
    %c0_364 = arith.constant 0 : index
    %c0_365 = arith.constant 0 : index
    %801 = vector.load %arg9[%c5_363, %c0_364, %c0_365] : memref<8x1x128xf32, #tpu.memory_space<vmem>>, vector<1x1x128xf32>
    %802 = vector.shape_cast %801 : vector<1x1x128xf32> to vector<1x128xf32>
    %803 = vector.broadcast %802 : vector<1x128xf32> to vector<8x128xf32>
    %804 = arith.addf %800, %803 : vector<8x128xf32>
    %cst_366 = arith.constant 5.000000e-01 : f32
    %805 = vector.broadcast %cst_366 : f32 to vector<8x128xf32>
    %806 = arith.mulf %805, %804 : vector<8x128xf32>
    %cst_367 = arith.constant 0.707106769 : f32
    %807 = vector.broadcast %cst_367 : f32 to vector<8x128xf32>
    %808 = arith.mulf %804, %807 : vector<8x128xf32>
    %809 = math.erf %808 : vector<8x128xf32>
    %cst_368 = arith.constant 1.000000e+00 : f32
    %810 = vector.broadcast %cst_368 : f32 to vector<8x128xf32>
    %811 = arith.addf %810, %809 : vector<8x128xf32>
    %812 = arith.mulf %806, %811 : vector<8x128xf32>
    %813 = arith.truncf %812 : vector<8x128xf32> to vector<8x128xbf16>
    %c5_369 = arith.constant 5 : index
    %c0_370 = arith.constant 0 : index
    %c0_371 = arith.constant 0 : index
    %814 = vector.load %arg10[%c5_369, %c0_370, %c0_371] : memref<8x128x128xbf16, #tpu.memory_space<vmem>>, vector<1x128x128xbf16>
    %815 = vector.shape_cast %814 : vector<1x128x128xbf16> to vector<128x128xbf16>
    %cst_372 = arith.constant dense<0.000000e+00> : vector<8x128xf32>
    %816 = tpu.matmul %813, %815, %cst_372 {dimension_numbers = #tpu.dot_dimension_numbers<[1], [0], [0], [1], [0, 0, 1, 1], [], []>} : vector<8x128xbf16>, vector<128x128xbf16>, vector<8x128xf32> -> vector<8x128xf32>
    %c5_373 = arith.constant 5 : index
    %c0_374 = arith.constant 0 : index
    %c0_375 = arith.constant 0 : index
    %817 = vector.load %arg11[%c5_373, %c0_374, %c0_375] : memref<8x1x128xf32, #tpu.memory_space<vmem>>, vector<1x1x128xf32>
    %818 = vector.shape_cast %817 : vector<1x1x128xf32> to vector<1x128xf32>
    %819 = vector.broadcast %818 : vector<1x128xf32> to vector<8x128xf32>
    %820 = arith.addf %816, %819 : vector<8x128xf32>
    %821 = arith.truncf %820 : vector<8x128xf32> to vector<8x128xbf16>
    %c6 = arith.constant 6 : index
    %c0_376 = arith.constant 0 : index
    %c0_377 = arith.constant 0 : index
    %822 = vector.load %arg2[%c6, %c0_376, %c0_377] : memref<8x128x128xbf16, #tpu.memory_space<vmem>>, vector<1x128x128xbf16>
    %823 = vector.shape_cast %822 : vector<1x128x128xbf16> to vector<128x128xbf16>
    %cst_378 = arith.constant dense<0.000000e+00> : vector<8x128xf32>
    %824 = tpu.matmul %821, %823, %cst_378 {dimension_numbers = #tpu.dot_dimension_numbers<[1], [0], [0], [1], [0, 0, 1, 1], [], []>} : vector<8x128xbf16>, vector<128x128xbf16>, vector<8x128xf32> -> vector<8x128xf32>
    %c6_379 = arith.constant 6 : index
    %c0_380 = arith.constant 0 : index
    %c0_381 = arith.constant 0 : index
    %825 = vector.load %arg3[%c6_379, %c0_380, %c0_381] : memref<8x2x128xf32, #tpu.memory_space<vmem>>, vector<1x2x128xf32>
    %826 = vector.shape_cast %825 : vector<1x2x128xf32> to vector<2x128xf32>
    %c6_382 = arith.constant 6 : index
    %c0_383 = arith.constant 0 : index
    %c0_384 = arith.constant 0 : index
    %827 = vector.load %arg4[%c6_382, %c0_383, %c0_384] : memref<8x2x128xf32, #tpu.memory_space<vmem>>, vector<1x2x128xf32>
    %828 = vector.shape_cast %827 : vector<1x2x128xf32> to vector<2x128xf32>
    %cst_385 = arith.constant dense<0.000000e+00> : vector<8x2xf32>
    %829 = tpu.matmul %824, %826, %cst_385 {dimension_numbers = #tpu.dot_dimension_numbers<[1], [1], [0], [0], [0, 0, 1, 0], [], []>} : vector<8x128xf32>, vector<2x128xf32>, vector<8x2xf32> -> vector<8x2xf32>
    %cst_386 = arith.constant dense<0.000000e+00> : vector<2x8xf32>
    %830 = tpu.matmul %828, %824, %cst_386 {dimension_numbers = #tpu.dot_dimension_numbers<[1], [1], [0], [0], [0, 0, 1, 0], [], []>} : vector<2x128xf32>, vector<8x128xf32>, vector<2x8xf32> -> vector<2x8xf32>
    %cst_387 = arith.constant 0.000000e+00 : f32
    %831 = vector.broadcast %cst_387 : f32 to vector<8x128xf32>
    %832 = vector.extract_strided_slice %829 {offsets = [0, 0], sizes = [8, 1], strides = [1, 1]} : vector<8x2xf32> to vector<8x1xf32>
    %833 = vector.extract_strided_slice %830 {offsets = [0, 0], sizes = [1, 8], strides = [1, 1]} : vector<2x8xf32> to vector<1x8xf32>
    %834 = vector.broadcast %832 : vector<8x1xf32> to vector<8x8xf32>
    %835 = vector.broadcast %833 : vector<1x8xf32> to vector<8x8xf32>
    %836 = arith.addf %834, %835 : vector<8x8xf32>
    %cst_388 = arith.constant 0.000000e+00 : f32
    %837 = vector.broadcast %cst_388 : f32 to vector<8x8xf32>
    %838 = arith.cmpf ogt, %836, %837 : vector<8x8xf32>
    %cst_389 = arith.constant 0.00999999977 : f32
    %839 = vector.broadcast %cst_389 : f32 to vector<8x8xf32>
    %840 = arith.mulf %839, %836 : vector<8x8xf32>
    %841 = arith.select %838, %836, %840 : vector<8x8xi1>, vector<8x8xf32>
    %842 = arith.addf %841, %1 : vector<8x8xf32>
    %cst_390 = arith.constant dense<0xFF800000> : vector<8xf32>
    %843 = vector.multi_reduction <maximumf>, %842, %cst_390 [1] : vector<8x8xf32> to vector<8xf32>
    %844 = vector.shape_cast %843 : vector<8xf32> to vector<8x1xf32>
    %845 = vector.broadcast %844 : vector<8x1xf32> to vector<8x8xf32>
    %846 = arith.subf %842, %845 : vector<8x8xf32>
    %847 = math.exp %846 : vector<8x8xf32>
    %cst_391 = arith.constant dense<0.000000e+00> : vector<8xf32>
    %848 = vector.multi_reduction <add>, %847, %cst_391 [1] : vector<8x8xf32> to vector<8xf32>
    %849 = vector.shape_cast %848 : vector<8xf32> to vector<8x1xf32>
    %850 = tpu.reciprocal %849 : vector<8x1xf32> -> vector<8x1xf32>
    %851 = vector.broadcast %850 : vector<8x1xf32> to vector<8x8xf32>
    %852 = arith.mulf %847, %851 : vector<8x8xf32>
    %853 = vector.broadcast %9 : vector<1x128xf32> to vector<8x128xf32>
    %854 = arith.mulf %824, %853 : vector<8x128xf32>
    %cst_392 = arith.constant dense<0.000000e+00> : vector<8x128xf32>
    %855 = tpu.matmul %852, %854, %cst_392 {dimension_numbers = #tpu.dot_dimension_numbers<[1], [0], [0], [1], [0, 0, 1, 1], [], []>} : vector<8x8xf32>, vector<8x128xf32>, vector<8x128xf32> -> vector<8x128xf32>
    %856 = arith.addf %831, %855 : vector<8x128xf32>
    %857 = vector.extract_strided_slice %829 {offsets = [0, 1], sizes = [8, 1], strides = [1, 1]} : vector<8x2xf32> to vector<8x1xf32>
    %858 = vector.extract_strided_slice %830 {offsets = [1, 0], sizes = [1, 8], strides = [1, 1]} : vector<2x8xf32> to vector<1x8xf32>
    %859 = vector.broadcast %857 : vector<8x1xf32> to vector<8x8xf32>
    %860 = vector.broadcast %858 : vector<1x8xf32> to vector<8x8xf32>
    %861 = arith.addf %859, %860 : vector<8x8xf32>
    %cst_393 = arith.constant 0.000000e+00 : f32
    %862 = vector.broadcast %cst_393 : f32 to vector<8x8xf32>
    %863 = arith.cmpf ogt, %861, %862 : vector<8x8xf32>
    %cst_394 = arith.constant 0.00999999977 : f32
    %864 = vector.broadcast %cst_394 : f32 to vector<8x8xf32>
    %865 = arith.mulf %864, %861 : vector<8x8xf32>
    %866 = arith.select %863, %861, %865 : vector<8x8xi1>, vector<8x8xf32>
    %867 = arith.addf %866, %1 : vector<8x8xf32>
    %cst_395 = arith.constant dense<0xFF800000> : vector<8xf32>
    %868 = vector.multi_reduction <maximumf>, %867, %cst_395 [1] : vector<8x8xf32> to vector<8xf32>
    %869 = vector.shape_cast %868 : vector<8xf32> to vector<8x1xf32>
    %870 = vector.broadcast %869 : vector<8x1xf32> to vector<8x8xf32>
    %871 = arith.subf %867, %870 : vector<8x8xf32>
    %872 = math.exp %871 : vector<8x8xf32>
    %cst_396 = arith.constant dense<0.000000e+00> : vector<8xf32>
    %873 = vector.multi_reduction <add>, %872, %cst_396 [1] : vector<8x8xf32> to vector<8xf32>
    %874 = vector.shape_cast %873 : vector<8xf32> to vector<8x1xf32>
    %875 = tpu.reciprocal %874 : vector<8x1xf32> -> vector<8x1xf32>
    %876 = vector.broadcast %875 : vector<8x1xf32> to vector<8x8xf32>
    %877 = arith.mulf %872, %876 : vector<8x8xf32>
    %878 = vector.broadcast %16 : vector<1x128xf32> to vector<8x128xf32>
    %879 = arith.mulf %824, %878 : vector<8x128xf32>
    %cst_397 = arith.constant dense<0.000000e+00> : vector<8x128xf32>
    %880 = tpu.matmul %877, %879, %cst_397 {dimension_numbers = #tpu.dot_dimension_numbers<[1], [0], [0], [1], [0, 0, 1, 1], [], []>} : vector<8x8xf32>, vector<8x128xf32>, vector<8x128xf32> -> vector<8x128xf32>
    %881 = arith.addf %856, %880 : vector<8x128xf32>
    %cst_398 = arith.constant 0.000000e+00 : f32
    %882 = vector.broadcast %cst_398 : f32 to vector<8x128xf32>
    %883 = arith.cmpf ogt, %881, %882 : vector<8x128xf32>
    %cst_399 = arith.constant 0.000000e+00 : f32
    %884 = vector.broadcast %cst_399 : f32 to vector<8x128xf32>
    %885 = arith.minimumf %881, %884 : vector<8x128xf32>
    %886 = math.exp %885 : vector<8x128xf32>
    %cst_400 = arith.constant 1.000000e+00 : f32
    %887 = vector.broadcast %cst_400 : f32 to vector<8x128xf32>
    %888 = arith.subf %886, %887 : vector<8x128xf32>
    %889 = arith.select %883, %881, %888 : vector<8x128xi1>, vector<8x128xf32>
    %890 = arith.truncf %889 : vector<8x128xf32> to vector<8x128xbf16>
    %c6_401 = arith.constant 6 : index
    %c0_402 = arith.constant 0 : index
    %c0_403 = arith.constant 0 : index
    %891 = vector.load %arg5[%c6_401, %c0_402, %c0_403] : memref<8x128x128xbf16, #tpu.memory_space<vmem>>, vector<1x128x128xbf16>
    %892 = vector.shape_cast %891 : vector<1x128x128xbf16> to vector<128x128xbf16>
    %cst_404 = arith.constant dense<0.000000e+00> : vector<8x128xf32>
    %893 = tpu.matmul %890, %892, %cst_404 {dimension_numbers = #tpu.dot_dimension_numbers<[1], [0], [0], [1], [0, 0, 1, 1], [], []>} : vector<8x128xbf16>, vector<128x128xbf16>, vector<8x128xf32> -> vector<8x128xf32>
    %c6_405 = arith.constant 6 : index
    %c0_406 = arith.constant 0 : index
    %c0_407 = arith.constant 0 : index
    %894 = vector.load %arg6[%c6_405, %c0_406, %c0_407] : memref<8x1x128xf32, #tpu.memory_space<vmem>>, vector<1x1x128xf32>
    %895 = vector.shape_cast %894 : vector<1x1x128xf32> to vector<1x128xf32>
    %c6_408 = arith.constant 6 : index
    %c0_409 = arith.constant 0 : index
    %c0_410 = arith.constant 0 : index
    %896 = vector.load %arg7[%c6_408, %c0_409, %c0_410] : memref<8x1x128xf32, #tpu.memory_space<vmem>>, vector<1x1x128xf32>
    %897 = vector.shape_cast %896 : vector<1x1x128xf32> to vector<1x128xf32>
    %898 = vector.broadcast %895 : vector<1x128xf32> to vector<8x128xf32>
    %899 = arith.mulf %893, %898 : vector<8x128xf32>
    %cst_411 = arith.constant dense<0.000000e+00> : vector<8xf32>
    %900 = vector.multi_reduction <add>, %899, %cst_411 [1] : vector<8x128xf32> to vector<8xf32>
    %901 = vector.shape_cast %900 : vector<8xf32> to vector<8x1xf32>
    %cst_412 = arith.constant dense<0.000000e+00> : vector<1x8xf32>
    %902 = tpu.matmul %897, %893, %cst_412 {dimension_numbers = #tpu.dot_dimension_numbers<[1], [1], [0], [0], [0, 0, 1, 0], [], []>} : vector<1x128xf32>, vector<8x128xf32>, vector<1x8xf32> -> vector<1x8xf32>
    %903 = vector.broadcast %901 : vector<8x1xf32> to vector<8x8xf32>
    %904 = vector.broadcast %902 : vector<1x8xf32> to vector<8x8xf32>
    %905 = arith.addf %903, %904 : vector<8x8xf32>
    %cst_413 = arith.constant 0.000000e+00 : f32
    %906 = vector.broadcast %cst_413 : f32 to vector<8x8xf32>
    %907 = arith.cmpf ogt, %905, %906 : vector<8x8xf32>
    %cst_414 = arith.constant 0.00999999977 : f32
    %908 = vector.broadcast %cst_414 : f32 to vector<8x8xf32>
    %909 = arith.mulf %908, %905 : vector<8x8xf32>
    %910 = arith.select %907, %905, %909 : vector<8x8xi1>, vector<8x8xf32>
    %911 = arith.addf %910, %1 : vector<8x8xf32>
    %cst_415 = arith.constant dense<0xFF800000> : vector<8xf32>
    %912 = vector.multi_reduction <maximumf>, %911, %cst_415 [1] : vector<8x8xf32> to vector<8xf32>
    %913 = vector.shape_cast %912 : vector<8xf32> to vector<8x1xf32>
    %914 = vector.broadcast %913 : vector<8x1xf32> to vector<8x8xf32>
    %915 = arith.subf %911, %914 : vector<8x8xf32>
    %916 = math.exp %915 : vector<8x8xf32>
    %cst_416 = arith.constant dense<0.000000e+00> : vector<8xf32>
    %917 = vector.multi_reduction <add>, %916, %cst_416 [1] : vector<8x8xf32> to vector<8xf32>
    %918 = vector.shape_cast %917 : vector<8xf32> to vector<8x1xf32>
    %919 = tpu.reciprocal %918 : vector<8x1xf32> -> vector<8x1xf32>
    %920 = vector.broadcast %919 : vector<8x1xf32> to vector<8x8xf32>
    %921 = arith.mulf %916, %920 : vector<8x8xf32>
    %cst_417 = arith.constant dense<0.000000e+00> : vector<8x128xf32>
    %922 = tpu.matmul %921, %893, %cst_417 {dimension_numbers = #tpu.dot_dimension_numbers<[1], [0], [0], [1], [0, 0, 1, 1], [], []>} : vector<8x8xf32>, vector<8x128xf32>, vector<8x128xf32> -> vector<8x128xf32>
    %cst_418 = arith.constant 0.000000e+00 : f32
    %923 = vector.broadcast %cst_418 : f32 to vector<8x128xf32>
    %924 = arith.cmpf ogt, %922, %923 : vector<8x128xf32>
    %cst_419 = arith.constant 0.000000e+00 : f32
    %925 = vector.broadcast %cst_419 : f32 to vector<8x128xf32>
    %926 = arith.minimumf %922, %925 : vector<8x128xf32>
    %927 = math.exp %926 : vector<8x128xf32>
    %cst_420 = arith.constant 1.000000e+00 : f32
    %928 = vector.broadcast %cst_420 : f32 to vector<8x128xf32>
    %929 = arith.subf %927, %928 : vector<8x128xf32>
    %930 = arith.select %924, %922, %929 : vector<8x128xi1>, vector<8x128xf32>
    %931 = arith.truncf %930 : vector<8x128xf32> to vector<8x128xbf16>
    %c6_421 = arith.constant 6 : index
    %c0_422 = arith.constant 0 : index
    %c0_423 = arith.constant 0 : index
    %932 = vector.load %arg8[%c6_421, %c0_422, %c0_423] : memref<8x128x128xbf16, #tpu.memory_space<vmem>>, vector<1x128x128xbf16>
    %933 = vector.shape_cast %932 : vector<1x128x128xbf16> to vector<128x128xbf16>
    %cst_424 = arith.constant dense<0.000000e+00> : vector<8x128xf32>
    %934 = tpu.matmul %931, %933, %cst_424 {dimension_numbers = #tpu.dot_dimension_numbers<[1], [0], [0], [1], [0, 0, 1, 1], [], []>} : vector<8x128xbf16>, vector<128x128xbf16>, vector<8x128xf32> -> vector<8x128xf32>
    %c6_425 = arith.constant 6 : index
    %c0_426 = arith.constant 0 : index
    %c0_427 = arith.constant 0 : index
    %935 = vector.load %arg9[%c6_425, %c0_426, %c0_427] : memref<8x1x128xf32, #tpu.memory_space<vmem>>, vector<1x1x128xf32>
    %936 = vector.shape_cast %935 : vector<1x1x128xf32> to vector<1x128xf32>
    %937 = vector.broadcast %936 : vector<1x128xf32> to vector<8x128xf32>
    %938 = arith.addf %934, %937 : vector<8x128xf32>
    %cst_428 = arith.constant 5.000000e-01 : f32
    %939 = vector.broadcast %cst_428 : f32 to vector<8x128xf32>
    %940 = arith.mulf %939, %938 : vector<8x128xf32>
    %cst_429 = arith.constant 0.707106769 : f32
    %941 = vector.broadcast %cst_429 : f32 to vector<8x128xf32>
    %942 = arith.mulf %938, %941 : vector<8x128xf32>
    %943 = math.erf %942 : vector<8x128xf32>
    %cst_430 = arith.constant 1.000000e+00 : f32
    %944 = vector.broadcast %cst_430 : f32 to vector<8x128xf32>
    %945 = arith.addf %944, %943 : vector<8x128xf32>
    %946 = arith.mulf %940, %945 : vector<8x128xf32>
    %947 = arith.truncf %946 : vector<8x128xf32> to vector<8x128xbf16>
    %c6_431 = arith.constant 6 : index
    %c0_432 = arith.constant 0 : index
    %c0_433 = arith.constant 0 : index
    %948 = vector.load %arg10[%c6_431, %c0_432, %c0_433] : memref<8x128x128xbf16, #tpu.memory_space<vmem>>, vector<1x128x128xbf16>
    %949 = vector.shape_cast %948 : vector<1x128x128xbf16> to vector<128x128xbf16>
    %cst_434 = arith.constant dense<0.000000e+00> : vector<8x128xf32>
    %950 = tpu.matmul %947, %949, %cst_434 {dimension_numbers = #tpu.dot_dimension_numbers<[1], [0], [0], [1], [0, 0, 1, 1], [], []>} : vector<8x128xbf16>, vector<128x128xbf16>, vector<8x128xf32> -> vector<8x128xf32>
    %c6_435 = arith.constant 6 : index
    %c0_436 = arith.constant 0 : index
    %c0_437 = arith.constant 0 : index
    %951 = vector.load %arg11[%c6_435, %c0_436, %c0_437] : memref<8x1x128xf32, #tpu.memory_space<vmem>>, vector<1x1x128xf32>
    %952 = vector.shape_cast %951 : vector<1x1x128xf32> to vector<1x128xf32>
    %953 = vector.broadcast %952 : vector<1x128xf32> to vector<8x128xf32>
    %954 = arith.addf %950, %953 : vector<8x128xf32>
    %955 = arith.truncf %954 : vector<8x128xf32> to vector<8x128xbf16>
    %c7 = arith.constant 7 : index
    %c0_438 = arith.constant 0 : index
    %c0_439 = arith.constant 0 : index
    %956 = vector.load %arg2[%c7, %c0_438, %c0_439] : memref<8x128x128xbf16, #tpu.memory_space<vmem>>, vector<1x128x128xbf16>
    %957 = vector.shape_cast %956 : vector<1x128x128xbf16> to vector<128x128xbf16>
    %cst_440 = arith.constant dense<0.000000e+00> : vector<8x128xf32>
    %958 = tpu.matmul %955, %957, %cst_440 {dimension_numbers = #tpu.dot_dimension_numbers<[1], [0], [0], [1], [0, 0, 1, 1], [], []>} : vector<8x128xbf16>, vector<128x128xbf16>, vector<8x128xf32> -> vector<8x128xf32>
    %c7_441 = arith.constant 7 : index
    %c0_442 = arith.constant 0 : index
    %c0_443 = arith.constant 0 : index
    %959 = vector.load %arg3[%c7_441, %c0_442, %c0_443] : memref<8x2x128xf32, #tpu.memory_space<vmem>>, vector<1x2x128xf32>
    %960 = vector.shape_cast %959 : vector<1x2x128xf32> to vector<2x128xf32>
    %c7_444 = arith.constant 7 : index
    %c0_445 = arith.constant 0 : index
    %c0_446 = arith.constant 0 : index
    %961 = vector.load %arg4[%c7_444, %c0_445, %c0_446] : memref<8x2x128xf32, #tpu.memory_space<vmem>>, vector<1x2x128xf32>
    %962 = vector.shape_cast %961 : vector<1x2x128xf32> to vector<2x128xf32>
    %cst_447 = arith.constant dense<0.000000e+00> : vector<8x2xf32>
    %963 = tpu.matmul %958, %960, %cst_447 {dimension_numbers = #tpu.dot_dimension_numbers<[1], [1], [0], [0], [0, 0, 1, 0], [], []>} : vector<8x128xf32>, vector<2x128xf32>, vector<8x2xf32> -> vector<8x2xf32>
    %cst_448 = arith.constant dense<0.000000e+00> : vector<2x8xf32>
    %964 = tpu.matmul %962, %958, %cst_448 {dimension_numbers = #tpu.dot_dimension_numbers<[1], [1], [0], [0], [0, 0, 1, 0], [], []>} : vector<2x128xf32>, vector<8x128xf32>, vector<2x8xf32> -> vector<2x8xf32>
    %cst_449 = arith.constant 0.000000e+00 : f32
    %965 = vector.broadcast %cst_449 : f32 to vector<8x128xf32>
    %966 = vector.extract_strided_slice %963 {offsets = [0, 0], sizes = [8, 1], strides = [1, 1]} : vector<8x2xf32> to vector<8x1xf32>
    %967 = vector.extract_strided_slice %964 {offsets = [0, 0], sizes = [1, 8], strides = [1, 1]} : vector<2x8xf32> to vector<1x8xf32>
    %968 = vector.broadcast %966 : vector<8x1xf32> to vector<8x8xf32>
    %969 = vector.broadcast %967 : vector<1x8xf32> to vector<8x8xf32>
    %970 = arith.addf %968, %969 : vector<8x8xf32>
    %cst_450 = arith.constant 0.000000e+00 : f32
    %971 = vector.broadcast %cst_450 : f32 to vector<8x8xf32>
    %972 = arith.cmpf ogt, %970, %971 : vector<8x8xf32>
    %cst_451 = arith.constant 0.00999999977 : f32
    %973 = vector.broadcast %cst_451 : f32 to vector<8x8xf32>
    %974 = arith.mulf %973, %970 : vector<8x8xf32>
    %975 = arith.select %972, %970, %974 : vector<8x8xi1>, vector<8x8xf32>
    %976 = arith.addf %975, %1 : vector<8x8xf32>
    %cst_452 = arith.constant dense<0xFF800000> : vector<8xf32>
    %977 = vector.multi_reduction <maximumf>, %976, %cst_452 [1] : vector<8x8xf32> to vector<8xf32>
    %978 = vector.shape_cast %977 : vector<8xf32> to vector<8x1xf32>
    %979 = vector.broadcast %978 : vector<8x1xf32> to vector<8x8xf32>
    %980 = arith.subf %976, %979 : vector<8x8xf32>
    %981 = math.exp %980 : vector<8x8xf32>
    %cst_453 = arith.constant dense<0.000000e+00> : vector<8xf32>
    %982 = vector.multi_reduction <add>, %981, %cst_453 [1] : vector<8x8xf32> to vector<8xf32>
    %983 = vector.shape_cast %982 : vector<8xf32> to vector<8x1xf32>
    %984 = tpu.reciprocal %983 : vector<8x1xf32> -> vector<8x1xf32>
    %985 = vector.broadcast %984 : vector<8x1xf32> to vector<8x8xf32>
    %986 = arith.mulf %981, %985 : vector<8x8xf32>
    %987 = vector.broadcast %9 : vector<1x128xf32> to vector<8x128xf32>
    %988 = arith.mulf %958, %987 : vector<8x128xf32>
    %cst_454 = arith.constant dense<0.000000e+00> : vector<8x128xf32>
    %989 = tpu.matmul %986, %988, %cst_454 {dimension_numbers = #tpu.dot_dimension_numbers<[1], [0], [0], [1], [0, 0, 1, 1], [], []>} : vector<8x8xf32>, vector<8x128xf32>, vector<8x128xf32> -> vector<8x128xf32>
    %990 = arith.addf %965, %989 : vector<8x128xf32>
    %991 = vector.extract_strided_slice %963 {offsets = [0, 1], sizes = [8, 1], strides = [1, 1]} : vector<8x2xf32> to vector<8x1xf32>
    %992 = vector.extract_strided_slice %964 {offsets = [1, 0], sizes = [1, 8], strides = [1, 1]} : vector<2x8xf32> to vector<1x8xf32>
    %993 = vector.broadcast %991 : vector<8x1xf32> to vector<8x8xf32>
    %994 = vector.broadcast %992 : vector<1x8xf32> to vector<8x8xf32>
    %995 = arith.addf %993, %994 : vector<8x8xf32>
    %cst_455 = arith.constant 0.000000e+00 : f32
    %996 = vector.broadcast %cst_455 : f32 to vector<8x8xf32>
    %997 = arith.cmpf ogt, %995, %996 : vector<8x8xf32>
    %cst_456 = arith.constant 0.00999999977 : f32
    %998 = vector.broadcast %cst_456 : f32 to vector<8x8xf32>
    %999 = arith.mulf %998, %995 : vector<8x8xf32>
    %1000 = arith.select %997, %995, %999 : vector<8x8xi1>, vector<8x8xf32>
    %1001 = arith.addf %1000, %1 : vector<8x8xf32>
    %cst_457 = arith.constant dense<0xFF800000> : vector<8xf32>
    %1002 = vector.multi_reduction <maximumf>, %1001, %cst_457 [1] : vector<8x8xf32> to vector<8xf32>
    %1003 = vector.shape_cast %1002 : vector<8xf32> to vector<8x1xf32>
    %1004 = vector.broadcast %1003 : vector<8x1xf32> to vector<8x8xf32>
    %1005 = arith.subf %1001, %1004 : vector<8x8xf32>
    %1006 = math.exp %1005 : vector<8x8xf32>
    %cst_458 = arith.constant dense<0.000000e+00> : vector<8xf32>
    %1007 = vector.multi_reduction <add>, %1006, %cst_458 [1] : vector<8x8xf32> to vector<8xf32>
    %1008 = vector.shape_cast %1007 : vector<8xf32> to vector<8x1xf32>
    %1009 = tpu.reciprocal %1008 : vector<8x1xf32> -> vector<8x1xf32>
    %1010 = vector.broadcast %1009 : vector<8x1xf32> to vector<8x8xf32>
    %1011 = arith.mulf %1006, %1010 : vector<8x8xf32>
    %1012 = vector.broadcast %16 : vector<1x128xf32> to vector<8x128xf32>
    %1013 = arith.mulf %958, %1012 : vector<8x128xf32>
    %cst_459 = arith.constant dense<0.000000e+00> : vector<8x128xf32>
    %1014 = tpu.matmul %1011, %1013, %cst_459 {dimension_numbers = #tpu.dot_dimension_numbers<[1], [0], [0], [1], [0, 0, 1, 1], [], []>} : vector<8x8xf32>, vector<8x128xf32>, vector<8x128xf32> -> vector<8x128xf32>
    %1015 = arith.addf %990, %1014 : vector<8x128xf32>
    %cst_460 = arith.constant 0.000000e+00 : f32
    %1016 = vector.broadcast %cst_460 : f32 to vector<8x128xf32>
    %1017 = arith.cmpf ogt, %1015, %1016 : vector<8x128xf32>
    %cst_461 = arith.constant 0.000000e+00 : f32
    %1018 = vector.broadcast %cst_461 : f32 to vector<8x128xf32>
    %1019 = arith.minimumf %1015, %1018 : vector<8x128xf32>
    %1020 = math.exp %1019 : vector<8x128xf32>
    %cst_462 = arith.constant 1.000000e+00 : f32
    %1021 = vector.broadcast %cst_462 : f32 to vector<8x128xf32>
    %1022 = arith.subf %1020, %1021 : vector<8x128xf32>
    %1023 = arith.select %1017, %1015, %1022 : vector<8x128xi1>, vector<8x128xf32>
    %1024 = arith.truncf %1023 : vector<8x128xf32> to vector<8x128xbf16>
    %c7_463 = arith.constant 7 : index
    %c0_464 = arith.constant 0 : index
    %c0_465 = arith.constant 0 : index
    %1025 = vector.load %arg5[%c7_463, %c0_464, %c0_465] : memref<8x128x128xbf16, #tpu.memory_space<vmem>>, vector<1x128x128xbf16>
    %1026 = vector.shape_cast %1025 : vector<1x128x128xbf16> to vector<128x128xbf16>
    %cst_466 = arith.constant dense<0.000000e+00> : vector<8x128xf32>
    %1027 = tpu.matmul %1024, %1026, %cst_466 {dimension_numbers = #tpu.dot_dimension_numbers<[1], [0], [0], [1], [0, 0, 1, 1], [], []>} : vector<8x128xbf16>, vector<128x128xbf16>, vector<8x128xf32> -> vector<8x128xf32>
    %c7_467 = arith.constant 7 : index
    %c0_468 = arith.constant 0 : index
    %c0_469 = arith.constant 0 : index
    %1028 = vector.load %arg6[%c7_467, %c0_468, %c0_469] : memref<8x1x128xf32, #tpu.memory_space<vmem>>, vector<1x1x128xf32>
    %1029 = vector.shape_cast %1028 : vector<1x1x128xf32> to vector<1x128xf32>
    %c7_470 = arith.constant 7 : index
    %c0_471 = arith.constant 0 : index
    %c0_472 = arith.constant 0 : index
    %1030 = vector.load %arg7[%c7_470, %c0_471, %c0_472] : memref<8x1x128xf32, #tpu.memory_space<vmem>>, vector<1x1x128xf32>
    %1031 = vector.shape_cast %1030 : vector<1x1x128xf32> to vector<1x128xf32>
    %1032 = vector.broadcast %1029 : vector<1x128xf32> to vector<8x128xf32>
    %1033 = arith.mulf %1027, %1032 : vector<8x128xf32>
    %cst_473 = arith.constant dense<0.000000e+00> : vector<8xf32>
    %1034 = vector.multi_reduction <add>, %1033, %cst_473 [1] : vector<8x128xf32> to vector<8xf32>
    %1035 = vector.shape_cast %1034 : vector<8xf32> to vector<8x1xf32>
    %cst_474 = arith.constant dense<0.000000e+00> : vector<1x8xf32>
    %1036 = tpu.matmul %1031, %1027, %cst_474 {dimension_numbers = #tpu.dot_dimension_numbers<[1], [1], [0], [0], [0, 0, 1, 0], [], []>} : vector<1x128xf32>, vector<8x128xf32>, vector<1x8xf32> -> vector<1x8xf32>
    %1037 = vector.broadcast %1035 : vector<8x1xf32> to vector<8x8xf32>
    %1038 = vector.broadcast %1036 : vector<1x8xf32> to vector<8x8xf32>
    %1039 = arith.addf %1037, %1038 : vector<8x8xf32>
    %cst_475 = arith.constant 0.000000e+00 : f32
    %1040 = vector.broadcast %cst_475 : f32 to vector<8x8xf32>
    %1041 = arith.cmpf ogt, %1039, %1040 : vector<8x8xf32>
    %cst_476 = arith.constant 0.00999999977 : f32
    %1042 = vector.broadcast %cst_476 : f32 to vector<8x8xf32>
    %1043 = arith.mulf %1042, %1039 : vector<8x8xf32>
    %1044 = arith.select %1041, %1039, %1043 : vector<8x8xi1>, vector<8x8xf32>
    %1045 = arith.addf %1044, %1 : vector<8x8xf32>
    %cst_477 = arith.constant dense<0xFF800000> : vector<8xf32>
    %1046 = vector.multi_reduction <maximumf>, %1045, %cst_477 [1] : vector<8x8xf32> to vector<8xf32>
    %1047 = vector.shape_cast %1046 : vector<8xf32> to vector<8x1xf32>
    %1048 = vector.broadcast %1047 : vector<8x1xf32> to vector<8x8xf32>
    %1049 = arith.subf %1045, %1048 : vector<8x8xf32>
    %1050 = math.exp %1049 : vector<8x8xf32>
    %cst_478 = arith.constant dense<0.000000e+00> : vector<8xf32>
    %1051 = vector.multi_reduction <add>, %1050, %cst_478 [1] : vector<8x8xf32> to vector<8xf32>
    %1052 = vector.shape_cast %1051 : vector<8xf32> to vector<8x1xf32>
    %1053 = tpu.reciprocal %1052 : vector<8x1xf32> -> vector<8x1xf32>
    %1054 = vector.broadcast %1053 : vector<8x1xf32> to vector<8x8xf32>
    %1055 = arith.mulf %1050, %1054 : vector<8x8xf32>
    %cst_479 = arith.constant dense<0.000000e+00> : vector<8x128xf32>
    %1056 = tpu.matmul %1055, %1027, %cst_479 {dimension_numbers = #tpu.dot_dimension_numbers<[1], [0], [0], [1], [0, 0, 1, 1], [], []>} : vector<8x8xf32>, vector<8x128xf32>, vector<8x128xf32> -> vector<8x128xf32>
    %cst_480 = arith.constant 0.000000e+00 : f32
    %1057 = vector.broadcast %cst_480 : f32 to vector<8x128xf32>
    %1058 = arith.cmpf ogt, %1056, %1057 : vector<8x128xf32>
    %cst_481 = arith.constant 0.000000e+00 : f32
    %1059 = vector.broadcast %cst_481 : f32 to vector<8x128xf32>
    %1060 = arith.minimumf %1056, %1059 : vector<8x128xf32>
    %1061 = math.exp %1060 : vector<8x128xf32>
    %cst_482 = arith.constant 1.000000e+00 : f32
    %1062 = vector.broadcast %cst_482 : f32 to vector<8x128xf32>
    %1063 = arith.subf %1061, %1062 : vector<8x128xf32>
    %1064 = arith.select %1058, %1056, %1063 : vector<8x128xi1>, vector<8x128xf32>
    %1065 = arith.truncf %1064 : vector<8x128xf32> to vector<8x128xbf16>
    %c7_483 = arith.constant 7 : index
    %c0_484 = arith.constant 0 : index
    %c0_485 = arith.constant 0 : index
    %1066 = vector.load %arg8[%c7_483, %c0_484, %c0_485] : memref<8x128x128xbf16, #tpu.memory_space<vmem>>, vector<1x128x128xbf16>
    %1067 = vector.shape_cast %1066 : vector<1x128x128xbf16> to vector<128x128xbf16>
    %cst_486 = arith.constant dense<0.000000e+00> : vector<8x128xf32>
    %1068 = tpu.matmul %1065, %1067, %cst_486 {dimension_numbers = #tpu.dot_dimension_numbers<[1], [0], [0], [1], [0, 0, 1, 1], [], []>} : vector<8x128xbf16>, vector<128x128xbf16>, vector<8x128xf32> -> vector<8x128xf32>
    %c7_487 = arith.constant 7 : index
    %c0_488 = arith.constant 0 : index
    %c0_489 = arith.constant 0 : index
    %1069 = vector.load %arg9[%c7_487, %c0_488, %c0_489] : memref<8x1x128xf32, #tpu.memory_space<vmem>>, vector<1x1x128xf32>
    %1070 = vector.shape_cast %1069 : vector<1x1x128xf32> to vector<1x128xf32>
    %1071 = vector.broadcast %1070 : vector<1x128xf32> to vector<8x128xf32>
    %1072 = arith.addf %1068, %1071 : vector<8x128xf32>
    %cst_490 = arith.constant 5.000000e-01 : f32
    %1073 = vector.broadcast %cst_490 : f32 to vector<8x128xf32>
    %1074 = arith.mulf %1073, %1072 : vector<8x128xf32>
    %cst_491 = arith.constant 0.707106769 : f32
    %1075 = vector.broadcast %cst_491 : f32 to vector<8x128xf32>
    %1076 = arith.mulf %1072, %1075 : vector<8x128xf32>
    %1077 = math.erf %1076 : vector<8x128xf32>
    %cst_492 = arith.constant 1.000000e+00 : f32
    %1078 = vector.broadcast %cst_492 : f32 to vector<8x128xf32>
    %1079 = arith.addf %1078, %1077 : vector<8x128xf32>
    %1080 = arith.mulf %1074, %1079 : vector<8x128xf32>
    %1081 = arith.truncf %1080 : vector<8x128xf32> to vector<8x128xbf16>
    %c7_493 = arith.constant 7 : index
    %c0_494 = arith.constant 0 : index
    %c0_495 = arith.constant 0 : index
    %1082 = vector.load %arg10[%c7_493, %c0_494, %c0_495] : memref<8x128x128xbf16, #tpu.memory_space<vmem>>, vector<1x128x128xbf16>
    %1083 = vector.shape_cast %1082 : vector<1x128x128xbf16> to vector<128x128xbf16>
    %cst_496 = arith.constant dense<0.000000e+00> : vector<8x128xf32>
    %1084 = tpu.matmul %1081, %1083, %cst_496 {dimension_numbers = #tpu.dot_dimension_numbers<[1], [0], [0], [1], [0, 0, 1, 1], [], []>} : vector<8x128xbf16>, vector<128x128xbf16>, vector<8x128xf32> -> vector<8x128xf32>
    %c7_497 = arith.constant 7 : index
    %c0_498 = arith.constant 0 : index
    %c0_499 = arith.constant 0 : index
    %1085 = vector.load %arg11[%c7_497, %c0_498, %c0_499] : memref<8x1x128xf32, #tpu.memory_space<vmem>>, vector<1x1x128xf32>
    %1086 = vector.shape_cast %1085 : vector<1x1x128xf32> to vector<1x128xf32>
    %1087 = vector.broadcast %1086 : vector<1x128xf32> to vector<8x128xf32>
    %1088 = arith.addf %1084, %1087 : vector<8x128xf32>
    %c0_500 = arith.constant 0 : index
    %c0_501 = arith.constant 0 : index
    %1089 = vector.load %arg12[%c0_500, %c0_501] : memref<8x128xf32, #tpu.memory_space<vmem>>, vector<8x128xf32>
    tpu.vector_store %arg12[%c0_500, %c0_501], %1088 {strides = array<i32>} : memref<8x128xf32, #tpu.memory_space<vmem>>, vector<8x128xf32>,
    return
  }
}

</mosaic_0001>

<bundles_post_ra>
// kernel: tf_forward.1
= control target key start
LH: loop header
LB: loop body
LE: loop exit
PB: predicated region body
PF: predicated region fallthrough
CT: control target
= control target key end

     0   :  { %17 = vsyncpa [#allocation3], 0  ;;  %s7248_s0 = inlined_call_operand.vmem [shape: f32[8,128], index: 0, kind: input, shape index: {}]   ;;  %s7249_s1 = inlined_call_operand.vmem [shape: f32[8,8], index: 1, kind: input, shape index: {}]   ;;  %s7250_s2 = inlined_call_operand.hbm [shape: bf16[8,128,128], index: 2, kind: input, shape index: {}]   ;;  %s7251_s3 = inlined_call_operand.vmem [shape: f32[8,2,128], index: 3, kind: input, shape index: {}]   ;;  %s7252_s4 = inlined_call_operand.vmem [shape: f32[8,2,128], index: 4, kind: input, shape index: {}]   ;;  %s7253_s5 = inlined_call_operand.hbm [shape: bf16[8,128,128], index: 5, kind: input, shape index: {}]   ;;  %s7254_s6 = inlined_call_operand.vmem [shape: f32[8,1,128], index: 6, kind: input, shape index: {}]   ;;  %s7255_s7 = inlined_call_operand.hbm [shape: f32[8,1,128], index: 7, kind: input, shape index: {}]   ;;  %s7256_s8 = inlined_call_operand.hbm [shape: bf16[8,128,128], index: 8, kind: input, shape index: {}]   ;;  %s7257_s9 = inlined_call_operand.hbm [shape: f32[8,1,128], index: 9, kind: input, shape index: {}]   ;;  %s7258_s10 = inlined_call_operand.hbm [shape: bf16[8,128,128], index: 10, kind: input, shape index: {}]   ;;  %s7259_s11 = inlined_call_operand.hbm [shape: f32[8,1,128], index: 11, kind: input, shape index: {}]   ;;  %s7260_s12 = inlined_call_operand.vmem [shape: f32[8,128], index: 12, kind: output, shape index: {}]  }
   0x1   :  { %18 = vsyncpa [#allocation5], 0 }
   0x2   :  { %19 = vsyncpa [#allocation8], 0 }
   0x3   :  { %20 = vsyncpa [#allocation11], 0  ;;  %s46_s23 = sshll.u32 %s7253_s5, 4  ;;  %s6895_s24 = smov [#allocation4]   ;;  %s47_s23 = int_to_ptr.hbm [resolvable:$true] %s46_s23 }
   0x4   :  { %s48_s25 = sshll.u32 %s6895_s24, 4  ;;  %s74_s28 = sshll.u32 %s7256_s8, 4  ;;  %s49_s25 = int_to_ptr.vmem [resolvable:$true] %s48_s25  ;;  %s75_s28 = int_to_ptr.hbm [resolvable:$true] %s74_s28 }
   0x5   :  { %s6896_s29 = smov 64   ;;  %s6897_s30 = smov 4  }
   0x6   :  { %54 = dma.hbm_to_vmem [thread:$0]  %s47_s23, 8192, %s49_s25, [#allocation5], %s6896_s29, %s6896_s29, %s6897_s30  }
   0x7   :  { %s6898_s13 = smov [#allocation7]   ;;  %s100_s17 = sshll.u32 %s7258_s10, 4  ;;  %s101_s17 = int_to_ptr.hbm [resolvable:$true] %s100_s17 }
   0x8   :  { %s76_s14 = sshll.u32 %s6898_s13, 4  ;;  %s29_s19 = sshll.u32 %s7250_s2, 4  ;;  %s77_s14 = int_to_ptr.vmem [resolvable:$true] %s76_s14  ;;  %s30_s19 = int_to_ptr.hbm [resolvable:$true] %s29_s19 }
   0x9   :  { %82 = dma.hbm_to_vmem [thread:$0]  %s75_s28, 8192, %s77_s14, [#allocation8], %s6896_s29, %s6896_s29, %s6897_s30  }
   0xa   :  { %s6899_s20 = smov [#allocation10]   ;;  %s6900_s8 = smov [#allocation2]  }
   0xb   :  { %s102_s21 = sshll.u32 %s6899_s20, 4  ;;  %s31_s22 = sshll.u32 %s6900_s8, 4  ;;  %s103_s21 = int_to_ptr.vmem [resolvable:$true] %s102_s21  ;;  %s32_s22 = int_to_ptr.vmem [resolvable:$true] %s31_s22 }
   0xc   :  { %108 = dma.hbm_to_vmem [thread:$0]  %s101_s17, 8192, %s103_s21, [#allocation11], %s6896_s29, %s6896_s29, %s6897_s30  }
   0xd   :  { %s61_s25 = sshll.u32 %s7255_s7, 4  ;;  %s6901_s10 = smov [#allocation6]   ;;  %s62_s25 = int_to_ptr.hbm [resolvable:$true] %s61_s25 }
   0xe   :  { %37 = dma.hbm_to_vmem [thread:$0]  %s30_s19, 8192, %s32_s22, [#allocation3], %s6896_s29, %s6896_s29, %s6897_s30  }
   0xf   :  { %s63_s26 = sshll.u32 %s6901_s10, 4  ;;  %s87_s2 = sshll.u32 %s7257_s9, 4  ;;  %s64_s26 = int_to_ptr.vmem [resolvable:$true] %s63_s26  ;;  %s88_s2 = int_to_ptr.hbm [resolvable:$true] %s87_s2 }
  0x10   :  { %s6902_s13 = smov 16   ;;  %s6903_s14 = smov 1  }
  0x11   :  { %69 = dma.hbm_to_vmem [thread:$0]  %s62_s25, 128, %s64_s26, [#allocation5], %s6902_s13, %s6902_s13, %s6903_s14  }
  0x12   :  { %s6904_s15 = smov [#allocation9]   ;;  %s113_s7 = sshll.u32 %s7259_s11, 4  ;;  %s114_s7 = int_to_ptr.hbm [resolvable:$true] %s113_s7 }
  0x13   :  { %s89_s16 = sshll.u32 %s6904_s15, 4  ;;  %s6905_s29 = smov [#allocation12]   ;;  %s90_s16 = int_to_ptr.vmem [resolvable:$true] %s89_s16 }
  0x14   :  { %95 = dma.hbm_to_vmem [thread:$0]  %s88_s2, 128, %s90_s16, [#allocation8], %s6902_s13, %s6902_s13, %s6903_s14  }
  0x15   :  { %s115_s30 = sshll.u32 %s6905_s29, 4  ;;  %s116_s30 = int_to_ptr.vmem [resolvable:$true] %s115_s30 }
  0x16   :  { %121 = dma.hbm_to_vmem [thread:$0]  %s114_s7, 128, %s116_s30, [#allocation11], %s6902_s13, %s6902_s13, %s6903_s14  }
  0x17   :  { %6887 = dma.done.wait [#allocation3], 8192  }
  0x18   :  { %6888 = vsyncadd [#allocation3], 4294959104 }
  0x19   :  { %6889 = dma.done.wait [#allocation5], 8320  }
  0x1a   :  { %6890 = vsyncadd [#allocation5], 4294958976 }
  0x1b   :  { %6891 = dma.done.wait [#allocation8], 8320  }
  0x1c   :  { %6892 = vsyncadd [#allocation8], 4294958976 }
  0x1d   :  { %6893 = dma.done.wait [#allocation11], 8320  }
  0x1e   :  { %6894 = vsyncadd [#allocation11], 4294958976  ;;  %v6274_v0 = vld [vmem:[#allocation2 + $0x38] sm:$0xff]  ;;  %v6273_v1 = vld [vmem:[#allocation2 + $0x30] sm:$0xff]  ;;  %v6906_v11 = vmov 1   ;;  %v152_v12 = vlaneseq  ;;  %v6907_v14 = vmov 0.0  }
  0x1f   :  { %229 = vmatpush.bf16.msra.mxu0 %v6274_v0  ;;  %v242_v2 = vld [vmem:[%s7251_s3] sm:$0x3]  ;;  %v6272_v3 = vld [vmem:[#allocation2 + $0x28] sm:$0xff]  ;;  %v6270_v5 = vld [vmem:[#allocation2 + $0x18] sm:$0xff]  ;;  %6537 = vset.pattern.permute.xlu0 %v6906_v11  ;;  %v6908_v22 = vmov 0   ;;  %vm295_vm5 = vcmask 64512  }
  0x20   :  { %259 = vmatpush.xpose.msra.mxu1 %v242_v2  ;;  %v6271_v4 = vld [vmem:[#allocation2 + $0x20] sm:$0xff]  ;;  %v6269_v6 = vld [vmem:[#allocation2 + $0x10] sm:$0xff]  ;;  %v6268_v7 = vld [vmem:[#allocation2 + $0x8] sm:$0xff]  ;;  %6540 = vset.pattern.permute.xlu2 %v6906_v11  ;;  %v153_v13 = vand.u32 127, %v152_v12 }
  0x21   :  { %v6267_v8 = vld [vmem:[#allocation2] sm:$0xff]  ;;  %6539 = vset.pattern.permute.xlu1 %v6908_v22  ;;  %v6282_v50 = vld [vmem:[#allocation4 + $0x38] sm:$0xff]  ;;  %v6281_v12 = vld [vmem:[#allocation4 + $0x30] sm:$0xff] }
  0x22   :  { %v150_v9 = vld [vmem:[%s7248_s0] sm:$0xff]  ;;  %vm159_vm0 = vcmp.ge.s32.totalorder %v153_v13, 8  ;;  %vm160_vm1 = vcmp.lt.s32.totalorder %v153_v13, 16  ;;  %vm155_vm3 = vcmp.lt.s32.totalorder %v153_v13, 8  ;;  %v6280_v13 = vld [vmem:[#allocation4 + $0x28] sm:$0xff] }
  0x23   :  { %230 = vmatpush.bf16.msra.mxu0 %v6273_v1  ;;  %v164_v10 = vpack.c.bf16 %v150_v9, %v150_v9  ;;  %vm161_vm2 = vmand %vm159_vm0, %vm160_vm1  ;;  %v7005_v16 = vsel %vm155_vm3, 1.0, %v6907_v14  ;;  %v243_v20 = vld [vmem:[%s7252_s4] sm:$0x3] }
  0x24   :  { %v7003_v15 = vsel %vm161_vm2, 1.0, %v6907_v14  ;;  %v7018_v29 = vld [vmem:[%s7249_s1] sm:$0xff]  ;;  %473 = vmatpush.bf16.msrb.mxu1 %v6282_v50 }
  0x25   :  { %v6279_v14 = vld [vmem:[#allocation4 + $0x20] sm:$0xff] }
  0x26   :  { %v6290_v50 = vld [vmem:[#allocation7 + $0x38] sm:$0xff] }
  0x27   :  { %231 = vmatpush.bf16.msra.mxu0 %v6272_v3 }
  0x28   :  { %474 = vmatpush.bf16.msrb.mxu1 %v6281_v12 }
  0x2b   :  { %232 = vmatpush.bf16.msra.mxu0 %v6271_v4 }
  0x2c   :  { %475 = vmatpush.bf16.msrb.mxu1 %v6280_v13 }
  0x2f   :  { %233 = vmatpush.bf16.msra.mxu0 %v6270_v5 }
  0x30   :  { %476 = vmatpush.bf16.msrb.mxu1 %v6279_v14  ;;  %v6298_v14 = vld [vmem:[#allocation10 + $0x38] sm:$0xff] }
  0x33   :  { %234 = vmatpush.bf16.msra.mxu0 %v6269_v6 }
  0x37   :  { %235 = vmatpush.bf16.msra.mxu0 %v6268_v7 }
  0x3b   :  { %236 = vmatpush.bf16.msra.mxu0 %v6267_v8 }
  0x3e   :  { %237 = vmatmul.bf16.vlgmr.msra.gmra.mxu0 %v164_v10 }
  0xbb   :  { %v238_v17 = vpop.f32.mrf.mxu0 }
  0xbc   :  { %260 = vmatmul.f32.vlgmr.msra.gmra.mxu1 %v238_v17  ;;  %279 = vmatpush.xpose.msra.mxu2 %v238_v17  ;;  %v355_v18 = vmul.f32 %v7003_v15, %v238_v17  ;;  %v320_v19 = vmul.f32 %v7005_v16, %v238_v17  ;;  %v6278_v17 = vld [vmem:[#allocation4 + $0x18] sm:$0xff] }
  0xbd   :  { %477 = vmatpush.bf16.msrb.mxu1 %v6278_v17  ;;  %v6297_v17 = vld [vmem:[#allocation10 + $0x30] sm:$0xff] }
  0xbe   :  { %374 = vmatpush.msra.mxu3 %v355_v18  ;;  %v6277_v18 = vld [vmem:[#allocation4 + $0x10] sm:$0xff] }
  0xbf   :  { %280 = vmatmul.f32.vlgmr.msra.gmra.mxu2 %v243_v20  ;;  %v6275_v20 = vld [vmem:[#allocation4] sm:$0xff] }
  0xc0   :  { %397 = vmatpush.msrb.mxu3 %v320_v19  ;;  %v6276_v19 = vld [vmem:[#allocation4 + $0x8] sm:$0xff] }
  0xc1   :  { %478 = vmatpush.bf16.msrb.mxu1 %v6277_v18  ;;  %v6549_v18 = vld [vmem:[#allocation9] ss:$0 sm:$0xff] }
  0xc3   :  { %v240_v21 = vpop.f32.mrf.mxu0 }
  0xc5   :  { %479 = vmatpush.bf16.msrb.mxu1 %v6276_v19 }
  0xc9   :  { %480 = vmatpush.bf16.msrb.mxu1 %v6275_v20  ;;  %v6296_v20 = vld [vmem:[#allocation10 + $0x28] sm:$0xff] }
 0x139   :  { %v261_v23 = vpop.f32.mrf.mxu1 }
 0x13a   :  { %322 = vperm.xlu0 %6537, %v261_v23  }
 0x142   :  { %6538 = vset.pattern.permute.xlu0 %v6908_v22  ;;  %v281_v24 = vpop.f32.mrf.mxu2 }
 0x143   :  { %286 = vperm.xlu0 %6538, %v261_v23   ;;  %v325_v25 = vperm.slane %v281_v24, 1  ;;  %v289_v33 = vperm.slane %v281_v24, 0 }
 0x14b   :  { %6541 = vset.pattern.permute.xlu0 %v6906_v11 }
 0x1ac   :  { %v323_v26 = vpop.permute.xlu0 %322 }
 0x1ad   :  { %v326_v27 = vadd.f32 %v325_v25, %v323_v26 }
 0x1af   :  { %v328_v28 = vmul.f32 0.01, %v326_v27  ;;  %vm327_vm4 = vcmp.gt.f32.partialorder %v326_v27, 0.0 }
 0x1b1   :  { %v329_v30 = vsel %vm327_vm4, %v326_v27, %v328_v28 }
 0x1b2   :  { %v330_v31 = vadd.f32 %v329_v30, %v7018_v29 }
 0x1b4   :  { %v331_v32 = vsel %vm295_vm5, %v330_v31, -inf }
 0x1b5   :  { %332 = vmax.xlane.f32.xlu1 %v331_v32  ;;  %v287_v34 = vpop.permute.xlu0 %286  ;;  %v6548_v32 = vld [vmem:[%s7254_s6] ss:$0 sm:$0xff] }
 0x1b6   :  { %v290_v35 = vadd.f32 %v289_v33, %v287_v34 }
 0x1b8   :  { %vm291_vm6 = vcmp.gt.f32.partialorder %v290_v35, 0.0  ;;  %v292_v36 = vmul.f32 0.01, %v290_v35 }
 0x1ba   :  { %v293_v37 = vsel %vm291_vm6, %v290_v35, %v292_v36  ;;  %v487_v35 = vld [vmem:[#allocation6] sm:$0x1] }
 0x1bb   :  { %v294_v38 = vadd.f32 %v293_v37, %v7018_v29 }
 0x1bd   :  { %v296_v39 = vsel %vm295_vm5, %v294_v38, -inf }
 0x1be   :  { %297 = vmax.xlane.f32.xlu1 %v296_v39 }
 0x228   :  { %v333_v40 = vpop.xlane.xlu1 %332 }
 0x229   :  { %v334_v41 = vsub.f32 %v330_v31, %v333_v40 }
 0x22b   :  { %v335_v42 = vmul.f32 1.442695, %v334_v41 }
 0x22d   :  { %6572 = vpow2.f32 %v335_v42 }
 0x231   :  { %v298_v43 = vpop.xlane.xlu1 %297 }
 0x232   :  { %v299_v44 = vsub.f32 %v294_v38, %v298_v43 }
 0x233   :  { %v6573_v45 = vpop.eup %6572 }
 0x234   :  { %v300_v46 = vmul.f32 1.442695, %v299_v44  ;;  %v337_v47 = vsel %vm295_vm5, %v6573_v45, 0.0 }
 0x235   :  { %338 = vadd.xlane.f32.xlu2 %v337_v47 }
 0x236   :  { %6574 = vpow2.f32 %v300_v46 }
 0x23c   :  { %v6575_v48 = vpop.eup %6574 }
 0x23d   :  { %v302_v49 = vsel %vm295_vm5, %v6575_v48, 0.0 }
 0x23e   :  { %303 = vadd.xlane.f32.xlu2 %v302_v49 }
 0x2a8   :  { %v339_v51 = vpop.xlane.xlu2 %338 }
 0x2a9   :  { %6576 = vrcp.f32 %v339_v51  ;;  %v351_v56 = vand.u32 2147483648, %v339_v51  ;;  %v349_v58 = vand.u32 2147483647, %v339_v51  ;;  %vm345_vm8 = vweird.f32 %v339_v51 }
 0x2ab   :  { %v352_v60 = vor.u32 1.1754944e-38, %v351_v56  ;;  %vm350_vm10 = vcmp.eq.f32.partialorder %v349_v58, 8.507059e+37 }
 0x2af   :  { %v6577_v52 = vpop.eup %6576 }
 0x2b0   :  { %v341_v53 = vmul.f32 %v6577_v52, %v339_v51  ;;  %vm346_vm7 = vweird.f32 %v6577_v52  ;;  %v6289_v51 = vld [vmem:[#allocation7 + $0x30] sm:$0xff] }
 0x2b1   :  { %v304_v54 = vpop.xlane.xlu2 %303  ;;  %vm347_vm9 = vmor %vm345_vm8, %vm346_vm7 }
 0x2b2   :  { %v342_v55 = vsub.f32 1.0, %v341_v53  ;;  %6578 = vrcp.f32 %v304_v54  ;;  %v316_v3 = vand.u32 2147483648, %v304_v54  ;;  %v314_v5 = vand.u32 2147483647, %v304_v54  ;;  %v6287_v53 = vld [vmem:[#allocation7 + $0x20] sm:$0xff] }
 0x2b3   :  { %vm310_vm12 = vweird.f32 %v304_v54 }
 0x2b4   :  { %v343_v57 = vmul.f32 %v6577_v52, %v342_v55  ;;  %v317_v7 = vor.u32 1.1754944e-38, %v316_v3  ;;  %vm315_vm14 = vcmp.eq.f32.partialorder %v314_v5, 8.507059e+37  ;;  %v6285_v3 = vld [vmem:[#allocation7 + $0x10] sm:$0xff]  ;;  %v6283_v5 = vld [vmem:[#allocation7] sm:$0xff] }
 0x2b6   :  { %v344_v59 = vadd.f32 %v6577_v52, %v343_v57 }
 0x2b8   :  { %v6579_v61 = vpop.eup %6578  ;;  %v348_v62 = vsel %vm347_vm9, %v6577_v52, %v344_v59  ;;  %v6288_v52 = vld [vmem:[#allocation7 + $0x28] sm:$0xff] }
 0x2b9   :  { %v306_v63 = vmul.f32 %v6579_v61, %v304_v54  ;;  %v353_v0 = vsel %vm350_vm10, %v352_v60, %v348_v62  ;;  %vm311_vm11 = vweird.f32 %v6579_v61 }
 0x2ba   :  { %v354_v1 = vmul.f32 %v6573_v45, %v353_v0  ;;  %vm312_vm13 = vmor %vm310_vm12, %vm311_vm11 }
 0x2bb   :  { %v307_v2 = vsub.f32 1.0, %v306_v63 }
 0x2bc   :  { %5206 = vmatmul.msk.f32.vlgmr.msra.gmra.mxu3 %vm295_vm5, %v354_v1 }
 0x2bd   :  { %v308_v4 = vmul.f32 %v6579_v61, %v307_v2  ;;  %v6286_v2 = vld [vmem:[#allocation7 + $0x18] sm:$0xff] }
 0x2bf   :  { %v309_v6 = vadd.f32 %v6579_v61, %v308_v4  ;;  %v6284_v4 = vld [vmem:[#allocation7 + $0x8] sm:$0xff] }
 0x2c1   :  { %v313_v8 = vsel %vm312_vm13, %v6579_v61, %v309_v6 }
 0x2c2   :  { %v318_v9 = vsel %vm315_vm14, %v317_v7, %v313_v8 }
 0x2c3   :  { %v319_v10 = vmul.f32 %v6575_v48, %v318_v9 }
 0x2c5   :  { %5207 = vmatmul.msk.f32.vlgmr.msrb.gmra.mxu3 %vm295_vm5, %v319_v10 }
 0x33f   :  { %v376_v21 = vpop.f32.mrf.mxu3 }
 0x348   :  { %v399_v23 = vpop.f32.mrf.mxu3 }
 0x349   :  { %v400_v24 = vadd.f32 %v399_v23, %v376_v21 }
 0x34b   :  { %v403_v25 = vmin.f32 %v400_v24, 0.0  ;;  %vm402_vm15 = vcmp.gt.f32.partialorder %v400_v24, 0.0 }
 0x34d   :  { %v404_v26 = vmul.f32 1.442695, %v403_v25 }
 0x34f   :  { %6580 = vpow2.f32 %v404_v26 }
 0x355   :  { %v6581_v27 = vpop.eup %6580 }
 0x356   :  { %v5208_v28 = vadd.f32 -1.0, %v6581_v27 }
 0x358   :  { %v407_v30 = vsel %vm402_vm15, %v400_v24, %v5208_v28  ;;  %v6295_v24 = vld [vmem:[#allocation10 + $0x20] sm:$0xff]  ;;  %v6294_v28 = vld [vmem:[#allocation10 + $0x18] sm:$0xff] }
 0x359   :  { %v408_v31 = vpack.c.bf16 %v407_v30, %v407_v30 }
 0x35b   :  { %481 = vmatmul.bf16.vlgmr.msrb.gmra.mxu1 %v408_v31 }
 0x3d8   :  { %v482_v33 = vpop.f32.mrf.mxu1 }
 0x3d9   :  { %509 = vmatpush.xpose.msrb.mxu2 %v482_v33  ;;  %562 = vmatpush.msra.mxu3 %v482_v33  ;;  %v491_v34 = vmul.f32 %v6548_v32, %v482_v33 }
 0x3db   :  { %492 = vadd.xlane.f32.xlu1 %v491_v34  ;;  %768 = vmatpush.bf16.msrb.mxu3 %v6298_v14  ;;  %v6293_v34 = vld [vmem:[#allocation10 + $0x10] sm:$0xff] }
 0x3dc   :  { %510 = vmatmul.f32.vlgmr.msrb.gmra.mxu2 %v487_v35  ;;  %v6299_v14 = vld [vmem:[#allocation2 + $0x40] sm:$0xff] }
 0x3dd   :  { %642 = vmatpush.bf16.msra.mxu2 %v6290_v50 }
 0x3df   :  { %769 = vmatpush.bf16.msrb.mxu3 %v6297_v17  ;;  %v5340_v17 = vld [vmem:[%s7251_s3 + $0x2] sm:$0x3] }
 0x3e0   :  { %v484_v36 = vpop.f32.mrf.mxu1  ;;  %879 = vmatpush.xpose.msra.mxu1 %v5340_v17 }
 0x3e1   :  { %643 = vmatpush.bf16.msra.mxu2 %v6289_v51 }
 0x3e3   :  { %770 = vmatpush.bf16.msrb.mxu3 %v6296_v20 }
 0x3e5   :  { %644 = vmatpush.bf16.msra.mxu2 %v6288_v52  ;;  %v6304_v52 = vld [vmem:[#allocation2 + $0x68] sm:$0xff] }
 0x3e7   :  { %771 = vmatpush.bf16.msrb.mxu3 %v6295_v24 }
 0x3e9   :  { %645 = vmatpush.bf16.msra.mxu2 %v6287_v53 }
 0x3eb   :  { %772 = vmatpush.bf16.msrb.mxu3 %v6294_v28 }
 0x3ed   :  { %646 = vmatpush.bf16.msra.mxu2 %v6286_v2 }
 0x3ef   :  { %773 = vmatpush.bf16.msrb.mxu3 %v6293_v34 }
 0x3f1   :  { %647 = vmatpush.bf16.msra.mxu2 %v6285_v3 }
 0x3f5   :  { %648 = vmatpush.bf16.msra.mxu2 %v6284_v4 }
 0x3f9   :  { %649 = vmatpush.bf16.msra.mxu2 %v6283_v5 }
 0x44e   :  { %v493_v39 = vpop.xlane.xlu1 %492 }
 0x45f   :  { %v511_v37 = vpop.f32.mrf.mxu2 }
 0x460   :  { %v514_v38 = vperm.slane %v511_v37, 0 }
 0x462   :  { %v515_v40 = vadd.f32 %v514_v38, %v493_v39  ;;  %v6292_v39 = vld [vmem:[#allocation10 + $0x8] sm:$0xff] }
 0x463   :  { %774 = vmatpush.bf16.msrb.mxu3 %v6292_v39 }
 0x464   :  { %v517_v41 = vmul.f32 0.01, %v515_v40  ;;  %vm516_vm0 = vcmp.gt.f32.partialorder %v515_v40, 0.0 }
 0x466   :  { %v518_v42 = vsel %vm516_vm0, %v515_v40, %v517_v41 }
 0x467   :  { %v519_v43 = vadd.f32 %v518_v42, %v7018_v29 }
 0x469   :  { %v520_v44 = vsel %vm295_vm5, %v519_v43, -inf }
 0x46a   :  { %521 = vmax.xlane.f32.xlu2 %v520_v44 }
 0x4dd   :  { %v522_v45 = vpop.xlane.xlu2 %521 }
 0x4de   :  { %v523_v46 = vsub.f32 %v519_v43, %v522_v45  ;;  %v6291_v43 = vld [vmem:[#allocation10] sm:$0xff] }
 0x4df   :  { %775 = vmatpush.bf16.msrb.mxu3 %v6291_v43 }
 0x4e0   :  { %v524_v47 = vmul.f32 1.442695, %v523_v46 }
 0x4e2   :  { %6582 = vpow2.f32 %v524_v47  ;;  %v6306_v47 = vld [vmem:[#allocation2 + $0x78] sm:$0xff] }
 0x4e3   :  { %847 = vmatpush.bf16.msrb.mxu0 %v6306_v47 }
 0x4e8   :  { %v6583_v48 = vpop.eup %6582 }
 0x4e9   :  { %v526_v49 = vsel %vm295_vm5, %v6583_v48, 0.0 }
 0x4ea   :  { %527 = vadd.xlane.f32.xlu0 %v526_v49  ;;  %v6305_v49 = vld [vmem:[#allocation2 + $0x70] sm:$0xff] }
 0x4eb   :  { %848 = vmatpush.bf16.msrb.mxu0 %v6305_v49 }
 0x4ef   :  { %849 = vmatpush.bf16.msrb.mxu0 %v6304_v52 }
 0x55d   :  { %v528_v54 = vpop.xlane.xlu0 %527 }
 0x55e   :  { %6584 = vrcp.f32 %v528_v54  ;;  %v540_v58 = vand.u32 2147483648, %v528_v54  ;;  %v538_v60 = vand.u32 2147483647, %v528_v54  ;;  %vm534_vm2 = vweird.f32 %v528_v54 }
 0x560   :  { %v541_v62 = vor.u32 1.1754944e-38, %v540_v58  ;;  %vm539_vm4 = vcmp.eq.f32.partialorder %v538_v60, 8.507059e+37 }
 0x564   :  { %v6585_v55 = vpop.eup %6584 }
 0x565   :  { %v530_v56 = vmul.f32 %v6585_v55, %v528_v54  ;;  %vm535_vm1 = vweird.f32 %v6585_v55  ;;  %v6303_v54 = vld [vmem:[#allocation2 + $0x60] sm:$0xff] }
 0x566   :  { %vm536_vm3 = vmor %vm534_vm2, %vm535_vm1  ;;  %850 = vmatpush.bf16.msrb.mxu0 %v6303_v54 }
 0x567   :  { %v531_v57 = vsub.f32 1.0, %v530_v56 }
 0x569   :  { %v532_v59 = vmul.f32 %v6585_v55, %v531_v57 }
 0x56b   :  { %v533_v61 = vadd.f32 %v6585_v55, %v532_v59  ;;  %v6302_v59 = vld [vmem:[#allocation2 + $0x58] sm:$0xff] }
 0x56c   :  { %851 = vmatpush.bf16.msrb.mxu0 %v6302_v59 }
 0x56d   :  { %v537_v63 = vsel %vm536_vm3, %v6585_v55, %v533_v61 }
 0x56e   :  { %v542_v0 = vsel %vm539_vm4, %v541_v62, %v537_v63 }
 0x56f   :  { %v543_v1 = vmul.f32 %v6583_v48, %v542_v0 }
 0x571   :  { %5241 = vmatmul.msk.f32.vlgmr.msra.gmra.mxu3 %vm295_vm5, %v543_v1  ;;  %v6301_v1 = vld [vmem:[#allocation2 + $0x50] sm:$0xff] }
 0x572   :  { %852 = vmatpush.bf16.msrb.mxu0 %v6301_v1 }
 0x5f4   :  { %v564_v6 = vpop.f32.mrf.mxu3 }
 0x5f5   :  { %v568_v7 = vmin.f32 %v564_v6, 0.0  ;;  %vm567_vm6 = vcmp.gt.f32.partialorder %v564_v6, 0.0 }
 0x5f7   :  { %v569_v8 = vmul.f32 1.442695, %v568_v7  ;;  %v6300_v7 = vld [vmem:[#allocation2 + $0x48] sm:$0xff] }
 0x5f8   :  { %853 = vmatpush.bf16.msrb.mxu0 %v6300_v7 }
 0x5f9   :  { %6586 = vpow2.f32 %v569_v8 }
 0x5fc   :  { %854 = vmatpush.bf16.msrb.mxu0 %v6299_v14 }
 0x5ff   :  { %v6587_v9 = vpop.eup %6586 }
 0x600   :  { %v5242_v10 = vadd.f32 -1.0, %v6587_v9 }
 0x602   :  { %v572_v12 = vsel %vm567_vm6, %v564_v6, %v5242_v10 }
 0x603   :  { %v573_v13 = vpack.c.bf16 %v572_v12, %v572_v12 }
 0x605   :  { %650 = vmatmul.bf16.vlgmr.msra.gmra.mxu2 %v573_v13 }
 0x688   :  { %v651_v19 = vpop.f32.mrf.mxu2 }
 0x689   :  { %v7035_v21 = vadd.f32 %v6549_v18, %v651_v19  ;;  %v6550_v18 = vld [vmem:[#allocation12] ss:$0 sm:$0xff] }
 0x68b   :  { %v656_v23 = vmul.f32 0.70710677, %v7035_v21  ;;  %v655_v9 = vmul.f32 0.5, %v7035_v21 }
 0x68d   :  { %v657_v25 = vmul.f32 %v656_v23, %v656_v23 }
 0x68f   :  { %v658_v26 = vmin.f32 %v657_v25, 16.0 }
 0x690   :  { %v653_v27 = vpop.f32.mrf.mxu2 }
 0x691   :  { %v659_v30 = vmul.f32 2.1237322e-06, %v658_v26  ;;  %v670_v31 = vmul.f32 3.8918573e-05, %v658_v26  ;;  %v5341_v27 = vld [vmem:[%s7252_s4 + $0x2] sm:$0x3] }
 0x693   :  { %v660_v32 = vadd.f32 0.00028619796, %v659_v30  ;;  %v671_v33 = vadd.f32 0.001143296, %v670_v31 }
 0x695   :  { %v661_v35 = vmul.f32 %v660_v32, %v658_v26  ;;  %v672_v36 = vmul.f32 %v671_v33, %v658_v26 }
 0x697   :  { %v673_v37 = vadd.f32 0.014752088, %v672_v36  ;;  %v662_v38 = vadd.f32 0.0036580483, %v661_v35 }
 0x699   :  { %v674_v40 = vmul.f32 %v673_v37, %v658_v26  ;;  %v663_v42 = vmul.f32 %v662_v38, %v658_v26 }
 0x69b   :  { %v675_v41 = vadd.f32 0.112945676, %v674_v40  ;;  %v664_v46 = vadd.f32 0.05243302, %v663_v42 }
 0x69d   :  { %v676_v44 = vmul.f32 %v675_v41, %v658_v26  ;;  %v665_v51 = vmul.f32 %v664_v46, %v658_v26 }
 0x69f   :  { %v677_v45 = vadd.f32 0.4994258, %v676_v44  ;;  %v666_v53 = vadd.f32 0.18741608, %v665_v51 }
 0x6a1   :  { %v678_v48 = vmul.f32 %v677_v45, %v658_v26  ;;  %v667_v56 = vmul.f32 %v666_v53, %v658_v26 }
 0x6a3   :  { %v679_v50 = vadd.f32 1.0, %v678_v48  ;;  %v668_v61 = vadd.f32 1.1283791, %v667_v56  ;;  %v6314_v56 = vld [vmem:[#allocation4 + $0x78] sm:$0xff] }
 0x6a5   :  { %6588 = vrcp.f32 %v679_v50  ;;  %v691_v60 = vand.u32 2147483648, %v679_v50  ;;  %v689_v63 = vand.u32 2147483647, %v679_v50  ;;  %vm685_vm8 = vweird.f32 %v679_v50 }
 0x6a6   :  { %v669_v3 = vmul.f32 %v668_v61, %v656_v23 }
 0x6a7   :  { %v692_v2 = vor.u32 1.1754944e-38, %v691_v60  ;;  %vm690_vm10 = vcmp.eq.f32.partialorder %v689_v63, 8.507059e+37 }
 0x6ab   :  { %v6589_v55 = vpop.eup %6588 }
 0x6ac   :  { %v681_v57 = vmul.f32 %v6589_v55, %v679_v50  ;;  %vm686_vm7 = vweird.f32 %v6589_v55 }
 0x6ad   :  { %vm687_vm9 = vmor %vm685_vm8, %vm686_vm7 }
 0x6ae   :  { %v682_v58 = vsub.f32 1.0, %v681_v57 }
 0x6b0   :  { %v683_v62 = vmul.f32 %v6589_v55, %v682_v58 }
 0x6b2   :  { %v684_v0 = vadd.f32 %v6589_v55, %v683_v62 }
 0x6b4   :  { %v688_v4 = vsel %vm687_vm9, %v6589_v55, %v684_v0 }
 0x6b5   :  { %v693_v5 = vsel %vm690_vm10, %v692_v2, %v688_v4 }
 0x6b6   :  { %v694_v6 = vmul.f32 %v693_v5, %v669_v3 }
 0x6b8   :  { %v5275_v8 = vclamps-f32 %v694_v6, 1.0 }
 0x6ba   :  { %v697_v10 = vadd.f32 1.0, %v5275_v8 }
 0x6bc   :  { %v698_v12 = vmul.f32 %v697_v10, %v655_v9 }
 0x6be   :  { %v699_v13 = vpack.c.bf16 %v698_v12, %v698_v12 }
 0x6c0   :  { %776 = vmatmul.bf16.vlgmr.msrb.gmra.mxu3 %v699_v13 }
 0x743   :  { %v777_v19 = vpop.f32.mrf.mxu3 }
 0x744   :  { %v778_v20 = vadd.f32 %v6550_v18, %v777_v19 }
 0x746   :  { %v781_v23 = vpack.c.bf16 %v778_v20, %v778_v20  ;;  %v6313_v20 = vld [vmem:[#allocation4 + $0x70] sm:$0xff] }
 0x748   :  { %855 = vmatmul.bf16.vlgmr.msrb.gmra.mxu0 %v781_v23  ;;  %v6312_v23 = vld [vmem:[#allocation4 + $0x68] sm:$0xff] }
 0x74b   :  { %v779_v24 = vpop.f32.mrf.mxu3 }
 0x74c   :  { %v6311_v24 = vld [vmem:[#allocation4 + $0x60] sm:$0xff] }
 0x7c5   :  { %v856_v25 = vpop.f32.mrf.mxu0 }
 0x7c6   :  { %v939_v21 = vmul.f32 %v7005_v16, %v856_v25  ;;  %v974_v26 = vmul.f32 %v7003_v15, %v856_v25  ;;  %880 = vmatmul.f32.vlgmr.msra.gmra.mxu1 %v856_v25 }
 0x7c7   :  { %899 = vmatpush.xpose.msrb.mxu1 %v856_v25  ;;  %v6310_v25 = vld [vmem:[#allocation4 + $0x58] sm:$0xff] }
 0x7c8   :  { %993 = vmatpush.msrb.mxu2 %v974_v26  ;;  %1016 = vmatpush.msra.mxu3 %v939_v21  ;;  %v6309_v21 = vld [vmem:[#allocation4 + $0x50] sm:$0xff]  ;;  %v6308_v26 = vld [vmem:[#allocation4 + $0x48] sm:$0xff] }
 0x7cb   :  { %1093 = vmatpush.bf16.msra.mxu1 %v6314_v56  ;;  %v6322_v56 = vld [vmem:[#allocation7 + $0x78] sm:$0xff] }
 0x7cc   :  { %1266 = vmatpush.bf16.msra.mxu0 %v6322_v56 }
 0x7cd   :  { %v858_v28 = vpop.f32.mrf.mxu0 }
 0x7ce   :  { %900 = vmatmul.f32.vlgmr.msrb.gmra.mxu1 %v5341_v27  ;;  %v6307_v27 = vld [vmem:[#allocation4 + $0x40] sm:$0xff] }
 0x7cf   :  { %1094 = vmatpush.bf16.msra.mxu1 %v6313_v20 }
 0x7d3   :  { %1095 = vmatpush.bf16.msra.mxu1 %v6312_v23  ;;  %v6330_v23 = vld [vmem:[#allocation10 + $0x78] sm:$0xff] }
 0x7d7   :  { %1096 = vmatpush.bf16.msra.mxu1 %v6311_v24  ;;  %v6329_v24 = vld [vmem:[#allocation10 + $0x70] sm:$0xff] }
 0x7db   :  { %1097 = vmatpush.bf16.msra.mxu1 %v6310_v25  ;;  %v6552_v25 = vld [vmem:[#allocation9 + $0x1] ss:$0 sm:$0xff] }
 0x7df   :  { %1098 = vmatpush.bf16.msra.mxu1 %v6309_v21 }
 0x7e3   :  { %1099 = vmatpush.bf16.msra.mxu1 %v6308_v26  ;;  %v6328_v26 = vld [vmem:[#allocation10 + $0x68] sm:$0xff] }
 0x7e7   :  { %1100 = vmatpush.bf16.msra.mxu1 %v6307_v27 }
 0x843   :  { %v881_v30 = vpop.f32.mrf.mxu1 }
 0x844   :  { %941 = vperm.xlu2 %6540, %v881_v30   ;;  %906 = vperm.xlu1 %6539, %v881_v30  }
 0x84b   :  { %v901_v31 = vpop.f32.mrf.mxu1 }
 0x84c   :  { %v944_v32 = vperm.slane %v901_v31, 1  ;;  %v909_v39 = vperm.slane %v901_v31, 0 }
 0x89e   :  { %v942_v33 = vpop.permute.xlu2 %941 }
 0x89f   :  { %v945_v34 = vadd.f32 %v944_v32, %v942_v33 }
 0x8a1   :  { %vm946_vm11 = vcmp.gt.f32.partialorder %v945_v34, 0.0  ;;  %v947_v35 = vmul.f32 0.01, %v945_v34 }
 0x8a3   :  { %v948_v36 = vsel %vm946_vm11, %v945_v34, %v947_v35 }
 0x8a4   :  { %v949_v37 = vadd.f32 %v948_v36, %v7018_v29 }
 0x8a6   :  { %v950_v38 = vsel %vm295_vm5, %v949_v37, -inf }
 0x8a7   :  { %951 = vmax.xlane.f32.xlu1 %v950_v38  ;;  %v6551_v38 = vld [vmem:[%s7254_s6 + $0x1] ss:$0 sm:$0xff] }
 0x8b6   :  { %v907_v40 = vpop.permute.xlu1 %906 }
 0x8b7   :  { %v910_v41 = vadd.f32 %v909_v39, %v907_v40 }
 0x8b9   :  { %vm911_vm12 = vcmp.gt.f32.partialorder %v910_v41, 0.0  ;;  %v912_v42 = vmul.f32 0.01, %v910_v41 }
 0x8bb   :  { %v913_v43 = vsel %vm911_vm12, %v910_v41, %v912_v42  ;;  %v1109_v41 = vld [vmem:[#allocation6 + $0x1] sm:$0x1] }
 0x8bc   :  { %v914_v44 = vadd.f32 %v913_v43, %v7018_v29 }
 0x8be   :  { %v915_v45 = vsel %vm295_vm5, %v914_v44, -inf }
 0x8bf   :  { %916 = vmax.xlane.f32.xlu2 %v915_v45 }
 0x91a   :  { %v952_v46 = vpop.xlane.xlu1 %951 }
 0x91b   :  { %v953_v49 = vsub.f32 %v949_v37, %v952_v46 }
 0x91d   :  { %v954_v51 = vmul.f32 1.442695, %v953_v49 }
 0x932   :  { %v917_v47 = vpop.xlane.xlu2 %916 }
 0x933   :  { %v918_v48 = vsub.f32 %v914_v44, %v917_v47 }
 0x935   :  { %v919_v50 = vmul.f32 1.442695, %v918_v48 }
 0x937   :  { %6590 = vpow2.f32 %v919_v50 }
 0x938   :  { %6592 = vpow2.f32 %v954_v51 }
 0x93d   :  { %v6591_v52 = vpop.eup %6590 }
 0x93e   :  { %v921_v53 = vsel %vm295_vm5, %v6591_v52, 0.0  ;;  %v6593_v54 = vpop.eup %6592 }
 0x93f   :  { %922 = vadd.xlane.f32.xlu0 %v921_v53  ;;  %v956_v55 = vsel %vm295_vm5, %v6593_v54, 0.0 }
 0x947   :  { %957 = vadd.xlane.f32.xlu0 %v956_v55 }
 0x9b2   :  { %v923_v57 = vpop.xlane.xlu0 %922 }
 0x9b3   :  { %6594 = vrcp.f32 %v923_v57  ;;  %v935_v62 = vand.u32 2147483648, %v923_v57  ;;  %v933_v0 = vand.u32 2147483647, %v923_v57  ;;  %vm929_vm14 = vweird.f32 %v923_v57 }
 0x9b5   :  { %v936_v3 = vor.u32 1.1754944e-38, %v935_v62  ;;  %vm934_vm0 = vcmp.eq.f32.partialorder %v933_v0, 8.507059e+37 }
 0x9b9   :  { %v6595_v58 = vpop.eup %6594 }
 0x9ba   :  { %v925_v59 = vmul.f32 %v6595_v58, %v923_v57  ;;  %v958_v60 = vpop.xlane.xlu0 %957  ;;  %vm930_vm13 = vweird.f32 %v6595_v58  ;;  %v6321_v57 = vld [vmem:[#allocation7 + $0x70] sm:$0xff] }
 0x9bb   :  { %6596 = vrcp.f32 %v958_v60  ;;  %vm931_vm15 = vmor %vm929_vm14, %vm930_vm13  ;;  %v970_v9 = vand.u32 2147483648, %v958_v60  ;;  %v968_v12 = vand.u32 2147483647, %v958_v60  ;;  %vm964_vm2 = vweird.f32 %v958_v60  ;;  %1267 = vmatpush.bf16.msra.mxu0 %v6321_v57  ;;  %v6336_v57 = vld [vmem:[#allocation2 + $0xa8] sm:$0xff] }
 0x9bc   :  { %v926_v61 = vsub.f32 1.0, %v925_v59  ;;  %v6319_v59 = vld [vmem:[#allocation7 + $0x60] sm:$0xff] }
 0x9bd   :  { %v971_v14 = vor.u32 1.1754944e-38, %v970_v9  ;;  %vm969_vm4 = vcmp.eq.f32.partialorder %v968_v12, 8.507059e+37  ;;  %v6316_v9 = vld [vmem:[#allocation7 + $0x48] sm:$0xff] }
 0x9be   :  { %v927_v63 = vmul.f32 %v6595_v58, %v926_v61 }
 0x9c0   :  { %v928_v1 = vadd.f32 %v6595_v58, %v927_v63 }
 0x9c1   :  { %v6597_v2 = vpop.eup %6596 }
 0x9c2   :  { %v932_v4 = vsel %vm931_vm15, %v6595_v58, %v928_v1  ;;  %v960_v5 = vmul.f32 %v6597_v2, %v958_v60  ;;  %vm965_vm1 = vweird.f32 %v6597_v2  ;;  %v6320_v58 = vld [vmem:[#allocation7 + $0x68] sm:$0xff] }
 0x9c3   :  { %v937_v6 = vsel %vm934_vm0, %v936_v3, %v932_v4  ;;  %vm966_vm3 = vmor %vm964_vm2, %vm965_vm1  ;;  %1268 = vmatpush.bf16.msra.mxu0 %v6320_v58 }
 0x9c4   :  { %v961_v7 = vsub.f32 1.0, %v960_v5  ;;  %v938_v8 = vmul.f32 %v6591_v52, %v937_v6 }
 0x9c6   :  { %v962_v10 = vmul.f32 %v6597_v2, %v961_v7  ;;  %5343 = vmatmul.msk.f32.vlgmr.msra.gmra.mxu3 %vm295_vm5, %v938_v8  ;;  %v6318_v7 = vld [vmem:[#allocation7 + $0x58] sm:$0xff]  ;;  %v6317_v8 = vld [vmem:[#allocation7 + $0x50] sm:$0xff] }
 0x9c7   :  { %1269 = vmatpush.bf16.msra.mxu0 %v6319_v59  ;;  %v6335_v59 = vld [vmem:[#allocation2 + $0xa0] sm:$0xff] }
 0x9c8   :  { %v963_v13 = vadd.f32 %v6597_v2, %v962_v10  ;;  %v6315_v10 = vld [vmem:[#allocation7 + $0x40] sm:$0xff] }
 0x9ca   :  { %v967_v17 = vsel %vm966_vm3, %v6597_v2, %v963_v13 }
 0x9cb   :  { %v972_v18 = vsel %vm969_vm4, %v971_v14, %v967_v17  ;;  %1270 = vmatpush.bf16.msra.mxu0 %v6318_v7 }
 0x9cc   :  { %v973_v19 = vmul.f32 %v6593_v54, %v972_v18 }
 0x9ce   :  { %5342 = vmatmul.msk.f32.vlgmr.msrb.gmra.mxu2 %vm295_vm5, %v973_v19 }
 0x9cf   :  { %1271 = vmatpush.bf16.msra.mxu0 %v6317_v8 }
 0x9d3   :  { %1272 = vmatpush.bf16.msra.mxu0 %v6316_v9 }
 0x9d7   :  { %1273 = vmatpush.bf16.msra.mxu0 %v6315_v10 }
 0xa49   :  { %v1018_v28 = vpop.f32.mrf.mxu3 }
 0xa51   :  { %v995_v30 = vpop.f32.mrf.mxu2 }
 0xa52   :  { %v1019_v31 = vadd.f32 %v1018_v28, %v995_v30  ;;  %v6327_v30 = vld [vmem:[#allocation10 + $0x60] sm:$0xff] }
 0xa54   :  { %v1022_v32 = vmin.f32 %v1019_v31, 0.0  ;;  %vm1021_vm6 = vcmp.gt.f32.partialorder %v1019_v31, 0.0 }
 0xa56   :  { %v1023_v33 = vmul.f32 1.442695, %v1022_v32 }
 0xa58   :  { %6598 = vpow2.f32 %v1023_v33 }
 0xa5e   :  { %v6599_v34 = vpop.eup %6598 }
 0xa5f   :  { %v5344_v35 = vadd.f32 -1.0, %v6599_v34  ;;  %v6326_v34 = vld [vmem:[#allocation10 + $0x58] sm:$0xff] }
 0xa61   :  { %v1026_v36 = vsel %vm1021_vm6, %v1019_v31, %v5344_v35 }
 0xa62   :  { %v1027_v37 = vpack.c.bf16 %v1026_v36, %v1026_v36 }
 0xa64   :  { %1101 = vmatmul.bf16.vlgmr.msra.gmra.mxu1 %v1027_v37 }
 0xae1   :  { %v1102_v39 = vpop.f32.mrf.mxu1 }
 0xae2   :  { %1131 = vmatpush.xpose.msra.mxu2 %v1102_v39  ;;  %1184 = vmatpush.msrb.mxu3 %v1102_v39  ;;  %v1113_v40 = vmul.f32 %v6551_v38, %v1102_v39  ;;  %v6325_v39 = vld [vmem:[#allocation10 + $0x50] sm:$0xff] }
 0xae4   :  { %1114 = vadd.xlane.f32.xlu0 %v1113_v40 }
 0xae5   :  { %1132 = vmatmul.f32.vlgmr.msra.gmra.mxu2 %v1109_v41 }
 0xae6   :  { %1394 = vmatpush.bf16.msrb.mxu2 %v6330_v23  ;;  %v5477_v23 = vld [vmem:[%s7251_s3 + $0x4] sm:$0x3] }
 0xae7   :  { %1505 = vmatpush.xpose.msrb.mxu1 %v5477_v23 }
 0xae9   :  { %v1104_v42 = vpop.f32.mrf.mxu1 }
 0xaea   :  { %1395 = vmatpush.bf16.msrb.mxu2 %v6329_v24  ;;  %v6553_v24 = vld [vmem:[#allocation12 + $0x1] ss:$0 sm:$0xff] }
 0xaee   :  { %1396 = vmatpush.bf16.msrb.mxu2 %v6328_v26 }
 0xaf2   :  { %1397 = vmatpush.bf16.msrb.mxu2 %v6327_v30 }
 0xaf6   :  { %1398 = vmatpush.bf16.msrb.mxu2 %v6326_v34 }
 0xafa   :  { %1399 = vmatpush.bf16.msrb.mxu2 %v6325_v39 }
 0xb57   :  { %v1115_v45 = vpop.xlane.xlu0 %1114 }
 0xb68   :  { %v1133_v43 = vpop.f32.mrf.mxu2 }
 0xb69   :  { %v1136_v44 = vperm.slane %v1133_v43, 0 }
 0xb6b   :  { %v1137_v46 = vadd.f32 %v1136_v44, %v1115_v45  ;;  %v6324_v44 = vld [vmem:[#allocation10 + $0x48] sm:$0xff] }
 0xb6c   :  { %1400 = vmatpush.bf16.msrb.mxu2 %v6324_v44 }
 0xb6d   :  { %v1139_v47 = vmul.f32 0.01, %v1137_v46  ;;  %vm1138_vm7 = vcmp.gt.f32.partialorder %v1137_v46, 0.0 }
 0xb6f   :  { %v1140_v48 = vsel %vm1138_vm7, %v1137_v46, %v1139_v47 }
 0xb70   :  { %v1141_v49 = vadd.f32 %v1140_v48, %v7018_v29  ;;  %v6323_v48 = vld [vmem:[#allocation10 + $0x40] sm:$0xff] }
 0xb71   :  { %1401 = vmatpush.bf16.msrb.mxu2 %v6323_v48 }
 0xb72   :  { %v1142_v50 = vsel %vm295_vm5, %v1141_v49, -inf }
 0xb73   :  { %1143 = vmax.xlane.f32.xlu2 %v1142_v50 }
 0xbe6   :  { %v1144_v51 = vpop.xlane.xlu2 %1143 }
 0xbe7   :  { %v1145_v52 = vsub.f32 %v1141_v49, %v1144_v51 }
 0xbe9   :  { %v1146_v53 = vmul.f32 1.442695, %v1145_v52  ;;  %v6338_v52 = vld [vmem:[#allocation2 + $0xb8] sm:$0xff] }
 0xbea   :  { %1473 = vmatpush.bf16.msra.mxu3 %v6338_v52 }
 0xbeb   :  { %6600 = vpow2.f32 %v1146_v53 }
 0xbf1   :  { %v6601_v54 = vpop.eup %6600 }
 0xbf2   :  { %v1148_v55 = vsel %vm295_vm5, %v6601_v54, 0.0 }
 0xbf3   :  { %1149 = vadd.xlane.f32.xlu0 %v1148_v55 }
 0xc66   :  { %v1150_v60 = vpop.xlane.xlu0 %1149 }
 0xc67   :  { %6602 = vrcp.f32 %v1150_v60  ;;  %v1162_v63 = vand.u32 2147483648, %v1150_v60  ;;  %v1160_v1 = vand.u32 2147483647, %v1150_v60  ;;  %vm1156_vm9 = vweird.f32 %v1150_v60 }
 0xc69   :  { %v1163_v3 = vor.u32 1.1754944e-38, %v1162_v63  ;;  %vm1161_vm11 = vcmp.eq.f32.partialorder %v1160_v1, 8.507059e+37  ;;  %v6334_v63 = vld [vmem:[#allocation2 + $0x98] sm:$0xff] }
 0xc6d   :  { %v6603_v29 = vpop.eup %6602 }
 0xc6e   :  { %v1152_v61 = vmul.f32 %v6603_v29, %v1150_v60  ;;  %vm1157_vm8 = vweird.f32 %v6603_v29 }
 0xc6f   :  { %vm1158_vm10 = vmor %vm1156_vm9, %vm1157_vm8 }
 0xc70   :  { %v1153_v62 = vsub.f32 1.0, %v1152_v61 }
 0xc72   :  { %v1154_v0 = vmul.f32 %v6603_v29, %v1153_v62 }
 0xc74   :  { %v1155_v2 = vadd.f32 %v6603_v29, %v1154_v0 }
 0xc76   :  { %v1159_v4 = vsel %vm1158_vm10, %v6603_v29, %v1155_v2 }
 0xc77   :  { %v1164_v5 = vsel %vm1161_vm11, %v1163_v3, %v1159_v4 }
 0xc78   :  { %v1165_v6 = vmul.f32 %v6601_v54, %v1164_v5  ;;  %v6337_v54 = vld [vmem:[#allocation2 + $0xb0] sm:$0xff] }
 0xc79   :  { %1474 = vmatpush.bf16.msra.mxu3 %v6337_v54  ;;  %v6333_v5 = vld [vmem:[#allocation2 + $0x90] sm:$0xff] }
 0xc7a   :  { %5378 = vmatmul.msk.f32.vlgmr.msrb.gmra.mxu3 %vm295_vm5, %v1165_v6 }
 0xc7d   :  { %1475 = vmatpush.bf16.msra.mxu3 %v6336_v57 }
 0xc81   :  { %1476 = vmatpush.bf16.msra.mxu3 %v6335_v59 }
 0xc85   :  { %1477 = vmatpush.bf16.msra.mxu3 %v6334_v63  ;;  %v6344_v63 = vld [vmem:[#allocation4 + $0xa8] sm:$0xff] }
 0xc89   :  { %1478 = vmatpush.bf16.msra.mxu3 %v6333_v5 }
 0xcfd   :  { %v1186_v12 = vpop.f32.mrf.mxu3 }
 0xcfe   :  { %v1190_v13 = vmin.f32 %v1186_v12, 0.0  ;;  %vm1189_vm12 = vcmp.gt.f32.partialorder %v1186_v12, 0.0 }
 0xd00   :  { %v1191_v14 = vmul.f32 1.442695, %v1190_v13 }
 0xd02   :  { %6604 = vpow2.f32 %v1191_v14 }
 0xd08   :  { %v6605_v17 = vpop.eup %6604 }
 0xd09   :  { %v5379_v18 = vadd.f32 -1.0, %v6605_v17 }
 0xd0b   :  { %v1194_v19 = vsel %vm1189_vm12, %v1186_v12, %v5379_v18  ;;  %v6332_v12 = vld [vmem:[#allocation2 + $0x88] sm:$0xff] }
 0xd0c   :  { %v1195_v20 = vpack.c.bf16 %v1194_v19, %v1194_v19  ;;  %1479 = vmatpush.bf16.msra.mxu3 %v6332_v12 }
 0xd0e   :  { %1274 = vmatmul.bf16.vlgmr.msra.gmra.mxu0 %v1195_v20  ;;  %v6331_v20 = vld [vmem:[#allocation2 + $0x80] sm:$0xff] }
 0xd10   :  { %1480 = vmatpush.bf16.msra.mxu3 %v6331_v20 }
 0xd8b   :  { %v1275_v21 = vpop.f32.mrf.mxu0 }
 0xd8c   :  { %v7062_v27 = vadd.f32 %v6552_v25, %v1275_v21 }
 0xd8e   :  { %v1280_v28 = vmul.f32 0.70710677, %v7062_v27  ;;  %v1279_v14 = vmul.f32 0.5, %v7062_v27 }
 0xd90   :  { %v1281_v31 = vmul.f32 %v1280_v28, %v1280_v28 }
 0xd92   :  { %v1282_v32 = vmin.f32 %v1281_v31, 16.0 }
 0xd93   :  { %v1277_v33 = vpop.f32.mrf.mxu0 }
 0xd94   :  { %v1283_v35 = vmul.f32 2.1237322e-06, %v1282_v32  ;;  %v1294_v36 = vmul.f32 3.8918573e-05, %v1282_v32 }
 0xd96   :  { %v1284_v37 = vadd.f32 0.00028619796, %v1283_v35  ;;  %v1295_v38 = vadd.f32 0.001143296, %v1294_v36 }
 0xd98   :  { %v1285_v40 = vmul.f32 %v1284_v37, %v1282_v32  ;;  %v1296_v41 = vmul.f32 %v1295_v38, %v1282_v32 }
 0xd9a   :  { %v1297_v42 = vadd.f32 0.014752088, %v1296_v41  ;;  %v1286_v43 = vadd.f32 0.0036580483, %v1285_v40 }
 0xd9c   :  { %v1298_v45 = vmul.f32 %v1297_v42, %v1282_v32  ;;  %v1287_v47 = vmul.f32 %v1286_v43, %v1282_v32 }
 0xd9e   :  { %v1299_v46 = vadd.f32 0.112945676, %v1298_v45  ;;  %v1288_v51 = vadd.f32 0.05243302, %v1287_v47  ;;  %v7078_v45 = vld [vmem:[%s7249_s1] sm:$0xff] }
 0xda0   :  { %v1300_v49 = vmul.f32 %v1299_v46, %v1282_v32  ;;  %v1289_v56 = vmul.f32 %v1288_v51, %v1282_v32 }
 0xda2   :  { %v1301_v50 = vadd.f32 0.4994258, %v1300_v49  ;;  %v1290_v58 = vadd.f32 0.18741608, %v1289_v56 }
 0xda4   :  { %v1302_v53 = vmul.f32 %v1301_v50, %v1282_v32  ;;  %v1291_v29 = vmul.f32 %v1290_v58, %v1282_v32  ;;  %v5478_v32 = vld [vmem:[%s7252_s4 + $0x4] sm:$0x3] }
 0xda6   :  { %v1303_v55 = vadd.f32 1.0, %v1302_v53  ;;  %v1292_v1 = vadd.f32 1.1283791, %v1291_v29  ;;  %v6346_v29 = vld [vmem:[#allocation4 + $0xb8] sm:$0xff] }
 0xda7   :  { %1719 = vmatpush.bf16.msrb.mxu3 %v6346_v29  ;;  %v6354_v29 = vld [vmem:[#allocation7 + $0xb8] sm:$0xff] }
 0xda8   :  { %6606 = vrcp.f32 %v1303_v55  ;;  %v1315_v0 = vand.u32 2147483648, %v1303_v55  ;;  %v1313_v3 = vand.u32 2147483647, %v1303_v55  ;;  %vm1309_vm14 = vweird.f32 %v1303_v55 }
 0xda9   :  { %v1293_v7 = vmul.f32 %v1292_v1, %v1280_v28 }
 0xdaa   :  { %v1316_v6 = vor.u32 1.1754944e-38, %v1315_v0  ;;  %vm1314_vm0 = vcmp.eq.f32.partialorder %v1313_v3, 8.507059e+37 }
 0xdae   :  { %v6607_v60 = vpop.eup %6606 }
 0xdaf   :  { %v1305_v61 = vmul.f32 %v6607_v60, %v1303_v55  ;;  %vm1310_vm13 = vweird.f32 %v6607_v60 }
 0xdb0   :  { %vm1311_vm15 = vmor %vm1309_vm14, %vm1310_vm13 }
 0xdb1   :  { %v1306_v62 = vsub.f32 1.0, %v1305_v61  ;;  %v6345_v61 = vld [vmem:[#allocation4 + $0xb0] sm:$0xff] }
 0xdb2   :  { %1720 = vmatpush.bf16.msrb.mxu3 %v6345_v61  ;;  %v6353_v61 = vld [vmem:[#allocation7 + $0xb0] sm:$0xff] }
 0xdb3   :  { %v1307_v2 = vmul.f32 %v6607_v60, %v1306_v62 }
 0xdb5   :  { %v1308_v4 = vadd.f32 %v6607_v60, %v1307_v2 }
 0xdb6   :  { %1721 = vmatpush.bf16.msrb.mxu3 %v6344_v63  ;;  %v6351_v63 = vld [vmem:[#allocation7 + $0xa0] sm:$0xff] }
 0xdb7   :  { %v1312_v8 = vsel %vm1311_vm15, %v6607_v60, %v1308_v4 }
 0xdb8   :  { %v1317_v9 = vsel %vm1314_vm0, %v1316_v6, %v1312_v8 }
 0xdb9   :  { %v1318_v10 = vmul.f32 %v1317_v9, %v1293_v7 }
 0xdbb   :  { %v5412_v13 = vclamps-f32 %v1318_v10, 1.0 }
 0xdbd   :  { %v1321_v17 = vadd.f32 1.0, %v5412_v13 }
 0xdbf   :  { %v1322_v18 = vmul.f32 %v1321_v17, %v1279_v14 }
 0xdc1   :  { %v1323_v19 = vpack.c.bf16 %v1322_v18, %v1322_v18 }
 0xdc3   :  { %1402 = vmatmul.bf16.vlgmr.msrb.gmra.mxu2 %v1323_v19 }
 0xe46   :  { %v1403_v25 = vpop.f32.mrf.mxu2 }
 0xe47   :  { %v1404_v21 = vadd.f32 %v6553_v24, %v1403_v25 }
 0xe49   :  { %v1407_v26 = vpack.c.bf16 %v1404_v21, %v1404_v21 }
 0xe4b   :  { %1481 = vmatmul.bf16.vlgmr.msra.gmra.mxu3 %v1407_v26 }
 0xe4e   :  { %v1405_v28 = vpop.f32.mrf.mxu2 }
 0xe4f   :  { %v6343_v28 = vld [vmem:[#allocation4 + $0xa0] sm:$0xff] }
 0xe50   :  { %1722 = vmatpush.bf16.msrb.mxu3 %v6343_v28  ;;  %v6362_v28 = vld [vmem:[#allocation10 + $0xb8] sm:$0xff] }
 0xece   :  { %v1482_v30 = vpop.f32.mrf.mxu3 }
 0xecf   :  { %v1565_v27 = vmul.f32 %v7005_v16, %v1482_v30  ;;  %v1600_v31 = vmul.f32 %v7003_v15, %v1482_v30  ;;  %1506 = vmatmul.f32.vlgmr.msrb.gmra.mxu1 %v1482_v30  ;;  %1525 = vmatpush.xpose.msrb.mxu0 %v1482_v30  ;;  %v6342_v30 = vld [vmem:[#allocation4 + $0x98] sm:$0xff] }
 0xed0   :  { %1723 = vmatpush.bf16.msrb.mxu3 %v6342_v30  ;;  %v6361_v30 = vld [vmem:[#allocation10 + $0xb0] sm:$0xff] }
 0xed1   :  { %1619 = vmatpush.msra.mxu1 %v1600_v31  ;;  %1642 = vmatpush.msra.mxu2 %v1565_v27  ;;  %v6341_v27 = vld [vmem:[#allocation4 + $0x90] sm:$0xff]  ;;  %v6340_v31 = vld [vmem:[#allocation4 + $0x88] sm:$0xff] }
 0xed2   :  { %1526 = vmatmul.f32.vlgmr.msrb.gmra.mxu0 %v5478_v32  ;;  %v6339_v32 = vld [vmem:[#allocation4 + $0x80] sm:$0xff] }
 0xed3   :  { %1892 = vmatpush.bf16.msrb.mxu2 %v6354_v29 }
 0xed4   :  { %1724 = vmatpush.bf16.msrb.mxu3 %v6341_v27  ;;  %v6555_v27 = vld [vmem:[#allocation9 + $0x2] ss:$0 sm:$0xff] }
 0xed6   :  { %v1484_v33 = vpop.f32.mrf.mxu3 }
 0xed7   :  { %1893 = vmatpush.bf16.msrb.mxu2 %v6353_v61 }
 0xed8   :  { %1725 = vmatpush.bf16.msrb.mxu3 %v6340_v31 }
 0xedc   :  { %1726 = vmatpush.bf16.msrb.mxu3 %v6339_v32  ;;  %v6360_v32 = vld [vmem:[#allocation10 + $0xa8] sm:$0xff] }
 0xf4c   :  { %v1507_v34 = vpop.f32.mrf.mxu1 }
 0xf4d   :  { %1567 = vperm.xlu2 %6540, %v1507_v34   ;;  %1532 = vperm.xlu1 %6539, %v1507_v34  }
 0xf4f   :  { %v1527_v35 = vpop.f32.mrf.mxu0 }
 0xf50   :  { %v1535_v36 = vperm.slane %v1527_v35, 0  ;;  %v1570_v37 = vperm.slane %v1527_v35, 1 }
 0xf55   :  { %6542 = vset.pattern.permute.xlu2 %v6908_v22 }
 0xfa7   :  { %v1568_v38 = vpop.permute.xlu2 %1567 }
 0xfa8   :  { %v1571_v40 = vadd.f32 %v1570_v37, %v1568_v38 }
 0xfaa   :  { %v1573_v43 = vmul.f32 0.01, %v1571_v40  ;;  %vm1572_vm2 = vcmp.gt.f32.partialorder %v1571_v40, 0.0 }
 0xfac   :  { %v1574_v48 = vsel %vm1572_vm2, %v1571_v40, %v1573_v43 }
 0xfad   :  { %v1575_v49 = vadd.f32 %v7078_v45, %v1574_v48 }
 0xfaf   :  { %v1576_v50 = vsel %vm295_vm5, %v1575_v49, -inf }
 0xfbf   :  { %v1533_v39 = vpop.permute.xlu1 %1532 }
 0xfc0   :  { %v1536_v41 = vadd.f32 %v1535_v36, %v1533_v39 }
 0xfc2   :  { %vm1537_vm1 = vcmp.gt.f32.partialorder %v1536_v41, 0.0  ;;  %v1538_v42 = vmul.f32 0.01, %v1536_v41 }
 0xfc4   :  { %v1539_v44 = vsel %vm1537_vm1, %v1536_v41, %v1538_v42  ;;  %v6554_v42 = vld [vmem:[%s7254_s6 + $0x2] ss:$0 sm:$0xff] }
 0xfc5   :  { %v1540_v46 = vadd.f32 %v7078_v45, %v1539_v44 }
 0xfc7   :  { %v1541_v47 = vsel %vm295_vm5, %v1540_v46, -inf }
 0xfc8   :  { %1542 = vmax.xlane.f32.xlu0 %v1541_v47 }
 0xfd0   :  { %1577 = vmax.xlane.f32.xlu0 %v1576_v50 }
0x103b   :  { %v1543_v51 = vpop.xlane.xlu0 %1542 }
0x103c   :  { %v1544_v52 = vsub.f32 %v1540_v46, %v1543_v51  ;;  %v1735_v46 = vld [vmem:[#allocation6 + $0x2] sm:$0x1] }
0x103e   :  { %v1545_v53 = vmul.f32 1.442695, %v1544_v52 }
0x1040   :  { %6608 = vpow2.f32 %v1545_v53 }
0x1043   :  { %v1578_v54 = vpop.xlane.xlu0 %1577 }
0x1044   :  { %v1579_v55 = vsub.f32 %v1575_v49, %v1578_v54 }
0x1046   :  { %v6609_v56 = vpop.eup %6608  ;;  %v1580_v57 = vmul.f32 1.442695, %v1579_v55 }
0x1047   :  { %v1547_v58 = vsel %vm295_vm5, %v6609_v56, 0.0 }
0x1048   :  { %6610 = vpow2.f32 %v1580_v57  ;;  %1548 = vadd.xlane.f32.xlu0 %v1547_v58 }
0x104e   :  { %v6611_v59 = vpop.eup %6610 }
0x104f   :  { %v1582_v60 = vsel %vm295_vm5, %v6611_v59, 0.0 }
0x1050   :  { %1583 = vadd.xlane.f32.xlu1 %v1582_v60 }
0x10bb   :  { %v1549_v62 = vpop.xlane.xlu0 %1548 }
0x10bc   :  { %6612 = vrcp.f32 %v1549_v62  ;;  %v1561_v4 = vand.u32 2147483648, %v1549_v62  ;;  %v1559_v6 = vand.u32 2147483647, %v1549_v62  ;;  %vm1555_vm4 = vweird.f32 %v1549_v62 }
0x10be   :  { %v1562_v9 = vor.u32 1.1754944e-38, %v1561_v4  ;;  %vm1560_vm7 = vcmp.eq.f32.partialorder %v1559_v6, 8.507059e+37 }
0x10c2   :  { %v6613_v0 = vpop.eup %6612 }
0x10c3   :  { %v1551_v1 = vmul.f32 %v6613_v0, %v1549_v62  ;;  %v1584_v2 = vpop.xlane.xlu1 %1583  ;;  %vm1556_vm3 = vweird.f32 %v6613_v0  ;;  %v6352_v62 = vld [vmem:[#allocation7 + $0xa8] sm:$0xff] }
0x10c4   :  { %6614 = vrcp.f32 %v1584_v2  ;;  %vm1557_vm6 = vmor %vm1555_vm4, %vm1556_vm3  ;;  %v1596_v18 = vand.u32 2147483648, %v1584_v2  ;;  %v1594_v20 = vand.u32 2147483647, %v1584_v2  ;;  %vm1590_vm9 = vweird.f32 %v1584_v2  ;;  %1894 = vmatpush.bf16.msrb.mxu2 %v6352_v62  ;;  %v6368_v62 = vld [vmem:[#allocation2 + $0xe8] sm:$0xff] }
0x10c5   :  { %v1552_v3 = vsub.f32 1.0, %v1551_v1 }
0x10c6   :  { %v1597_v24 = vor.u32 1.1754944e-38, %v1596_v18  ;;  %vm1595_vm11 = vcmp.eq.f32.partialorder %v1594_v20, 8.507059e+37  ;;  %v6347_v18 = vld [vmem:[#allocation7 + $0x80] sm:$0xff] }
0x10c7   :  { %v1553_v5 = vmul.f32 %v6613_v0, %v1552_v3 }
0x10c8   :  { %1895 = vmatpush.bf16.msrb.mxu2 %v6351_v63 }
0x10c9   :  { %v1554_v7 = vadd.f32 %v6613_v0, %v1553_v5 }
0x10ca   :  { %v6615_v8 = vpop.eup %6614 }
0x10cb   :  { %v1558_v10 = vsel %vm1557_vm6, %v6613_v0, %v1554_v7  ;;  %v1586_v12 = vmul.f32 %v6615_v8, %v1584_v2  ;;  %vm1591_vm8 = vweird.f32 %v6615_v8 }
0x10cc   :  { %v1563_v13 = vsel %vm1560_vm7, %v1562_v9, %v1558_v10  ;;  %vm1592_vm10 = vmor %vm1590_vm9, %vm1591_vm8 }
0x10cd   :  { %v1587_v14 = vsub.f32 1.0, %v1586_v12  ;;  %v1564_v17 = vmul.f32 %v6609_v56, %v1563_v13  ;;  %v6350_v13 = vld [vmem:[#allocation7 + $0x98] sm:$0xff] }
0x10ce   :  { %1896 = vmatpush.bf16.msrb.mxu2 %v6350_v13 }
0x10cf   :  { %v1588_v19 = vmul.f32 %v6615_v8, %v1587_v14  ;;  %5480 = vmatmul.msk.f32.vlgmr.msra.gmra.mxu2 %vm295_vm5, %v1564_v17  ;;  %v6349_v14 = vld [vmem:[#allocation7 + $0x90] sm:$0xff]  ;;  %v6348_v17 = vld [vmem:[#allocation7 + $0x88] sm:$0xff] }
0x10d1   :  { %v1589_v23 = vadd.f32 %v6615_v8, %v1588_v19 }
0x10d2   :  { %1897 = vmatpush.bf16.msrb.mxu2 %v6349_v14 }
0x10d3   :  { %v1593_v25 = vsel %vm1592_vm10, %v6615_v8, %v1589_v23 }
0x10d4   :  { %v1598_v21 = vsel %vm1595_vm11, %v1597_v24, %v1593_v25 }
0x10d5   :  { %v1599_v26 = vmul.f32 %v6611_v59, %v1598_v21 }
0x10d6   :  { %1898 = vmatpush.bf16.msrb.mxu2 %v6348_v17 }
0x10d7   :  { %5479 = vmatmul.msk.f32.vlgmr.msra.gmra.mxu1 %vm295_vm5, %v1599_v26 }
0x10da   :  { %1899 = vmatpush.bf16.msrb.mxu2 %v6347_v18 }
0x1152   :  { %v1644_v33 = vpop.f32.mrf.mxu2 }
0x1154   :  { %v1621_v34 = vpop.f32.mrf.mxu1 }
0x1155   :  { %v1645_v35 = vadd.f32 %v1644_v33, %v1621_v34 }
0x1157   :  { %v1648_v36 = vmin.f32 %v1645_v35, 0.0  ;;  %vm1647_vm12 = vcmp.gt.f32.partialorder %v1645_v35, 0.0 }
0x1159   :  { %v1649_v37 = vmul.f32 1.442695, %v1648_v36 }
0x115b   :  { %6616 = vpow2.f32 %v1649_v37 }
0x1161   :  { %v6617_v38 = vpop.eup %6616 }
0x1162   :  { %v5481_v39 = vadd.f32 -1.0, %v6617_v38 }
0x1164   :  { %v1652_v40 = vsel %vm1647_vm12, %v1645_v35, %v5481_v39  ;;  %v6359_v35 = vld [vmem:[#allocation10 + $0xa0] sm:$0xff]  ;;  %v6358_v39 = vld [vmem:[#allocation10 + $0x98] sm:$0xff] }
0x1165   :  { %v1653_v41 = vpack.c.bf16 %v1652_v40, %v1652_v40 }
0x1167   :  { %1727 = vmatmul.bf16.vlgmr.msrb.gmra.mxu3 %v1653_v41 }
0x11ea   :  { %v1728_v43 = vpop.f32.mrf.mxu3 }
0x11eb   :  { %1757 = vmatpush.xpose.msra.mxu0 %v1728_v43  ;;  %1810 = vmatpush.msrb.mxu1 %v1728_v43  ;;  %v1739_v44 = vmul.f32 %v6554_v42, %v1728_v43 }
0x11ed   :  { %1740 = vadd.xlane.f32.xlu2 %v1739_v44  ;;  %v6357_v44 = vld [vmem:[#allocation10 + $0x90] sm:$0xff] }
0x11ee   :  { %1758 = vmatmul.f32.vlgmr.msra.gmra.mxu0 %v1735_v46 }
0x11ef   :  { %2020 = vmatpush.bf16.msrb.mxu0 %v6362_v28  ;;  %v6363_v28 = vld [vmem:[#allocation2 + $0xc0] sm:$0xff] }
0x11f2   :  { %v1730_v47 = vpop.f32.mrf.mxu3 }
0x11f3   :  { %2021 = vmatpush.bf16.msrb.mxu0 %v6361_v30  ;;  %v5614_v30 = vld [vmem:[%s7251_s3 + $0x6] sm:$0x3] }
0x11f4   :  { %2131 = vmatpush.xpose.msra.mxu3 %v5614_v30 }
0x11f7   :  { %2022 = vmatpush.bf16.msrb.mxu0 %v6360_v32 }
0x11fb   :  { %2023 = vmatpush.bf16.msrb.mxu0 %v6359_v35 }
0x11ff   :  { %2024 = vmatpush.bf16.msrb.mxu0 %v6358_v39 }
0x1203   :  { %2025 = vmatpush.bf16.msrb.mxu0 %v6357_v44 }
0x1260   :  { %v1741_v50 = vpop.xlane.xlu2 %1740 }
0x126b   :  { %v1759_v48 = vpop.f32.mrf.mxu0 }
0x126c   :  { %v1762_v49 = vperm.slane %v1759_v48, 0 }
0x126e   :  { %v1763_v51 = vadd.f32 %v1762_v49, %v1741_v50  ;;  %v6356_v50 = vld [vmem:[#allocation10 + $0x88] sm:$0xff] }
0x126f   :  { %2026 = vmatpush.bf16.msrb.mxu0 %v6356_v50 }
0x1270   :  { %v1765_v52 = vmul.f32 0.01, %v1763_v51  ;;  %vm1764_vm13 = vcmp.gt.f32.partialorder %v1763_v51, 0.0 }
0x1272   :  { %v1766_v53 = vsel %vm1764_vm13, %v1763_v51, %v1765_v52 }
0x1273   :  { %v1767_v54 = vadd.f32 %v7078_v45, %v1766_v53 }
0x1275   :  { %v1768_v55 = vsel %vm295_vm5, %v1767_v54, -inf }
0x1276   :  { %1769 = vmax.xlane.f32.xlu0 %v1768_v55 }
0x12e9   :  { %v1770_v56 = vpop.xlane.xlu0 %1769 }
0x12ea   :  { %v1771_v57 = vsub.f32 %v1767_v54, %v1770_v56  ;;  %v6355_v54 = vld [vmem:[#allocation10 + $0x80] sm:$0xff] }
0x12eb   :  { %2027 = vmatpush.bf16.msrb.mxu0 %v6355_v54 }
0x12ec   :  { %v1772_v58 = vmul.f32 1.442695, %v1771_v57 }
0x12ee   :  { %6618 = vpow2.f32 %v1772_v58  ;;  %v6370_v58 = vld [vmem:[#allocation2 + $0xf8] sm:$0xff] }
0x12ef   :  { %2099 = vmatpush.bf16.msra.mxu1 %v6370_v58 }
0x12f4   :  { %v6619_v59 = vpop.eup %6618 }
0x12f5   :  { %v1774_v60 = vsel %vm295_vm5, %v6619_v59, 0.0 }
0x12f6   :  { %1775 = vadd.xlane.f32.xlu0 %v1774_v60  ;;  %v6369_v60 = vld [vmem:[#allocation2 + $0xf0] sm:$0xff] }
0x12f7   :  { %2100 = vmatpush.bf16.msra.mxu1 %v6369_v60 }
0x12fb   :  { %2101 = vmatpush.bf16.msra.mxu1 %v6368_v62 }
0x1369   :  { %v1776_v0 = vpop.xlane.xlu0 %1775 }
0x136a   :  { %6620 = vrcp.f32 %v1776_v0  ;;  %v1788_v4 = vand.u32 2147483648, %v1776_v0  ;;  %v1786_v6 = vand.u32 2147483647, %v1776_v0  ;;  %vm1782_vm15 = vweird.f32 %v1776_v0 }
0x136c   :  { %v1789_v8 = vor.u32 1.1754944e-38, %v1788_v4  ;;  %vm1787_vm1 = vcmp.eq.f32.partialorder %v1786_v6, 8.507059e+37 }
0x1370   :  { %v6621_v1 = vpop.eup %6620 }
0x1371   :  { %v1778_v2 = vmul.f32 %v6621_v1, %v1776_v0  ;;  %vm1783_vm14 = vweird.f32 %v6621_v1  ;;  %v6367_v0 = vld [vmem:[#allocation2 + $0xe0] sm:$0xff] }
0x1372   :  { %vm1784_vm0 = vmor %vm1782_vm15, %vm1783_vm14  ;;  %2102 = vmatpush.bf16.msra.mxu1 %v6367_v0 }
0x1373   :  { %v1779_v3 = vsub.f32 1.0, %v1778_v2 }
0x1375   :  { %v1780_v5 = vmul.f32 %v6621_v1, %v1779_v3 }
0x1377   :  { %v1781_v7 = vadd.f32 %v6621_v1, %v1780_v5  ;;  %v6366_v5 = vld [vmem:[#allocation2 + $0xd8] sm:$0xff] }
0x1378   :  { %2103 = vmatpush.bf16.msra.mxu1 %v6366_v5 }
0x1379   :  { %v1785_v9 = vsel %vm1784_vm0, %v6621_v1, %v1781_v7 }
0x137a   :  { %v1790_v10 = vsel %vm1787_vm1, %v1789_v8, %v1785_v9 }
0x137b   :  { %v1791_v12 = vmul.f32 %v6619_v59, %v1790_v10 }
0x137d   :  { %5515 = vmatmul.msk.f32.vlgmr.msrb.gmra.mxu1 %vm295_vm5, %v1791_v12  ;;  %v6365_v12 = vld [vmem:[#allocation2 + $0xd0] sm:$0xff] }
0x137e   :  { %2104 = vmatpush.bf16.msra.mxu1 %v6365_v12 }
0x13fa   :  { %v1812_v19 = vpop.f32.mrf.mxu1 }
0x13fb   :  { %v1816_v20 = vmin.f32 %v1812_v19, 0.0  ;;  %vm1815_vm2 = vcmp.gt.f32.partialorder %v1812_v19, 0.0 }
0x13fd   :  { %v1817_v23 = vmul.f32 1.442695, %v1816_v20  ;;  %v6364_v20 = vld [vmem:[#allocation2 + $0xc8] sm:$0xff] }
0x13fe   :  { %2105 = vmatpush.bf16.msra.mxu1 %v6364_v20 }
0x13ff   :  { %6622 = vpow2.f32 %v1817_v23 }
0x1402   :  { %2106 = vmatpush.bf16.msra.mxu1 %v6363_v28 }
0x1405   :  { %v6623_v24 = vpop.eup %6622 }
0x1406   :  { %v5516_v25 = vadd.f32 -1.0, %v6623_v24 }
0x1408   :  { %v1820_v21 = vsel %vm1815_vm2, %v1812_v19, %v5516_v25 }
0x1409   :  { %v1821_v26 = vpack.c.bf16 %v1820_v21, %v1820_v21 }
0x140b   :  { %1900 = vmatmul.bf16.vlgmr.msrb.gmra.mxu2 %v1821_v26 }
0x148e   :  { %v1901_v31 = vpop.f32.mrf.mxu2 }
0x148f   :  { %v7095_v33 = vadd.f32 %v6555_v27, %v1901_v31  ;;  %v6556_v27 = vld [vmem:[#allocation12 + $0x2] ss:$0 sm:$0xff] }
0x1491   :  { %v1906_v34 = vmul.f32 0.70710677, %v7095_v33  ;;  %v1905_v24 = vmul.f32 0.5, %v7095_v33 }
0x1493   :  { %v1907_v36 = vmul.f32 %v1906_v34, %v1906_v34 }
0x1495   :  { %v1908_v37 = vmin.f32 %v1907_v36, 16.0 }
0x1496   :  { %v1903_v38 = vpop.f32.mrf.mxu2 }
0x1497   :  { %v1909_v40 = vmul.f32 2.1237322e-06, %v1908_v37  ;;  %v1920_v41 = vmul.f32 3.8918573e-05, %v1908_v37  ;;  %v5615_v38 = vld [vmem:[%s7252_s4 + $0x6] sm:$0x3] }
0x1499   :  { %v1910_v42 = vadd.f32 0.00028619796, %v1909_v40  ;;  %v1921_v43 = vadd.f32 0.001143296, %v1920_v41 }
0x149b   :  { %v1911_v46 = vmul.f32 %v1910_v42, %v1908_v37  ;;  %v1922_v47 = vmul.f32 %v1921_v43, %v1908_v37 }
0x149d   :  { %v1923_v48 = vadd.f32 0.014752088, %v1922_v47  ;;  %v1912_v49 = vadd.f32 0.0036580483, %v1911_v46 }
0x149f   :  { %v1924_v51 = vmul.f32 %v1923_v48, %v1908_v37  ;;  %v1913_v53 = vmul.f32 %v1912_v49, %v1908_v37 }
0x14a1   :  { %v1925_v52 = vadd.f32 0.112945676, %v1924_v51  ;;  %v1914_v57 = vadd.f32 0.05243302, %v1913_v53 }
0x14a3   :  { %v1926_v55 = vmul.f32 %v1925_v52, %v1908_v37  ;;  %v1915_v61 = vmul.f32 %v1914_v57, %v1908_v37 }
0x14a5   :  { %v1927_v56 = vadd.f32 0.4994258, %v1926_v55  ;;  %v1916_v63 = vadd.f32 0.18741608, %v1915_v61 }
0x14a7   :  { %v1928_v59 = vmul.f32 %v1927_v56, %v1908_v37  ;;  %v1917_v2 = vmul.f32 %v1916_v63, %v1908_v37 }
0x14a9   :  { %v1929_v29 = vadd.f32 1.0, %v1928_v59  ;;  %v1918_v7 = vadd.f32 1.1283791, %v1917_v2  ;;  %v6378_v2 = vld [vmem:[#allocation4 + $0xf8] sm:$0xff] }
0x14aa   :  { %2345 = vmatpush.bf16.msrb.mxu1 %v6378_v2  ;;  %v6386_v2 = vld [vmem:[#allocation7 + $0xf8] sm:$0xff] }
0x14ab   :  { %6624 = vrcp.f32 %v1929_v29  ;;  %v1941_v6 = vand.u32 2147483648, %v1929_v29  ;;  %v1939_v9 = vand.u32 2147483647, %v1929_v29  ;;  %vm1935_vm4 = vweird.f32 %v1929_v29  ;;  %2518 = vmatpush.bf16.msra.mxu0 %v6386_v2 }
0x14ac   :  { %v1919_v14 = vmul.f32 %v1918_v7, %v1906_v34 }
0x14ad   :  { %v1942_v13 = vor.u32 1.1754944e-38, %v1941_v6  ;;  %vm1940_vm7 = vcmp.eq.f32.partialorder %v1939_v9, 8.507059e+37 }
0x14b1   :  { %v6625_v1 = vpop.eup %6624 }
0x14b2   :  { %v1931_v3 = vmul.f32 %v6625_v1, %v1929_v29  ;;  %vm1936_vm3 = vweird.f32 %v6625_v1 }
0x14b3   :  { %vm1937_vm6 = vmor %vm1935_vm4, %vm1936_vm3 }
0x14b4   :  { %v1932_v4 = vsub.f32 1.0, %v1931_v3 }
0x14b6   :  { %v1933_v8 = vmul.f32 %v6625_v1, %v1932_v4 }
0x14b8   :  { %v1934_v10 = vadd.f32 %v6625_v1, %v1933_v8 }
0x14ba   :  { %v1938_v17 = vsel %vm1937_vm6, %v6625_v1, %v1934_v10 }
0x14bb   :  { %v1943_v18 = vsel %vm1940_vm7, %v1942_v13, %v1938_v17 }
0x14bc   :  { %v1944_v19 = vmul.f32 %v1943_v18, %v1919_v14 }
0x14be   :  { %v5549_v23 = vclamps-f32 %v1944_v19, 1.0 }
0x14c0   :  { %v1947_v25 = vadd.f32 1.0, %v5549_v23 }
0x14c2   :  { %v1948_v21 = vmul.f32 %v1947_v25, %v1905_v24 }
0x14c4   :  { %v1949_v26 = vpack.c.bf16 %v1948_v21, %v1948_v21 }
0x14c6   :  { %2028 = vmatmul.bf16.vlgmr.msrb.gmra.mxu0 %v1949_v26 }
0x1543   :  { %v2029_v31 = vpop.f32.mrf.mxu0 }
0x1544   :  { %v2030_v32 = vadd.f32 %v6556_v27, %v2029_v31 }
0x1546   :  { %v2033_v34 = vpack.c.bf16 %v2030_v32, %v2030_v32  ;;  %v6377_v32 = vld [vmem:[#allocation4 + $0xf0] sm:$0xff] }
0x1547   :  { %2346 = vmatpush.bf16.msrb.mxu1 %v6377_v32 }
0x1548   :  { %2107 = vmatmul.bf16.vlgmr.msra.gmra.mxu1 %v2033_v34  ;;  %v6376_v34 = vld [vmem:[#allocation4 + $0xe8] sm:$0xff] }
0x154b   :  { %v2031_v35 = vpop.f32.mrf.mxu0  ;;  %2347 = vmatpush.bf16.msrb.mxu1 %v6376_v34  ;;  %v6394_v34 = vld [vmem:[#allocation10 + $0xf8] sm:$0xff] }
0x154c   :  { %v6375_v35 = vld [vmem:[#allocation4 + $0xe0] sm:$0xff] }
0x154f   :  { %2348 = vmatpush.bf16.msrb.mxu1 %v6375_v35  ;;  %v6393_v35 = vld [vmem:[#allocation10 + $0xf0] sm:$0xff] }
0x15c5   :  { %v2108_v36 = vpop.f32.mrf.mxu1 }
0x15c6   :  { %v2191_v33 = vmul.f32 %v7005_v16, %v2108_v36  ;;  %v2226_v37 = vmul.f32 %v7003_v15, %v2108_v36  ;;  %2132 = vmatmul.f32.vlgmr.msra.gmra.mxu3 %v2108_v36 }
0x15c7   :  { %2151 = vmatpush.xpose.msrb.mxu3 %v2108_v36  ;;  %v6374_v36 = vld [vmem:[#allocation4 + $0xd8] sm:$0xff] }
0x15c8   :  { %2245 = vmatpush.msra.mxu2 %v2226_v37  ;;  %2349 = vmatpush.bf16.msrb.mxu1 %v6374_v36  ;;  %v6372_v37 = vld [vmem:[#allocation4 + $0xc8] sm:$0xff] }
0x15c9   :  { %v6558_v36 = vld [vmem:[#allocation9 + $0x3] ss:$0 sm:$0xff] }
0x15ca   :  { %2268 = vmatpush.msrb.mxu2 %v2191_v33  ;;  %v6373_v33 = vld [vmem:[#allocation4 + $0xd0] sm:$0xff] }
0x15cc   :  { %2350 = vmatpush.bf16.msrb.mxu1 %v6373_v33 }
0x15cd   :  { %v2110_v39 = vpop.f32.mrf.mxu1 }
0x15ce   :  { %2152 = vmatmul.f32.vlgmr.msrb.gmra.mxu3 %v5615_v38  ;;  %v6371_v38 = vld [vmem:[#allocation4 + $0xc0] sm:$0xff] }
0x15d0   :  { %2351 = vmatpush.bf16.msrb.mxu1 %v6372_v37  ;;  %v6392_v37 = vld [vmem:[#allocation10 + $0xe8] sm:$0xff] }
0x15d4   :  { %2352 = vmatpush.bf16.msrb.mxu1 %v6371_v38 }
0x1649   :  { %v2133_v40 = vpop.f32.mrf.mxu3 }
0x164a   :  { %2158 = vperm.xlu1 %6539, %v2133_v40   ;;  %2193 = vperm.xlu0 %6541, %v2133_v40  }
0x1651   :  { %v2153_v41 = vpop.f32.mrf.mxu3 }
0x1652   :  { %6543 = vset.pattern.permute.xlu1 %v6906_v11  ;;  %v2161_v42 = vperm.slane %v2153_v41, 0  ;;  %v2196_v43 = vperm.slane %v2153_v41, 1 }
0x16bc   :  { %v2159_v44 = vpop.permute.xlu1 %2158  ;;  %v2194_v46 = vpop.permute.xlu0 %2193 }
0x16bd   :  { %v2162_v47 = vadd.f32 %v2161_v42, %v2159_v44  ;;  %v2197_v48 = vadd.f32 %v2196_v43, %v2194_v46 }
0x16bf   :  { %vm2198_vm8 = vcmp.gt.f32.partialorder %v2197_v48, 0.0  ;;  %v2199_v49 = vmul.f32 0.01, %v2197_v48  ;;  %v2164_v50 = vmul.f32 0.01, %v2162_v47  ;;  %vm2163_vm9 = vcmp.gt.f32.partialorder %v2162_v47, 0.0 }
0x16c1   :  { %v2200_v51 = vsel %vm2198_vm8, %v2197_v48, %v2199_v49  ;;  %v2165_v54 = vsel %vm2163_vm9, %v2162_v47, %v2164_v50  ;;  %v6557_v49 = vld [vmem:[%s7254_s6 + $0x3] ss:$0 sm:$0xff] }
0x16c2   :  { %v2201_v52 = vadd.f32 %v7078_v45, %v2200_v51  ;;  %v2166_v55 = vadd.f32 %v7078_v45, %v2165_v54 }
0x16c4   :  { %v2202_v53 = vsel %vm295_vm5, %v2201_v52, -inf  ;;  %v2167_v56 = vsel %vm295_vm5, %v2166_v55, -inf }
0x16c5   :  { %2203 = vmax.xlane.f32.xlu2 %v2202_v53 }
0x16cd   :  { %2168 = vmax.xlane.f32.xlu2 %v2167_v56 }
0x1738   :  { %v2204_v57 = vpop.xlane.xlu2 %2203 }
0x1739   :  { %v2205_v58 = vsub.f32 %v2201_v52, %v2204_v57  ;;  %v2361_v52 = vld [vmem:[#allocation6 + $0x3] sm:$0x1] }
0x173b   :  { %v2206_v59 = vmul.f32 1.442695, %v2205_v58 }
0x173d   :  { %6626 = vpow2.f32 %v2206_v59 }
0x1740   :  { %v2169_v60 = vpop.xlane.xlu2 %2168 }
0x1741   :  { %v2170_v29 = vsub.f32 %v2166_v55, %v2169_v60 }
0x1743   :  { %v6627_v61 = vpop.eup %6626  ;;  %v2171_v62 = vmul.f32 1.442695, %v2170_v29 }
0x1744   :  { %v2208_v63 = vsel %vm295_vm5, %v6627_v61, 0.0 }
0x1745   :  { %6628 = vpow2.f32 %v2171_v62  ;;  %2209 = vadd.xlane.f32.xlu0 %v2208_v63 }
0x174b   :  { %v6629_v0 = vpop.eup %6628 }
0x174c   :  { %v2173_v1 = vsel %vm295_vm5, %v6629_v0, 0.0 }
0x174d   :  { %2174 = vadd.xlane.f32.xlu2 %v2173_v1 }
0x17b8   :  { %v2210_v3 = vpop.xlane.xlu0 %2209 }
0x17b9   :  { %6630 = vrcp.f32 %v2210_v3  ;;  %v2222_v8 = vand.u32 2147483648, %v2210_v3  ;;  %v2220_v10 = vand.u32 2147483647, %v2210_v3  ;;  %vm2216_vm11 = vweird.f32 %v2210_v3 }
0x17bb   :  { %v2223_v14 = vor.u32 1.1754944e-38, %v2222_v8  ;;  %vm2221_vm13 = vcmp.eq.f32.partialorder %v2220_v10, 8.507059e+37 }
0x17bf   :  { %v6631_v4 = vpop.eup %6630 }
0x17c0   :  { %v2212_v5 = vmul.f32 %v6631_v4, %v2210_v3  ;;  %v2175_v6 = vpop.xlane.xlu2 %2174  ;;  %vm2217_vm10 = vweird.f32 %v6631_v4  ;;  %v6385_v3 = vld [vmem:[#allocation7 + $0xf0] sm:$0xff] }
0x17c1   :  { %6632 = vrcp.f32 %v2175_v6  ;;  %vm2218_vm12 = vmor %vm2216_vm11, %vm2217_vm10  ;;  %v2187_v24 = vand.u32 2147483648, %v2175_v6  ;;  %v2185_v21 = vand.u32 2147483647, %v2175_v6  ;;  %vm2181_vm15 = vweird.f32 %v2175_v6  ;;  %2519 = vmatpush.bf16.msra.mxu0 %v6385_v3  ;;  %v6400_v3 = vld [vmem:[#allocation2 + $0x128] sm:$0xff] }
0x17c2   :  { %v2213_v7 = vsub.f32 1.0, %v2212_v5  ;;  %v6383_v5 = vld [vmem:[#allocation7 + $0xe0] sm:$0xff] }
0x17c3   :  { %v2188_v28 = vor.u32 1.1754944e-38, %v2187_v24  ;;  %vm2186_vm1 = vcmp.eq.f32.partialorder %v2185_v21, 8.507059e+37  ;;  %v6380_v24 = vld [vmem:[#allocation7 + $0xc8] sm:$0xff] }
0x17c4   :  { %v2214_v9 = vmul.f32 %v6631_v4, %v2213_v7 }
0x17c6   :  { %v2215_v12 = vadd.f32 %v6631_v4, %v2214_v9 }
0x17c7   :  { %v6633_v13 = vpop.eup %6632 }
0x17c8   :  { %v2219_v17 = vsel %vm2218_vm12, %v6631_v4, %v2215_v12  ;;  %v2177_v18 = vmul.f32 %v6633_v13, %v2175_v6  ;;  %vm2182_vm14 = vweird.f32 %v6633_v13  ;;  %v6384_v4 = vld [vmem:[#allocation7 + $0xe8] sm:$0xff] }
0x17c9   :  { %v2224_v19 = vsel %vm2221_vm13, %v2223_v14, %v2219_v17  ;;  %vm2183_vm0 = vmor %vm2181_vm15, %vm2182_vm14  ;;  %2520 = vmatpush.bf16.msra.mxu0 %v6384_v4 }
0x17ca   :  { %v2178_v20 = vsub.f32 1.0, %v2177_v18  ;;  %v2225_v23 = vmul.f32 %v6627_v61, %v2224_v19 }
0x17cc   :  { %v2179_v25 = vmul.f32 %v6633_v13, %v2178_v20  ;;  %5616 = vmatmul.msk.f32.vlgmr.msra.gmra.mxu2 %vm295_vm5, %v2225_v23  ;;  %v6382_v20 = vld [vmem:[#allocation7 + $0xd8] sm:$0xff]  ;;  %v6381_v23 = vld [vmem:[#allocation7 + $0xd0] sm:$0xff] }
0x17cd   :  { %2521 = vmatpush.bf16.msra.mxu0 %v6383_v5  ;;  %v6399_v5 = vld [vmem:[#allocation2 + $0x120] sm:$0xff] }
0x17ce   :  { %v2180_v26 = vadd.f32 %v6633_v13, %v2179_v25  ;;  %v6379_v25 = vld [vmem:[#allocation7 + $0xc0] sm:$0xff] }
0x17d0   :  { %v2184_v30 = vsel %vm2183_vm0, %v6633_v13, %v2180_v26 }
0x17d1   :  { %v2189_v27 = vsel %vm2186_vm1, %v2188_v28, %v2184_v30  ;;  %2522 = vmatpush.bf16.msra.mxu0 %v6382_v20 }
0x17d2   :  { %v2190_v31 = vmul.f32 %v6629_v0, %v2189_v27 }
0x17d4   :  { %5617 = vmatmul.msk.f32.vlgmr.msrb.gmra.mxu2 %vm295_vm5, %v2190_v31 }
0x17d5   :  { %2523 = vmatpush.bf16.msra.mxu0 %v6381_v23 }
0x17d9   :  { %2524 = vmatpush.bf16.msra.mxu0 %v6380_v24 }
0x17dd   :  { %2525 = vmatpush.bf16.msra.mxu0 %v6379_v25 }
0x184f   :  { %v2247_v39 = vpop.f32.mrf.mxu2 }
0x1857   :  { %v2270_v40 = vpop.f32.mrf.mxu2 }
0x1858   :  { %v2271_v41 = vadd.f32 %v2270_v40, %v2247_v39  ;;  %v6391_v40 = vld [vmem:[#allocation10 + $0xe0] sm:$0xff] }
0x185a   :  { %v2274_v42 = vmin.f32 %v2271_v41, 0.0  ;;  %vm2273_vm2 = vcmp.gt.f32.partialorder %v2271_v41, 0.0 }
0x185c   :  { %v2275_v43 = vmul.f32 1.442695, %v2274_v42 }
0x185e   :  { %6634 = vpow2.f32 %v2275_v43 }
0x1864   :  { %v6635_v44 = vpop.eup %6634 }
0x1865   :  { %v5618_v46 = vadd.f32 -1.0, %v6635_v44  ;;  %v6390_v44 = vld [vmem:[#allocation10 + $0xd8] sm:$0xff] }
0x1867   :  { %v2278_v47 = vsel %vm2273_vm2, %v2271_v41, %v5618_v46 }
0x1868   :  { %v2279_v48 = vpack.c.bf16 %v2278_v47, %v2278_v47 }
0x186a   :  { %2353 = vmatmul.bf16.vlgmr.msrb.gmra.mxu1 %v2279_v48 }
0x18e7   :  { %v2354_v50 = vpop.f32.mrf.mxu1 }
0x18e8   :  { %2383 = vmatpush.xpose.msra.mxu3 %v2354_v50  ;;  %2436 = vmatpush.msra.mxu2 %v2354_v50  ;;  %v2365_v51 = vmul.f32 %v6557_v49, %v2354_v50  ;;  %v6389_v50 = vld [vmem:[#allocation10 + $0xd0] sm:$0xff] }
0x18ea   :  { %2366 = vadd.xlane.f32.xlu1 %v2365_v51 }
0x18eb   :  { %2384 = vmatmul.f32.vlgmr.msra.gmra.mxu3 %v2361_v52 }
0x18ec   :  { %2646 = vmatpush.bf16.msrb.mxu3 %v6394_v34  ;;  %v5751_v34 = vld [vmem:[%s7251_s3 + $0x8] sm:$0x3] }
0x18ed   :  { %2757 = vmatpush.xpose.msra.mxu1 %v5751_v34 }
0x18ef   :  { %v2356_v53 = vpop.f32.mrf.mxu1 }
0x18f0   :  { %2647 = vmatpush.bf16.msrb.mxu3 %v6393_v35  ;;  %v6559_v35 = vld [vmem:[#allocation12 + $0x3] ss:$0 sm:$0xff] }
0x18f4   :  { %2648 = vmatpush.bf16.msrb.mxu3 %v6392_v37 }
0x18f8   :  { %2649 = vmatpush.bf16.msrb.mxu3 %v6391_v40 }
0x18fc   :  { %2650 = vmatpush.bf16.msrb.mxu3 %v6390_v44 }
0x1900   :  { %2651 = vmatpush.bf16.msrb.mxu3 %v6389_v50 }
0x195d   :  { %v2367_v56 = vpop.xlane.xlu1 %2366 }
0x196e   :  { %v2385_v54 = vpop.f32.mrf.mxu3 }
0x196f   :  { %v2388_v55 = vperm.slane %v2385_v54, 0 }
0x1971   :  { %v2389_v57 = vadd.f32 %v2388_v55, %v2367_v56  ;;  %v6388_v55 = vld [vmem:[#allocation10 + $0xc8] sm:$0xff] }
0x1972   :  { %2652 = vmatpush.bf16.msrb.mxu3 %v6388_v55 }
0x1973   :  { %v2391_v58 = vmul.f32 0.01, %v2389_v57  ;;  %vm2390_vm3 = vcmp.gt.f32.partialorder %v2389_v57, 0.0 }
0x1975   :  { %v2392_v59 = vsel %vm2390_vm3, %v2389_v57, %v2391_v58 }
0x1976   :  { %v2393_v60 = vadd.f32 %v7078_v45, %v2392_v59  ;;  %v6387_v59 = vld [vmem:[#allocation10 + $0xc0] sm:$0xff] }
0x1977   :  { %2653 = vmatpush.bf16.msrb.mxu3 %v6387_v59 }
0x1978   :  { %v2394_v29 = vsel %vm295_vm5, %v2393_v60, -inf }
0x1979   :  { %2395 = vmax.xlane.f32.xlu2 %v2394_v29 }
0x19ec   :  { %v2396_v61 = vpop.xlane.xlu2 %2395 }
0x19ed   :  { %v2397_v62 = vsub.f32 %v2393_v60, %v2396_v61 }
0x19ef   :  { %v2398_v63 = vmul.f32 1.442695, %v2397_v62  ;;  %v6402_v62 = vld [vmem:[#allocation2 + $0x138] sm:$0xff] }
0x19f0   :  { %2725 = vmatpush.bf16.msrb.mxu2 %v6402_v62 }
0x19f1   :  { %6636 = vpow2.f32 %v2398_v63 }
0x19f7   :  { %v6637_v0 = vpop.eup %6636 }
0x19f8   :  { %v2400_v1 = vsel %vm295_vm5, %v6637_v0, 0.0 }
0x19f9   :  { %2401 = vadd.xlane.f32.xlu2 %v2400_v1 }
0x1a6c   :  { %v2402_v6 = vpop.xlane.xlu2 %2401 }
0x1a6d   :  { %6638 = vrcp.f32 %v2402_v6  ;;  %v2414_v9 = vand.u32 2147483648, %v2402_v6  ;;  %v2412_v12 = vand.u32 2147483647, %v2402_v6  ;;  %vm2408_vm6 = vweird.f32 %v2402_v6 }
0x1a6f   :  { %v2415_v14 = vor.u32 1.1754944e-38, %v2414_v9  ;;  %vm2413_vm8 = vcmp.eq.f32.partialorder %v2412_v12, 8.507059e+37  ;;  %v6398_v9 = vld [vmem:[#allocation2 + $0x118] sm:$0xff] }
0x1a73   :  { %v6639_v45 = vpop.eup %6638 }
0x1a74   :  { %v2404_v7 = vmul.f32 %v6639_v45, %v2402_v6  ;;  %vm2409_vm4 = vweird.f32 %v6639_v45 }
0x1a75   :  { %vm2410_vm7 = vmor %vm2408_vm6, %vm2409_vm4 }
0x1a76   :  { %v2405_v8 = vsub.f32 1.0, %v2404_v7 }
0x1a78   :  { %v2406_v10 = vmul.f32 %v6639_v45, %v2405_v8 }
0x1a7a   :  { %v2407_v13 = vadd.f32 %v6639_v45, %v2406_v10 }
0x1a7c   :  { %v2411_v17 = vsel %vm2410_vm7, %v6639_v45, %v2407_v13 }
0x1a7d   :  { %v2416_v18 = vsel %vm2413_vm8, %v2415_v14, %v2411_v17 }
0x1a7e   :  { %v2417_v19 = vmul.f32 %v6637_v0, %v2416_v18  ;;  %v6401_v0 = vld [vmem:[#allocation2 + $0x130] sm:$0xff] }
0x1a7f   :  { %2726 = vmatpush.bf16.msrb.mxu2 %v6401_v0  ;;  %v6397_v18 = vld [vmem:[#allocation2 + $0x110] sm:$0xff] }
0x1a80   :  { %5652 = vmatmul.msk.f32.vlgmr.msra.gmra.mxu2 %vm295_vm5, %v2417_v19 }
0x1a83   :  { %2727 = vmatpush.bf16.msrb.mxu2 %v6400_v3 }
0x1a87   :  { %2728 = vmatpush.bf16.msrb.mxu2 %v6399_v5 }
0x1a8b   :  { %2729 = vmatpush.bf16.msrb.mxu2 %v6398_v9 }
0x1a8f   :  { %2730 = vmatpush.bf16.msrb.mxu2 %v6397_v18 }
0x1b03   :  { %v2438_v21 = vpop.f32.mrf.mxu2 }
0x1b04   :  { %v2442_v26 = vmin.f32 %v2438_v21, 0.0  ;;  %vm2441_vm9 = vcmp.gt.f32.partialorder %v2438_v21, 0.0 }
0x1b06   :  { %v2443_v28 = vmul.f32 1.442695, %v2442_v26 }
0x1b08   :  { %6640 = vpow2.f32 %v2443_v28 }
0x1b0e   :  { %v6641_v30 = vpop.eup %6640 }
0x1b0f   :  { %v5653_v27 = vadd.f32 -1.0, %v6641_v30 }
0x1b11   :  { %v2446_v31 = vsel %vm2441_vm9, %v2438_v21, %v5653_v27  ;;  %v6396_v21 = vld [vmem:[#allocation2 + $0x108] sm:$0xff] }
0x1b12   :  { %v2447_v32 = vpack.c.bf16 %v2446_v31, %v2446_v31  ;;  %2731 = vmatpush.bf16.msrb.mxu2 %v6396_v21 }
0x1b14   :  { %2526 = vmatmul.bf16.vlgmr.msra.gmra.mxu0 %v2447_v32  ;;  %v6395_v32 = vld [vmem:[#allocation2 + $0x100] sm:$0xff] }
0x1b16   :  { %2732 = vmatpush.bf16.msrb.mxu2 %v6395_v32 }
0x1b91   :  { %v2527_v33 = vpop.f32.mrf.mxu0 }
0x1b92   :  { %v7123_v38 = vadd.f32 %v6558_v36, %v2527_v33 }
0x1b94   :  { %v2532_v39 = vmul.f32 0.70710677, %v7123_v38  ;;  %v2531_v28 = vmul.f32 0.5, %v7123_v38 }
0x1b96   :  { %v2533_v41 = vmul.f32 %v2532_v39, %v2532_v39 }
0x1b98   :  { %v2534_v42 = vmin.f32 %v2533_v41, 16.0 }
0x1b99   :  { %v2529_v43 = vpop.f32.mrf.mxu0 }
0x1b9a   :  { %v2535_v46 = vmul.f32 2.1237322e-06, %v2534_v42  ;;  %v2546_v47 = vmul.f32 3.8918573e-05, %v2534_v42 }
0x1b9c   :  { %v2536_v48 = vadd.f32 0.00028619796, %v2535_v46  ;;  %v2547_v49 = vadd.f32 0.001143296, %v2546_v47 }
0x1b9e   :  { %v2537_v51 = vmul.f32 %v2536_v48, %v2534_v42  ;;  %v2548_v52 = vmul.f32 %v2547_v49, %v2534_v42 }
0x1ba0   :  { %v2549_v53 = vadd.f32 0.014752088, %v2548_v52  ;;  %v2538_v54 = vadd.f32 0.0036580483, %v2537_v51  ;;  %v7139_v52 = vld [vmem:[%s7249_s1] sm:$0xff] }
0x1ba2   :  { %v2550_v56 = vmul.f32 %v2549_v53, %v2534_v42  ;;  %v2539_v58 = vmul.f32 %v2538_v54, %v2534_v42 }
0x1ba4   :  { %v2551_v57 = vadd.f32 0.112945676, %v2550_v56  ;;  %v2540_v61 = vadd.f32 0.05243302, %v2539_v58 }
0x1ba6   :  { %v2552_v60 = vmul.f32 %v2551_v57, %v2534_v42  ;;  %v2541_v2 = vmul.f32 %v2540_v61, %v2534_v42 }
0x1ba8   :  { %v2553_v29 = vadd.f32 0.4994258, %v2552_v60  ;;  %v2542_v4 = vadd.f32 0.18741608, %v2541_v2 }
0x1baa   :  { %v2554_v63 = vmul.f32 %v2553_v29, %v2534_v42  ;;  %v2543_v45 = vmul.f32 %v2542_v4, %v2534_v42  ;;  %v5752_v42 = vld [vmem:[%s7252_s4 + $0x8] sm:$0x3] }
0x1bac   :  { %v2555_v1 = vadd.f32 1.0, %v2554_v63  ;;  %v2544_v12 = vadd.f32 1.1283791, %v2543_v45 }
0x1bae   :  { %6642 = vrcp.f32 %v2555_v1  ;;  %v2567_v10 = vand.u32 2147483648, %v2555_v1  ;;  %v2565_v14 = vand.u32 2147483647, %v2555_v1  ;;  %vm2561_vm11 = vweird.f32 %v2555_v1 }
0x1baf   :  { %v2545_v20 = vmul.f32 %v2544_v12, %v2532_v39 }
0x1bb0   :  { %v2568_v19 = vor.u32 1.1754944e-38, %v2567_v10  ;;  %vm2566_vm13 = vcmp.eq.f32.partialorder %v2565_v14, 8.507059e+37 }
0x1bb4   :  { %v6643_v6 = vpop.eup %6642 }
0x1bb5   :  { %v2557_v7 = vmul.f32 %v6643_v6, %v2555_v1  ;;  %vm2562_vm10 = vweird.f32 %v6643_v6 }
0x1bb6   :  { %vm2563_vm12 = vmor %vm2561_vm11, %vm2562_vm10 }
0x1bb7   :  { %v2558_v8 = vsub.f32 1.0, %v2557_v7 }
0x1bb9   :  { %v2559_v13 = vmul.f32 %v6643_v6, %v2558_v8 }
0x1bbb   :  { %v2560_v17 = vadd.f32 %v6643_v6, %v2559_v13 }
0x1bbd   :  { %v2564_v23 = vsel %vm2563_vm12, %v6643_v6, %v2560_v17 }
0x1bbe   :  { %v2569_v24 = vsel %vm2566_vm13, %v2568_v19, %v2564_v23 }
0x1bbf   :  { %v2570_v25 = vmul.f32 %v2569_v24, %v2545_v20 }
0x1bc1   :  { %v5686_v26 = vclamps-f32 %v2570_v25, 1.0 }
0x1bc3   :  { %v2573_v30 = vadd.f32 1.0, %v5686_v26 }
0x1bc5   :  { %v2574_v27 = vmul.f32 %v2573_v30, %v2531_v28 }
0x1bc7   :  { %v2575_v31 = vpack.c.bf16 %v2574_v27, %v2574_v27 }
0x1bc9   :  { %2654 = vmatmul.bf16.vlgmr.msrb.gmra.mxu3 %v2575_v31 }
0x1c4c   :  { %v2655_v36 = vpop.f32.mrf.mxu3 }
0x1c4d   :  { %v2656_v33 = vadd.f32 %v6559_v35, %v2655_v36  ;;  %v6410_v36 = vld [vmem:[#allocation4 + $0x138] sm:$0xff] }
0x1c4f   :  { %v2659_v37 = vpack.c.bf16 %v2656_v33, %v2656_v33  ;;  %v6409_v33 = vld [vmem:[#allocation4 + $0x130] sm:$0xff] }
0x1c51   :  { %2733 = vmatmul.bf16.vlgmr.msrb.gmra.mxu2 %v2659_v37  ;;  %v6408_v37 = vld [vmem:[#allocation4 + $0x128] sm:$0xff] }
0x1c54   :  { %v2657_v39 = vpop.f32.mrf.mxu3 }
0x1c55   :  { %v6407_v39 = vld [vmem:[#allocation4 + $0x120] sm:$0xff] }
0x1cd4   :  { %v2734_v40 = vpop.f32.mrf.mxu2 }
0x1cd5   :  { %v2817_v38 = vmul.f32 %v7005_v16, %v2734_v40  ;;  %v2852_v41 = vmul.f32 %v7003_v15, %v2734_v40  ;;  %2758 = vmatmul.f32.vlgmr.msra.gmra.mxu1 %v2734_v40 }
0x1cd6   :  { %2777 = vmatpush.xpose.msrb.mxu1 %v2734_v40  ;;  %v6406_v40 = vld [vmem:[#allocation4 + $0x118] sm:$0xff] }
0x1cd7   :  { %2871 = vmatpush.msrb.mxu0 %v2852_v41  ;;  %2894 = vmatpush.msra.mxu2 %v2817_v38  ;;  %v6405_v38 = vld [vmem:[#allocation4 + $0x110] sm:$0xff]  ;;  %v6404_v41 = vld [vmem:[#allocation4 + $0x108] sm:$0xff] }
0x1cd9   :  { %2971 = vmatpush.bf16.msrb.mxu2 %v6410_v36 }
0x1cdc   :  { %v2736_v43 = vpop.f32.mrf.mxu2 }
0x1cdd   :  { %2778 = vmatmul.f32.vlgmr.msrb.gmra.mxu1 %v5752_v42  ;;  %2972 = vmatpush.bf16.msrb.mxu2 %v6409_v33  ;;  %v6403_v42 = vld [vmem:[#allocation4 + $0x100] sm:$0xff] }
0x1ce1   :  { %2973 = vmatpush.bf16.msrb.mxu2 %v6408_v37 }
0x1ce5   :  { %2974 = vmatpush.bf16.msrb.mxu2 %v6407_v39  ;;  %v6426_v39 = vld [vmem:[#allocation10 + $0x138] sm:$0xff] }
0x1ce9   :  { %2975 = vmatpush.bf16.msrb.mxu2 %v6406_v40  ;;  %v6425_v40 = vld [vmem:[#allocation10 + $0x130] sm:$0xff] }
0x1ced   :  { %2976 = vmatpush.bf16.msrb.mxu2 %v6405_v38  ;;  %v6561_v38 = vld [vmem:[#allocation9 + $0x4] ss:$0 sm:$0xff] }
0x1cf1   :  { %2977 = vmatpush.bf16.msrb.mxu2 %v6404_v41 }
0x1cf5   :  { %2978 = vmatpush.bf16.msrb.mxu2 %v6403_v42  ;;  %v6424_v42 = vld [vmem:[#allocation10 + $0x128] sm:$0xff] }
0x1d52   :  { %v2759_v44 = vpop.f32.mrf.mxu1 }
0x1d53   :  { %2819 = vperm.xlu0 %6541, %v2759_v44   ;;  %2784 = vperm.xlu2 %6542, %v2759_v44  }
0x1d5a   :  { %v2779_v46 = vpop.f32.mrf.mxu1 }
0x1d5b   :  { %6544 = vset.pattern.permute.xlu0 %v6908_v22  ;;  %v2787_v47 = vperm.slane %v2779_v46, 0  ;;  %v2822_v55 = vperm.slane %v2779_v46, 1 }
0x1dad   :  { %v2785_v48 = vpop.permute.xlu2 %2784 }
0x1dae   :  { %v2788_v49 = vadd.f32 %v2787_v47, %v2785_v48 }
0x1db0   :  { %vm2789_vm14 = vcmp.gt.f32.partialorder %v2788_v49, 0.0  ;;  %v2790_v50 = vmul.f32 0.01, %v2788_v49 }
0x1db2   :  { %v2791_v51 = vsel %vm2789_vm14, %v2788_v49, %v2790_v50 }
0x1db3   :  { %v2792_v53 = vadd.f32 %v7139_v52, %v2791_v51 }
0x1db5   :  { %v2793_v54 = vsel %vm295_vm5, %v2792_v53, -inf }
0x1db6   :  { %2794 = vmax.xlane.f32.xlu1 %v2793_v54  ;;  %v6560_v54 = vld [vmem:[%s7254_s6 + $0x4] ss:$0 sm:$0xff] }
0x1dc5   :  { %v2820_v56 = vpop.permute.xlu0 %2819 }
0x1dc6   :  { %v2823_v57 = vadd.f32 %v2822_v55, %v2820_v56 }
0x1dc8   :  { %vm2824_vm15 = vcmp.gt.f32.partialorder %v2823_v57, 0.0  ;;  %v2825_v58 = vmul.f32 0.01, %v2823_v57 }
0x1dca   :  { %v2826_v59 = vsel %vm2824_vm15, %v2823_v57, %v2825_v58  ;;  %v2987_v57 = vld [vmem:[#allocation6 + $0x4] sm:$0x1] }
0x1dcb   :  { %v2827_v60 = vadd.f32 %v7139_v52, %v2826_v59 }
0x1dcd   :  { %v2828_v29 = vsel %vm295_vm5, %v2827_v60, -inf }
0x1dce   :  { %2829 = vmax.xlane.f32.xlu2 %v2828_v29 }
0x1e29   :  { %v2795_v61 = vpop.xlane.xlu1 %2794 }
0x1e2a   :  { %v2796_v62 = vsub.f32 %v2792_v53, %v2795_v61 }
0x1e2c   :  { %v2797_v63 = vmul.f32 1.442695, %v2796_v62 }
0x1e2e   :  { %6644 = vpow2.f32 %v2797_v63 }
0x1e34   :  { %v6645_v0 = vpop.eup %6644 }
0x1e35   :  { %v2799_v1 = vsel %vm295_vm5, %v6645_v0, 0.0 }
0x1e36   :  { %2800 = vadd.xlane.f32.xlu1 %v2799_v1 }
0x1e41   :  { %v2830_v2 = vpop.xlane.xlu2 %2829 }
0x1e42   :  { %v2831_v3 = vsub.f32 %v2827_v60, %v2830_v2 }
0x1e44   :  { %v2832_v4 = vmul.f32 1.442695, %v2831_v3 }
0x1e46   :  { %6646 = vpow2.f32 %v2832_v4 }
0x1e4c   :  { %v6647_v5 = vpop.eup %6646 }
0x1e4d   :  { %v2834_v6 = vsel %vm295_vm5, %v6647_v5, 0.0 }
0x1e4e   :  { %2835 = vadd.xlane.f32.xlu0 %v2834_v6 }
0x1ea9   :  { %v2801_v45 = vpop.xlane.xlu1 %2800 }
0x1eaa   :  { %6648 = vrcp.f32 %v2801_v45  ;;  %v2813_v10 = vand.u32 2147483648, %v2801_v45  ;;  %v2811_v13 = vand.u32 2147483647, %v2801_v45  ;;  %vm2807_vm1 = vweird.f32 %v2801_v45 }
0x1eac   :  { %v2814_v17 = vor.u32 1.1754944e-38, %v2813_v10  ;;  %vm2812_vm3 = vcmp.eq.f32.partialorder %v2811_v13, 8.507059e+37 }
0x1eb0   :  { %v6649_v7 = vpop.eup %6648 }
0x1eb1   :  { %v2803_v8 = vmul.f32 %v6649_v7, %v2801_v45  ;;  %vm2808_vm0 = vweird.f32 %v6649_v7  ;;  %v6418_v45 = vld [vmem:[#allocation7 + $0x138] sm:$0xff] }
0x1eb2   :  { %vm2809_vm2 = vmor %vm2807_vm1, %vm2808_vm0  ;;  %3144 = vmatpush.bf16.msra.mxu3 %v6418_v45 }
0x1eb3   :  { %v2804_v9 = vsub.f32 1.0, %v2803_v8  ;;  %v6416_v8 = vld [vmem:[#allocation7 + $0x128] sm:$0xff] }
0x1eb5   :  { %v2805_v12 = vmul.f32 %v6649_v7, %v2804_v9  ;;  %v6415_v9 = vld [vmem:[#allocation7 + $0x120] sm:$0xff] }
0x1eb7   :  { %v2806_v14 = vadd.f32 %v6649_v7, %v2805_v12 }
0x1eb9   :  { %v2810_v18 = vsel %vm2809_vm2, %v6649_v7, %v2806_v14  ;;  %v6417_v7 = vld [vmem:[#allocation7 + $0x130] sm:$0xff] }
0x1eba   :  { %v2815_v19 = vsel %vm2812_vm3, %v2814_v17, %v2810_v18  ;;  %3145 = vmatpush.bf16.msra.mxu3 %v6417_v7 }
0x1ebb   :  { %v2816_v20 = vmul.f32 %v6645_v0, %v2815_v19 }
0x1ebd   :  { %5754 = vmatmul.msk.f32.vlgmr.msra.gmra.mxu2 %vm295_vm5, %v2816_v20 }
0x1ebe   :  { %3146 = vmatpush.bf16.msra.mxu3 %v6416_v8  ;;  %v6432_v8 = vld [vmem:[#allocation2 + $0x168] sm:$0xff] }
0x1ec1   :  { %v2836_v23 = vpop.xlane.xlu0 %2835 }
0x1ec2   :  { %6650 = vrcp.f32 %v2836_v23  ;;  %v2848_v26 = vand.u32 2147483648, %v2836_v23  ;;  %v2846_v30 = vand.u32 2147483647, %v2836_v23  ;;  %vm2842_vm6 = vweird.f32 %v2836_v23  ;;  %3147 = vmatpush.bf16.msra.mxu3 %v6415_v9 }
0x1ec4   :  { %v2849_v31 = vor.u32 1.1754944e-38, %v2848_v26  ;;  %vm2847_vm8 = vcmp.eq.f32.partialorder %v2846_v30, 8.507059e+37  ;;  %v6414_v26 = vld [vmem:[#allocation7 + $0x118] sm:$0xff]  ;;  %v6412_v30 = vld [vmem:[#allocation7 + $0x108] sm:$0xff] }
0x1ec6   :  { %3148 = vmatpush.bf16.msra.mxu3 %v6414_v26 }
0x1ec8   :  { %v6651_v24 = vpop.eup %6650 }
0x1ec9   :  { %v2838_v25 = vmul.f32 %v6651_v24, %v2836_v23  ;;  %vm2843_vm4 = vweird.f32 %v6651_v24 }
0x1eca   :  { %vm2844_vm7 = vmor %vm2842_vm6, %vm2843_vm4 }
0x1ecb   :  { %v2839_v21 = vsub.f32 1.0, %v2838_v25 }
0x1ecd   :  { %v2840_v28 = vmul.f32 %v6651_v24, %v2839_v21 }
0x1ecf   :  { %v2841_v27 = vadd.f32 %v6651_v24, %v2840_v28  ;;  %v6413_v28 = vld [vmem:[#allocation7 + $0x110] sm:$0xff] }
0x1ed0   :  { %3149 = vmatpush.bf16.msra.mxu3 %v6413_v28 }
0x1ed1   :  { %v2845_v32 = vsel %vm2844_vm7, %v6651_v24, %v2841_v27  ;;  %v6411_v27 = vld [vmem:[#allocation7 + $0x100] sm:$0xff] }
0x1ed2   :  { %v2850_v34 = vsel %vm2847_vm8, %v2849_v31, %v2845_v32 }
0x1ed3   :  { %v2851_v35 = vmul.f32 %v6647_v5, %v2850_v34 }
0x1ed4   :  { %3150 = vmatpush.bf16.msra.mxu3 %v6412_v30 }
0x1ed5   :  { %5753 = vmatmul.msk.f32.vlgmr.msrb.gmra.mxu0 %vm295_vm5, %v2851_v35 }
0x1ed8   :  { %3151 = vmatpush.bf16.msra.mxu3 %v6411_v27 }
0x1f40   :  { %v2896_v43 = vpop.f32.mrf.mxu2 }
0x1f52   :  { %v2873_v44 = vpop.f32.mrf.mxu0 }
0x1f53   :  { %v2897_v46 = vadd.f32 %v2896_v43, %v2873_v44 }
0x1f55   :  { %v2900_v47 = vmin.f32 %v2897_v46, 0.0  ;;  %vm2899_vm9 = vcmp.gt.f32.partialorder %v2897_v46, 0.0 }
0x1f57   :  { %v2901_v48 = vmul.f32 1.442695, %v2900_v47 }
0x1f59   :  { %6652 = vpow2.f32 %v2901_v48 }
0x1f5f   :  { %v6653_v49 = vpop.eup %6652 }
0x1f60   :  { %v5755_v50 = vadd.f32 -1.0, %v6653_v49 }
0x1f62   :  { %v2904_v51 = vsel %vm2899_vm9, %v2897_v46, %v5755_v50  ;;  %v6423_v46 = vld [vmem:[#allocation10 + $0x120] sm:$0xff]  ;;  %v6422_v50 = vld [vmem:[#allocation10 + $0x118] sm:$0xff] }
0x1f63   :  { %v2905_v53 = vpack.c.bf16 %v2904_v51, %v2904_v51 }
0x1f65   :  { %2979 = vmatmul.bf16.vlgmr.msrb.gmra.mxu2 %v2905_v53 }
0x1fe8   :  { %v2980_v55 = vpop.f32.mrf.mxu2 }
0x1fe9   :  { %3009 = vmatpush.xpose.msra.mxu1 %v2980_v55  ;;  %3062 = vmatpush.msra.mxu0 %v2980_v55  ;;  %v2991_v56 = vmul.f32 %v6560_v54, %v2980_v55 }
0x1feb   :  { %2992 = vadd.xlane.f32.xlu1 %v2991_v56  ;;  %v6421_v56 = vld [vmem:[#allocation10 + $0x110] sm:$0xff] }
0x1fec   :  { %3010 = vmatmul.f32.vlgmr.msra.gmra.mxu1 %v2987_v57 }
0x1fed   :  { %3272 = vmatpush.bf16.msrb.mxu1 %v6426_v39  ;;  %v6427_v39 = vld [vmem:[#allocation2 + $0x140] sm:$0xff] }
0x1ff0   :  { %v2982_v58 = vpop.f32.mrf.mxu2 }
0x1ff1   :  { %3273 = vmatpush.bf16.msrb.mxu1 %v6425_v40  ;;  %v5888_v40 = vld [vmem:[%s7251_s3 + $0xa] sm:$0x3] }
0x1ff2   :  { %3383 = vmatpush.xpose.msra.mxu2 %v5888_v40 }
0x1ff5   :  { %3274 = vmatpush.bf16.msrb.mxu1 %v6424_v42 }
0x1ff9   :  { %3275 = vmatpush.bf16.msrb.mxu1 %v6423_v46 }
0x1ffd   :  { %3276 = vmatpush.bf16.msrb.mxu1 %v6422_v50 }
0x2001   :  { %3277 = vmatpush.bf16.msrb.mxu1 %v6421_v56 }
0x205e   :  { %v2993_v29 = vpop.xlane.xlu1 %2992 }
0x2069   :  { %v3011_v59 = vpop.f32.mrf.mxu1 }
0x206a   :  { %v3014_v60 = vperm.slane %v3011_v59, 0 }
0x206c   :  { %v3015_v61 = vadd.f32 %v3014_v60, %v2993_v29  ;;  %v6420_v29 = vld [vmem:[#allocation10 + $0x108] sm:$0xff] }
0x206d   :  { %3278 = vmatpush.bf16.msrb.mxu1 %v6420_v29 }
0x206e   :  { %v3017_v62 = vmul.f32 0.01, %v3015_v61  ;;  %vm3016_vm10 = vcmp.gt.f32.partialorder %v3015_v61, 0.0 }
0x2070   :  { %v3018_v63 = vsel %vm3016_vm10, %v3015_v61, %v3017_v62 }
0x2071   :  { %v3019_v0 = vadd.f32 %v7139_v52, %v3018_v63 }
0x2073   :  { %v3020_v1 = vsel %vm295_vm5, %v3019_v0, -inf }
0x2074   :  { %3021 = vmax.xlane.f32.xlu1 %v3020_v1 }
0x20e7   :  { %v3022_v2 = vpop.xlane.xlu1 %3021 }
0x20e8   :  { %v3023_v3 = vsub.f32 %v3019_v0, %v3022_v2  ;;  %v6419_v0 = vld [vmem:[#allocation10 + $0x100] sm:$0xff] }
0x20e9   :  { %3279 = vmatpush.bf16.msrb.mxu1 %v6419_v0 }
0x20ea   :  { %v3024_v4 = vmul.f32 1.442695, %v3023_v3 }
0x20ec   :  { %6654 = vpow2.f32 %v3024_v4  ;;  %v6434_v4 = vld [vmem:[#allocation2 + $0x178] sm:$0xff] }
0x20ed   :  { %3351 = vmatpush.bf16.msrb.mxu0 %v6434_v4 }
0x20f2   :  { %v6655_v5 = vpop.eup %6654 }
0x20f3   :  { %v3026_v6 = vsel %vm295_vm5, %v6655_v5, 0.0 }
0x20f4   :  { %3027 = vadd.xlane.f32.xlu1 %v3026_v6  ;;  %v6433_v6 = vld [vmem:[#allocation2 + $0x170] sm:$0xff] }
0x20f5   :  { %3352 = vmatpush.bf16.msrb.mxu0 %v6433_v6 }
0x20f9   :  { %3353 = vmatpush.bf16.msrb.mxu0 %v6432_v8 }
0x2167   :  { %v3028_v10 = vpop.xlane.xlu1 %3027 }
0x2168   :  { %6656 = vrcp.f32 %v3028_v10  ;;  %v3040_v17 = vand.u32 2147483648, %v3028_v10  ;;  %v3038_v19 = vand.u32 2147483647, %v3028_v10  ;;  %vm3034_vm12 = vweird.f32 %v3028_v10 }
0x216a   :  { %v3041_v23 = vor.u32 1.1754944e-38, %v3040_v17  ;;  %vm3039_vm14 = vcmp.eq.f32.partialorder %v3038_v19, 8.507059e+37 }
0x216e   :  { %v6657_v12 = vpop.eup %6656 }
0x216f   :  { %v3030_v13 = vmul.f32 %v6657_v12, %v3028_v10  ;;  %vm3035_vm11 = vweird.f32 %v6657_v12  ;;  %v6431_v10 = vld [vmem:[#allocation2 + $0x160] sm:$0xff] }
0x2170   :  { %vm3036_vm13 = vmor %vm3034_vm12, %vm3035_vm11  ;;  %3354 = vmatpush.bf16.msrb.mxu0 %v6431_v10 }
0x2171   :  { %v3031_v14 = vsub.f32 1.0, %v3030_v13 }
0x2173   :  { %v3032_v18 = vmul.f32 %v6657_v12, %v3031_v14 }
0x2175   :  { %v3033_v20 = vadd.f32 %v6657_v12, %v3032_v18  ;;  %v6430_v18 = vld [vmem:[#allocation2 + $0x158] sm:$0xff] }
0x2176   :  { %3355 = vmatpush.bf16.msrb.mxu0 %v6430_v18  ;;  %v6440_v18 = vld [vmem:[#allocation4 + $0x168] sm:$0xff] }
0x2177   :  { %v3037_v24 = vsel %vm3036_vm13, %v6657_v12, %v3033_v20 }
0x2178   :  { %v3042_v25 = vsel %vm3039_vm14, %v3041_v23, %v3037_v24 }
0x2179   :  { %v3043_v21 = vmul.f32 %v6655_v5, %v3042_v25 }
0x217b   :  { %5789 = vmatmul.msk.f32.vlgmr.msra.gmra.mxu0 %vm295_vm5, %v3043_v21  ;;  %v6429_v21 = vld [vmem:[#allocation2 + $0x150] sm:$0xff] }
0x217c   :  { %3356 = vmatpush.bf16.msrb.mxu0 %v6429_v21 }
0x21f8   :  { %v3064_v31 = vpop.f32.mrf.mxu0 }
0x21f9   :  { %v3068_v32 = vmin.f32 %v3064_v31, 0.0  ;;  %vm3067_vm15 = vcmp.gt.f32.partialorder %v3064_v31, 0.0 }
0x21fb   :  { %v3069_v34 = vmul.f32 1.442695, %v3068_v32  ;;  %v6428_v32 = vld [vmem:[#allocation2 + $0x148] sm:$0xff] }
0x21fc   :  { %3357 = vmatpush.bf16.msrb.mxu0 %v6428_v32 }
0x21fd   :  { %6658 = vpow2.f32 %v3069_v34 }
0x2200   :  { %3358 = vmatpush.bf16.msrb.mxu0 %v6427_v39 }
0x2203   :  { %v6659_v35 = vpop.eup %6658 }
0x2204   :  { %v5790_v36 = vadd.f32 -1.0, %v6659_v35 }
0x2206   :  { %v3072_v33 = vsel %vm3067_vm15, %v3064_v31, %v5790_v36 }
0x2207   :  { %v3073_v37 = vpack.c.bf16 %v3072_v33, %v3072_v33 }
0x2209   :  { %3152 = vmatmul.bf16.vlgmr.msra.gmra.mxu3 %v3073_v37 }
0x228c   :  { %v3153_v41 = vpop.f32.mrf.mxu3 }
0x228d   :  { %v7156_v43 = vadd.f32 %v6561_v38, %v3153_v41  ;;  %v6562_v38 = vld [vmem:[#allocation12 + $0x4] ss:$0 sm:$0xff] }
0x228f   :  { %v3158_v44 = vmul.f32 0.70710677, %v7156_v43  ;;  %v3157_v35 = vmul.f32 0.5, %v7156_v43 }
0x2291   :  { %v3159_v47 = vmul.f32 %v3158_v44, %v3158_v44 }
0x2293   :  { %v3160_v48 = vmin.f32 %v3159_v47, 16.0 }
0x2294   :  { %v3155_v49 = vpop.f32.mrf.mxu3 }
0x2295   :  { %v3161_v51 = vmul.f32 2.1237322e-06, %v3160_v48  ;;  %v3172_v53 = vmul.f32 3.8918573e-05, %v3160_v48  ;;  %v5889_v49 = vld [vmem:[%s7252_s4 + $0xa] sm:$0x3] }
0x2297   :  { %v3162_v54 = vadd.f32 0.00028619796, %v3161_v51  ;;  %v3173_v55 = vadd.f32 0.001143296, %v3172_v53 }
0x2299   :  { %v3163_v57 = vmul.f32 %v3162_v54, %v3160_v48  ;;  %v3174_v58 = vmul.f32 %v3173_v55, %v3160_v48 }
0x229b   :  { %v3175_v59 = vadd.f32 0.014752088, %v3174_v58  ;;  %v3164_v60 = vadd.f32 0.0036580483, %v3163_v57 }
0x229d   :  { %v3176_v61 = vmul.f32 %v3175_v59, %v3160_v48  ;;  %v3165_v63 = vmul.f32 %v3164_v60, %v3160_v48 }
0x229f   :  { %v3177_v62 = vadd.f32 0.112945676, %v3176_v61  ;;  %v3166_v3 = vadd.f32 0.05243302, %v3165_v63 }
0x22a1   :  { %v3178_v1 = vmul.f32 %v3177_v62, %v3160_v48  ;;  %v3167_v7 = vmul.f32 %v3166_v3, %v3160_v48 }
0x22a3   :  { %v3179_v2 = vadd.f32 0.4994258, %v3178_v1  ;;  %v3168_v9 = vadd.f32 0.18741608, %v3167_v7 }
0x22a5   :  { %v3180_v5 = vmul.f32 %v3179_v2, %v3160_v48  ;;  %v3169_v13 = vmul.f32 %v3168_v9, %v3160_v48 }
0x22a7   :  { %v3181_v45 = vadd.f32 1.0, %v3180_v5  ;;  %v3170_v20 = vadd.f32 1.1283791, %v3169_v13  ;;  %v6442_v13 = vld [vmem:[#allocation4 + $0x178] sm:$0xff] }
0x22a8   :  { %3597 = vmatpush.bf16.msra.mxu0 %v6442_v13  ;;  %v6450_v13 = vld [vmem:[#allocation7 + $0x178] sm:$0xff] }
0x22a9   :  { %6660 = vrcp.f32 %v3181_v45  ;;  %v3193_v19 = vand.u32 2147483648, %v3181_v45  ;;  %v3191_v24 = vand.u32 2147483647, %v3181_v45  ;;  %vm3187_vm1 = vweird.f32 %v3181_v45 }
0x22aa   :  { %v3171_v28 = vmul.f32 %v3170_v20, %v3158_v44 }
0x22ab   :  { %v3194_v26 = vor.u32 1.1754944e-38, %v3193_v19  ;;  %vm3192_vm3 = vcmp.eq.f32.partialorder %v3191_v24, 8.507059e+37 }
0x22af   :  { %v6661_v12 = vpop.eup %6660 }
0x22b0   :  { %v3183_v14 = vmul.f32 %v6661_v12, %v3181_v45  ;;  %vm3188_vm0 = vweird.f32 %v6661_v12 }
0x22b1   :  { %vm3189_vm2 = vmor %vm3187_vm1, %vm3188_vm0 }
0x22b2   :  { %v3184_v17 = vsub.f32 1.0, %v3183_v14  ;;  %v6441_v14 = vld [vmem:[#allocation4 + $0x170] sm:$0xff] }
0x22b3   :  { %3598 = vmatpush.bf16.msra.mxu0 %v6441_v14  ;;  %v6449_v14 = vld [vmem:[#allocation7 + $0x170] sm:$0xff] }
0x22b4   :  { %v3185_v23 = vmul.f32 %v6661_v12, %v3184_v17 }
0x22b6   :  { %v3186_v25 = vadd.f32 %v6661_v12, %v3185_v23 }
0x22b7   :  { %3599 = vmatpush.bf16.msra.mxu0 %v6440_v18  ;;  %v6447_v18 = vld [vmem:[#allocation7 + $0x160] sm:$0xff] }
0x22b8   :  { %v3190_v30 = vsel %vm3189_vm2, %v6661_v12, %v3186_v25 }
0x22b9   :  { %v3195_v27 = vsel %vm3192_vm3, %v3194_v26, %v3190_v30 }
0x22ba   :  { %v3196_v31 = vmul.f32 %v3195_v27, %v3171_v28 }
0x22bc   :  { %v5823_v34 = vclamps-f32 %v3196_v31, 1.0 }
0x22be   :  { %v3199_v36 = vadd.f32 1.0, %v5823_v34 }
0x22c0   :  { %v3200_v33 = vmul.f32 %v3199_v36, %v3157_v35 }
0x22c2   :  { %v3201_v37 = vpack.c.bf16 %v3200_v33, %v3200_v33 }
0x22c4   :  { %3280 = vmatmul.bf16.vlgmr.msrb.gmra.mxu1 %v3201_v37 }
0x2341   :  { %v3281_v41 = vpop.f32.mrf.mxu1 }
0x2342   :  { %v3282_v42 = vadd.f32 %v6562_v38, %v3281_v41 }
0x2344   :  { %v3285_v44 = vpack.c.bf16 %v3282_v42, %v3282_v42 }
0x2346   :  { %3359 = vmatmul.bf16.vlgmr.msrb.gmra.mxu0 %v3285_v44 }
0x2349   :  { %v3283_v46 = vpop.f32.mrf.mxu1 }
0x234a   :  { %v6439_v46 = vld [vmem:[#allocation4 + $0x160] sm:$0xff] }
0x234b   :  { %3600 = vmatpush.bf16.msra.mxu0 %v6439_v46  ;;  %v6457_v46 = vld [vmem:[#allocation10 + $0x170] sm:$0xff] }
0x23c3   :  { %v3360_v47 = vpop.f32.mrf.mxu0 }
0x23c4   :  { %v3443_v43 = vmul.f32 %v7005_v16, %v3360_v47  ;;  %v3478_v48 = vmul.f32 %v7003_v15, %v3360_v47  ;;  %3384 = vmatmul.f32.vlgmr.msra.gmra.mxu2 %v3360_v47 }
0x23c5   :  { %3403 = vmatpush.xpose.msrb.mxu2 %v3360_v47  ;;  %v6438_v47 = vld [vmem:[#allocation4 + $0x158] sm:$0xff] }
0x23c6   :  { %3497 = vmatpush.msrb.mxu3 %v3478_v48  ;;  %3520 = vmatpush.msra.mxu1 %v3443_v43  ;;  %v6437_v43 = vld [vmem:[#allocation4 + $0x150] sm:$0xff]  ;;  %v6436_v48 = vld [vmem:[#allocation4 + $0x148] sm:$0xff] }
0x23c7   :  { %3601 = vmatpush.bf16.msra.mxu0 %v6438_v47  ;;  %v6564_v47 = vld [vmem:[#allocation9 + $0x5] ss:$0 sm:$0xff] }
0x23c8   :  { %3770 = vmatpush.bf16.msrb.mxu1 %v6450_v13 }
0x23cb   :  { %v3362_v50 = vpop.f32.mrf.mxu0  ;;  %3602 = vmatpush.bf16.msra.mxu0 %v6437_v43 }
0x23cc   :  { %3404 = vmatmul.f32.vlgmr.msrb.gmra.mxu2 %v5889_v49  ;;  %v6435_v49 = vld [vmem:[#allocation4 + $0x140] sm:$0xff]  ;;  %3771 = vmatpush.bf16.msrb.mxu1 %v6449_v14  ;;  %v6464_v14 = vld [vmem:[#allocation2 + $0x1a8] sm:$0xff] }
0x23cf   :  { %3603 = vmatpush.bf16.msra.mxu0 %v6436_v48  ;;  %v6456_v48 = vld [vmem:[#allocation10 + $0x168] sm:$0xff] }
0x23d3   :  { %3604 = vmatpush.bf16.msra.mxu0 %v6435_v49 }
0x2447   :  { %v3385_v51 = vpop.f32.mrf.mxu2 }
0x2448   :  { %3410 = vperm.xlu2 %6542, %v3385_v51   ;;  %3445 = vperm.xlu1 %6543, %v3385_v51  }
0x244f   :  { %v3405_v53 = vpop.f32.mrf.mxu2 }
0x2450   :  { %6545 = vset.pattern.permute.xlu2 %v6906_v11  ;;  %v3413_v54 = vperm.slane %v3405_v53, 0  ;;  %v3448_v55 = vperm.slane %v3405_v53, 1 }
0x24a2   :  { %v3411_v56 = vpop.permute.xlu2 %3410 }
0x24a3   :  { %v3414_v58 = vadd.f32 %v3413_v54, %v3411_v56 }
0x24a5   :  { %v3416_v29 = vmul.f32 0.01, %v3414_v58  ;;  %vm3415_vm6 = vcmp.gt.f32.partialorder %v3414_v58, 0.0 }
0x24a7   :  { %v3417_v0 = vsel %vm3415_vm6, %v3414_v58, %v3416_v29 }
0x24a8   :  { %v3418_v1 = vadd.f32 %v7139_v52, %v3417_v0 }
0x24aa   :  { %v3419_v2 = vsel %vm295_vm5, %v3418_v1, -inf }
0x24ba   :  { %v3446_v57 = vpop.permute.xlu1 %3445 }
0x24bb   :  { %v3449_v59 = vadd.f32 %v3448_v55, %v3446_v57 }
0x24bd   :  { %vm3450_vm4 = vcmp.gt.f32.partialorder %v3449_v59, 0.0  ;;  %v3451_v60 = vmul.f32 0.01, %v3449_v59 }
0x24bf   :  { %v3452_v61 = vsel %vm3450_vm4, %v3449_v59, %v3451_v60  ;;  %v6563_v60 = vld [vmem:[%s7254_s6 + $0x5] ss:$0 sm:$0xff] }
0x24c0   :  { %v3453_v62 = vadd.f32 %v7139_v52, %v3452_v61 }
0x24c2   :  { %v3454_v63 = vsel %vm295_vm5, %v3453_v62, -inf }
0x24c3   :  { %3455 = vmax.xlane.f32.xlu0 %v3454_v63 }
0x24cb   :  { %3420 = vmax.xlane.f32.xlu0 %v3419_v2 }
0x2536   :  { %v3456_v3 = vpop.xlane.xlu0 %3455 }
0x2537   :  { %v3457_v4 = vsub.f32 %v3453_v62, %v3456_v3  ;;  %v3613_v62 = vld [vmem:[#allocation6 + $0x5] sm:$0x1] }
0x2539   :  { %v3458_v5 = vmul.f32 1.442695, %v3457_v4 }
0x253b   :  { %6662 = vpow2.f32 %v3458_v5 }
0x253e   :  { %v3421_v6 = vpop.xlane.xlu0 %3420 }
0x253f   :  { %v3422_v45 = vsub.f32 %v3418_v1, %v3421_v6 }
0x2541   :  { %v6663_v7 = vpop.eup %6662  ;;  %v3423_v8 = vmul.f32 1.442695, %v3422_v45 }
0x2542   :  { %v3460_v9 = vsel %vm295_vm5, %v6663_v7, 0.0 }
0x2543   :  { %6664 = vpow2.f32 %v3423_v8  ;;  %3461 = vadd.xlane.f32.xlu1 %v3460_v9 }
0x2549   :  { %v6665_v10 = vpop.eup %6664 }
0x254a   :  { %v3425_v12 = vsel %vm295_vm5, %v6665_v10, 0.0 }
0x254b   :  { %3426 = vadd.xlane.f32.xlu2 %v3425_v12 }
0x25b6   :  { %v3462_v17 = vpop.xlane.xlu1 %3461 }
0x25b7   :  { %6666 = vrcp.f32 %v3462_v17  ;;  %v3474_v25 = vand.u32 2147483648, %v3462_v17  ;;  %v3472_v26 = vand.u32 2147483647, %v3462_v17  ;;  %vm3468_vm8 = vweird.f32 %v3462_v17 }
0x25b9   :  { %v3475_v27 = vor.u32 1.1754944e-38, %v3474_v25  ;;  %vm3473_vm10 = vcmp.eq.f32.partialorder %v3472_v26, 8.507059e+37 }
0x25bd   :  { %v6667_v19 = vpop.eup %6666 }
0x25be   :  { %v3464_v20 = vmul.f32 %v6667_v19, %v3462_v17  ;;  %v3427_v23 = vpop.xlane.xlu2 %3426  ;;  %vm3469_vm7 = vweird.f32 %v6667_v19  ;;  %v6448_v17 = vld [vmem:[#allocation7 + $0x168] sm:$0xff] }
0x25bf   :  { %6668 = vrcp.f32 %v3427_v23  ;;  %vm3470_vm9 = vmor %vm3468_vm8, %vm3469_vm7  ;;  %v3439_v33 = vand.u32 2147483648, %v3427_v23  ;;  %v3437_v39 = vand.u32 2147483647, %v3427_v23  ;;  %vm3433_vm12 = vweird.f32 %v3427_v23  ;;  %3772 = vmatpush.bf16.msrb.mxu1 %v6448_v17 }
0x25c0   :  { %v3465_v24 = vsub.f32 1.0, %v3464_v20 }
0x25c1   :  { %v3440_v38 = vor.u32 1.1754944e-38, %v3439_v33  ;;  %vm3438_vm14 = vcmp.eq.f32.partialorder %v3437_v39, 8.507059e+37 }
0x25c2   :  { %v3466_v21 = vmul.f32 %v6667_v19, %v3465_v24 }
0x25c3   :  { %3773 = vmatpush.bf16.msrb.mxu1 %v6447_v18  ;;  %v6463_v18 = vld [vmem:[#allocation2 + $0x1a0] sm:$0xff] }
0x25c4   :  { %v3467_v28 = vadd.f32 %v6667_v19, %v3466_v21 }
0x25c5   :  { %v6669_v30 = vpop.eup %6668 }
0x25c6   :  { %v3471_v31 = vsel %vm3470_vm9, %v6667_v19, %v3467_v28  ;;  %v3429_v32 = vmul.f32 %v6669_v30, %v3427_v23  ;;  %vm3434_vm11 = vweird.f32 %v6669_v30 }
0x25c7   :  { %v3476_v34 = vsel %vm3473_vm10, %v3475_v27, %v3471_v31  ;;  %vm3435_vm13 = vmor %vm3433_vm12, %vm3434_vm11 }
0x25c8   :  { %v3430_v35 = vsub.f32 1.0, %v3429_v32  ;;  %v3477_v36 = vmul.f32 %v6663_v7, %v3476_v34  ;;  %v6446_v32 = vld [vmem:[#allocation7 + $0x158] sm:$0xff]  ;;  %v6445_v34 = vld [vmem:[#allocation7 + $0x150] sm:$0xff] }
0x25c9   :  { %3774 = vmatpush.bf16.msrb.mxu1 %v6446_v32 }
0x25ca   :  { %v3431_v37 = vmul.f32 %v6669_v30, %v3430_v35  ;;  %5890 = vmatmul.msk.f32.vlgmr.msrb.gmra.mxu3 %vm295_vm5, %v3477_v36  ;;  %v6444_v35 = vld [vmem:[#allocation7 + $0x148] sm:$0xff]  ;;  %v6443_v36 = vld [vmem:[#allocation7 + $0x140] sm:$0xff] }
0x25cc   :  { %v3432_v40 = vadd.f32 %v6669_v30, %v3431_v37 }
0x25cd   :  { %3775 = vmatpush.bf16.msrb.mxu1 %v6445_v34 }
0x25ce   :  { %v3436_v41 = vsel %vm3435_vm13, %v6669_v30, %v3432_v40 }
0x25cf   :  { %v3441_v42 = vsel %vm3438_vm14, %v3440_v38, %v3436_v41 }
0x25d0   :  { %v3442_v44 = vmul.f32 %v6665_v10, %v3441_v42 }
0x25d1   :  { %3776 = vmatpush.bf16.msrb.mxu1 %v6444_v35 }
0x25d2   :  { %5891 = vmatmul.msk.f32.vlgmr.msra.gmra.mxu1 %vm295_vm5, %v3442_v44  ;;  %v6458_v44 = vld [vmem:[#allocation10 + $0x178] sm:$0xff] }
0x25d5   :  { %3777 = vmatpush.bf16.msrb.mxu1 %v6443_v36 }
0x264d   :  { %v3499_v50 = vpop.f32.mrf.mxu3 }
0x264f   :  { %v3522_v51 = vpop.f32.mrf.mxu1 }
0x2650   :  { %v3523_v53 = vadd.f32 %v3522_v51, %v3499_v50  ;;  %v6455_v51 = vld [vmem:[#allocation10 + $0x160] sm:$0xff] }
0x2652   :  { %v3526_v54 = vmin.f32 %v3523_v53, 0.0  ;;  %vm3525_vm15 = vcmp.gt.f32.partialorder %v3523_v53, 0.0 }
0x2654   :  { %v3527_v55 = vmul.f32 1.442695, %v3526_v54 }
0x2656   :  { %6670 = vpow2.f32 %v3527_v55 }
0x265c   :  { %v6671_v56 = vpop.eup %6670 }
0x265d   :  { %v5892_v57 = vadd.f32 -1.0, %v6671_v56  ;;  %v6454_v56 = vld [vmem:[#allocation10 + $0x158] sm:$0xff] }
0x265f   :  { %v3530_v58 = vsel %vm3525_vm15, %v3523_v53, %v5892_v57 }
0x2660   :  { %v3531_v59 = vpack.c.bf16 %v3530_v58, %v3530_v58 }
0x2662   :  { %3605 = vmatmul.bf16.vlgmr.msra.gmra.mxu0 %v3531_v59 }
0x26df   :  { %v3606_v29 = vpop.f32.mrf.mxu0 }
0x26e0   :  { %3635 = vmatpush.xpose.msra.mxu2 %v3606_v29  ;;  %3688 = vmatpush.msra.mxu3 %v3606_v29  ;;  %v3617_v61 = vmul.f32 %v6563_v60, %v3606_v29  ;;  %v6453_v29 = vld [vmem:[#allocation10 + $0x150] sm:$0xff] }
0x26e2   :  { %3618 = vadd.xlane.f32.xlu0 %v3617_v61 }
0x26e3   :  { %3636 = vmatmul.f32.vlgmr.msra.gmra.mxu2 %v3613_v62 }
0x26e4   :  { %3898 = vmatpush.bf16.msrb.mxu2 %v6458_v44  ;;  %v6025_v44 = vld [vmem:[%s7251_s3 + $0xc] sm:$0x3] }
0x26e5   :  { %4009 = vmatpush.xpose.msrb.mxu0 %v6025_v44 }
0x26e7   :  { %v3608_v63 = vpop.f32.mrf.mxu0 }
0x26e8   :  { %3899 = vmatpush.bf16.msrb.mxu2 %v6457_v46  ;;  %v6565_v46 = vld [vmem:[#allocation12 + $0x5] ss:$0 sm:$0xff] }
0x26ec   :  { %3900 = vmatpush.bf16.msrb.mxu2 %v6456_v48 }
0x26f0   :  { %3901 = vmatpush.bf16.msrb.mxu2 %v6455_v51 }
0x26f4   :  { %3902 = vmatpush.bf16.msrb.mxu2 %v6454_v56 }
0x26f8   :  { %3903 = vmatpush.bf16.msrb.mxu2 %v6453_v29 }
0x2755   :  { %v3619_v2 = vpop.xlane.xlu0 %3618 }
0x2766   :  { %v3637_v0 = vpop.f32.mrf.mxu2 }
0x2767   :  { %v3640_v1 = vperm.slane %v3637_v0, 0 }
0x2769   :  { %v3641_v3 = vadd.f32 %v3640_v1, %v3619_v2  ;;  %v6452_v1 = vld [vmem:[#allocation10 + $0x148] sm:$0xff] }
0x276a   :  { %3904 = vmatpush.bf16.msrb.mxu2 %v6452_v1 }
0x276b   :  { %v3643_v4 = vmul.f32 0.01, %v3641_v3  ;;  %vm3642_vm0 = vcmp.gt.f32.partialorder %v3641_v3, 0.0 }
0x276d   :  { %v3644_v5 = vsel %vm3642_vm0, %v3641_v3, %v3643_v4 }
0x276e   :  { %v3645_v6 = vadd.f32 %v7139_v52, %v3644_v5  ;;  %v6451_v5 = vld [vmem:[#allocation10 + $0x140] sm:$0xff] }
0x276f   :  { %3905 = vmatpush.bf16.msrb.mxu2 %v6451_v5 }
0x2770   :  { %v3646_v45 = vsel %vm295_vm5, %v3645_v6, -inf }
0x2771   :  { %3647 = vmax.xlane.f32.xlu0 %v3646_v45 }
0x27e4   :  { %v3648_v7 = vpop.xlane.xlu0 %3647 }
0x27e5   :  { %v3649_v8 = vsub.f32 %v3645_v6, %v3648_v7 }
0x27e7   :  { %v3650_v9 = vmul.f32 1.442695, %v3649_v8  ;;  %v6466_v8 = vld [vmem:[#allocation2 + $0x1b8] sm:$0xff] }
0x27e8   :  { %3977 = vmatpush.bf16.msrb.mxu3 %v6466_v8 }
0x27e9   :  { %6672 = vpow2.f32 %v3650_v9 }
0x27ef   :  { %v6673_v10 = vpop.eup %6672 }
0x27f0   :  { %v3652_v12 = vsel %vm295_vm5, %v6673_v10, 0.0 }
0x27f1   :  { %3653 = vadd.xlane.f32.xlu0 %v3652_v12 }
0x2864   :  { %v3654_v19 = vpop.xlane.xlu0 %3653 }
0x2865   :  { %6674 = vrcp.f32 %v3654_v19  ;;  %v3666_v24 = vand.u32 2147483648, %v3654_v19  ;;  %v3664_v21 = vand.u32 2147483647, %v3654_v19  ;;  %vm3660_vm2 = vweird.f32 %v3654_v19 }
0x2867   :  { %v3667_v28 = vor.u32 1.1754944e-38, %v3666_v24  ;;  %vm3665_vm4 = vcmp.eq.f32.partialorder %v3664_v21, 8.507059e+37  ;;  %v6462_v24 = vld [vmem:[#allocation2 + $0x198] sm:$0xff] }
0x286b   :  { %v6675_v52 = vpop.eup %6674 }
0x286c   :  { %v3656_v20 = vmul.f32 %v6675_v52, %v3654_v19  ;;  %vm3661_vm1 = vweird.f32 %v6675_v52 }
0x286d   :  { %vm3662_vm3 = vmor %vm3660_vm2, %vm3661_vm1 }
0x286e   :  { %v3657_v23 = vsub.f32 1.0, %v3656_v20 }
0x2870   :  { %v3658_v25 = vmul.f32 %v6675_v52, %v3657_v23 }
0x2872   :  { %v3659_v26 = vadd.f32 %v6675_v52, %v3658_v25 }
0x2874   :  { %v3663_v30 = vsel %vm3662_vm3, %v6675_v52, %v3659_v26 }
0x2875   :  { %v3668_v27 = vsel %vm3665_vm4, %v3667_v28, %v3663_v30 }
0x2876   :  { %v3669_v31 = vmul.f32 %v6673_v10, %v3668_v27  ;;  %v6465_v10 = vld [vmem:[#allocation2 + $0x1b0] sm:$0xff] }
0x2877   :  { %3978 = vmatpush.bf16.msrb.mxu3 %v6465_v10  ;;  %v6461_v27 = vld [vmem:[#allocation2 + $0x190] sm:$0xff] }
0x2878   :  { %5926 = vmatmul.msk.f32.vlgmr.msra.gmra.mxu3 %vm295_vm5, %v3669_v31 }
0x287b   :  { %3979 = vmatpush.bf16.msrb.mxu3 %v6464_v14 }
0x287f   :  { %3980 = vmatpush.bf16.msrb.mxu3 %v6463_v18 }
0x2883   :  { %3981 = vmatpush.bf16.msrb.mxu3 %v6462_v24 }
0x2887   :  { %3982 = vmatpush.bf16.msrb.mxu3 %v6461_v27 }
0x28fb   :  { %v3690_v33 = vpop.f32.mrf.mxu3 }
0x28fc   :  { %v3694_v37 = vmin.f32 %v3690_v33, 0.0  ;;  %vm3693_vm6 = vcmp.gt.f32.partialorder %v3690_v33, 0.0 }
0x28fe   :  { %v3695_v39 = vmul.f32 1.442695, %v3694_v37 }
0x2900   :  { %6676 = vpow2.f32 %v3695_v39 }
0x2906   :  { %v6677_v40 = vpop.eup %6676 }
0x2907   :  { %v5927_v38 = vadd.f32 -1.0, %v6677_v40 }
0x2909   :  { %v3698_v41 = vsel %vm3693_vm6, %v3690_v33, %v5927_v38  ;;  %v6460_v33 = vld [vmem:[#allocation2 + $0x188] sm:$0xff] }
0x290a   :  { %v3699_v42 = vpack.c.bf16 %v3698_v41, %v3698_v41  ;;  %3983 = vmatpush.bf16.msrb.mxu3 %v6460_v33 }
0x290c   :  { %3778 = vmatmul.bf16.vlgmr.msrb.gmra.mxu1 %v3699_v42  ;;  %v6459_v42 = vld [vmem:[#allocation2 + $0x180] sm:$0xff] }
0x290e   :  { %3984 = vmatpush.bf16.msrb.mxu3 %v6459_v42 }
0x2989   :  { %v3779_v43 = vpop.f32.mrf.mxu1 }
0x298a   :  { %v7184_v49 = vadd.f32 %v6564_v47, %v3779_v43 }
0x298c   :  { %v3784_v50 = vmul.f32 0.70710677, %v7184_v49  ;;  %v3783_v39 = vmul.f32 0.5, %v7184_v49 }
0x298e   :  { %v3785_v53 = vmul.f32 %v3784_v50, %v3784_v50 }
0x2990   :  { %v3786_v54 = vmin.f32 %v3785_v53, 16.0 }
0x2991   :  { %v3781_v55 = vpop.f32.mrf.mxu1 }
0x2992   :  { %v3787_v57 = vmul.f32 2.1237322e-06, %v3786_v54  ;;  %v3798_v58 = vmul.f32 3.8918573e-05, %v3786_v54 }
0x2994   :  { %v3788_v59 = vadd.f32 0.00028619796, %v3787_v57  ;;  %v3799_v60 = vadd.f32 0.001143296, %v3798_v58 }
0x2996   :  { %v3789_v61 = vmul.f32 %v3788_v59, %v3786_v54  ;;  %v3800_v62 = vmul.f32 %v3799_v60, %v3786_v54 }
0x2998   :  { %v3801_v63 = vadd.f32 0.014752088, %v3800_v62  ;;  %v3790_v0 = vadd.f32 0.0036580483, %v3789_v61 }
0x299a   :  { %v3802_v2 = vmul.f32 %v3801_v63, %v3786_v54  ;;  %v3791_v4 = vmul.f32 %v3790_v0, %v3786_v54 }
0x299c   :  { %v3803_v3 = vadd.f32 0.112945676, %v3802_v2  ;;  %v3792_v7 = vadd.f32 0.05243302, %v3791_v4  ;;  %v7200_v2 = vld [vmem:[%s7249_s1] sm:$0xff] }
0x299e   :  { %v3804_v6 = vmul.f32 %v3803_v3, %v3786_v54  ;;  %v3793_v13 = vmul.f32 %v3792_v7, %v3786_v54 }
0x29a0   :  { %v3805_v45 = vadd.f32 0.4994258, %v3804_v6  ;;  %v3794_v17 = vadd.f32 0.18741608, %v3793_v13 }
0x29a2   :  { %v3806_v9 = vmul.f32 %v3805_v45, %v3786_v54  ;;  %v3795_v52 = vmul.f32 %v3794_v17, %v3786_v54  ;;  %v6026_v54 = vld [vmem:[%s7252_s4 + $0xc] sm:$0x3] }
0x29a4   :  { %v3807_v12 = vadd.f32 1.0, %v3806_v9  ;;  %v3796_v21 = vadd.f32 1.1283791, %v3795_v52  ;;  %v6473_v52 = vld [vmem:[#allocation4 + $0x1b0] sm:$0xff] }
0x29a6   :  { %6678 = vrcp.f32 %v3807_v12  ;;  %v3819_v25 = vand.u32 2147483648, %v3807_v12  ;;  %v3817_v28 = vand.u32 2147483647, %v3807_v12  ;;  %vm3813_vm8 = vweird.f32 %v3807_v12 }
0x29a7   :  { %v3797_v32 = vmul.f32 %v3796_v21, %v3784_v50 }
0x29a8   :  { %v3820_v31 = vor.u32 1.1754944e-38, %v3819_v25  ;;  %vm3818_vm10 = vcmp.eq.f32.partialorder %v3817_v28, 8.507059e+37 }
0x29ac   :  { %v6679_v19 = vpop.eup %6678 }
0x29ad   :  { %v3809_v20 = vmul.f32 %v6679_v19, %v3807_v12  ;;  %vm3814_vm7 = vweird.f32 %v6679_v19 }
0x29ae   :  { %vm3815_vm9 = vmor %vm3813_vm8, %vm3814_vm7 }
0x29af   :  { %v3810_v23 = vsub.f32 1.0, %v3809_v20 }
0x29b1   :  { %v3811_v26 = vmul.f32 %v6679_v19, %v3810_v23  ;;  %v6472_v23 = vld [vmem:[#allocation4 + $0x1a8] sm:$0xff] }
0x29b3   :  { %v3812_v30 = vadd.f32 %v6679_v19, %v3811_v26 }
0x29b5   :  { %v3816_v34 = vsel %vm3815_vm9, %v6679_v19, %v3812_v30  ;;  %v6474_v19 = vld [vmem:[#allocation4 + $0x1b8] sm:$0xff] }
0x29b6   :  { %v3821_v35 = vsel %vm3818_vm10, %v3820_v31, %v3816_v34  ;;  %4223 = vmatpush.bf16.msra.mxu3 %v6474_v19  ;;  %v6481_v19 = vld [vmem:[#allocation7 + $0x1b0] sm:$0xff] }
0x29b7   :  { %v3822_v36 = vmul.f32 %v3821_v35, %v3797_v32 }
0x29b9   :  { %v5960_v37 = vclamps-f32 %v3822_v36, 1.0 }
0x29ba   :  { %4224 = vmatpush.bf16.msra.mxu3 %v6473_v52  ;;  %v6480_v52 = vld [vmem:[#allocation7 + $0x1a8] sm:$0xff] }
0x29bb   :  { %v3825_v40 = vadd.f32 1.0, %v5960_v37 }
0x29bd   :  { %v3826_v38 = vmul.f32 %v3825_v40, %v3783_v39 }
0x29be   :  { %4225 = vmatpush.bf16.msra.mxu3 %v6472_v23 }
0x29bf   :  { %v3827_v41 = vpack.c.bf16 %v3826_v38, %v3826_v38 }
0x29c1   :  { %3906 = vmatmul.bf16.vlgmr.msrb.gmra.mxu2 %v3827_v41 }
0x2a44   :  { %v3907_v47 = vpop.f32.mrf.mxu2 }
0x2a45   :  { %v3908_v43 = vadd.f32 %v6565_v46, %v3907_v47 }
0x2a47   :  { %v3911_v48 = vpack.c.bf16 %v3908_v43, %v3908_v43 }
0x2a49   :  { %3985 = vmatmul.bf16.vlgmr.msrb.gmra.mxu3 %v3911_v48  ;;  %v6471_v48 = vld [vmem:[#allocation4 + $0x1a0] sm:$0xff] }
0x2a4a   :  { %4226 = vmatpush.bf16.msra.mxu3 %v6471_v48  ;;  %v6489_v48 = vld [vmem:[#allocation10 + $0x1b0] sm:$0xff] }
0x2a4c   :  { %v3909_v50 = vpop.f32.mrf.mxu2 }
0x2a4d   :  { %v6470_v50 = vld [vmem:[#allocation4 + $0x198] sm:$0xff] }
0x2a4e   :  { %4227 = vmatpush.bf16.msra.mxu3 %v6470_v50  ;;  %v6567_v50 = vld [vmem:[#allocation9 + $0x6] ss:$0 sm:$0xff] }
0x2acc   :  { %v3986_v51 = vpop.f32.mrf.mxu3 }
0x2acd   :  { %v4069_v49 = vmul.f32 %v7005_v16, %v3986_v51  ;;  %v4104_v53 = vmul.f32 %v7003_v15, %v3986_v51  ;;  %4010 = vmatmul.f32.vlgmr.msrb.gmra.mxu0 %v3986_v51 }
0x2ace   :  { %4029 = vmatpush.xpose.msra.mxu0 %v3986_v51  ;;  %v6469_v51 = vld [vmem:[#allocation4 + $0x190] sm:$0xff] }
0x2acf   :  { %4123 = vmatpush.msra.mxu1 %v4104_v53  ;;  %4146 = vmatpush.msra.mxu2 %v4069_v49  ;;  %v6468_v49 = vld [vmem:[#allocation4 + $0x188] sm:$0xff]  ;;  %v6467_v53 = vld [vmem:[#allocation4 + $0x180] sm:$0xff] }
0x2ad0   :  { %4228 = vmatpush.bf16.msra.mxu3 %v6469_v51 }
0x2ad4   :  { %v3988_v55 = vpop.f32.mrf.mxu3  ;;  %4229 = vmatpush.bf16.msra.mxu3 %v6468_v49  ;;  %v6488_v49 = vld [vmem:[#allocation10 + $0x1a8] sm:$0xff] }
0x2ad5   :  { %4030 = vmatmul.f32.vlgmr.msra.gmra.mxu0 %v6026_v54 }
0x2ad8   :  { %4230 = vmatpush.bf16.msra.mxu3 %v6467_v53 }
0x2b4a   :  { %v4011_v56 = vpop.f32.mrf.mxu0 }
0x2b4b   :  { %4071 = vperm.xlu1 %6543, %v4011_v56   ;;  %4036 = vperm.xlu0 %6544, %v4011_v56  }
0x2b52   :  { %v4031_v57 = vpop.f32.mrf.mxu0 }
0x2b53   :  { %6547 = vset.pattern.permute.xlu0 %v6906_v11  ;;  %v4039_v58 = vperm.slane %v4031_v57, 0  ;;  %v4074_v59 = vperm.slane %v4031_v57, 1 }
0x2bbd   :  { %v4072_v60 = vpop.permute.xlu1 %4071  ;;  %v4037_v29 = vpop.permute.xlu0 %4036 }
0x2bbe   :  { %v4075_v61 = vadd.f32 %v4074_v59, %v4072_v60  ;;  %v4040_v62 = vadd.f32 %v4039_v58, %v4037_v29 }
0x2bc0   :  { %vm4041_vm11 = vcmp.gt.f32.partialorder %v4040_v62, 0.0  ;;  %v4042_v63 = vmul.f32 0.01, %v4040_v62  ;;  %v4077_v0 = vmul.f32 0.01, %v4075_v61  ;;  %vm4076_vm12 = vcmp.gt.f32.partialorder %v4075_v61, 0.0 }
0x2bc2   :  { %v4043_v1 = vsel %vm4041_vm11, %v4040_v62, %v4042_v63  ;;  %v4078_v4 = vsel %vm4076_vm12, %v4075_v61, %v4077_v0  ;;  %v6566_v62 = vld [vmem:[%s7254_s6 + $0x6] ss:$0 sm:$0xff] }
0x2bc3   :  { %v4044_v3 = vadd.f32 %v7200_v2, %v4043_v1  ;;  %v4079_v5 = vadd.f32 %v7200_v2, %v4078_v4  ;;  %v4239_v1 = vld [vmem:[#allocation6 + $0x6] sm:$0x1] }
0x2bc5   :  { %v4045_v11 = vsel %vm295_vm5, %v4044_v3, -inf  ;;  %v4080_v6 = vsel %vm295_vm5, %v4079_v5, -inf }
0x2bc6   :  { %4046 = vmax.xlane.f32.xlu2 %v4045_v11 }
0x2bce   :  { %4081 = vmax.xlane.f32.xlu2 %v4080_v6 }
0x2c39   :  { %v4047_v45 = vpop.xlane.xlu2 %4046 }
0x2c3a   :  { %v4048_v7 = vsub.f32 %v4044_v3, %v4047_v45 }
0x2c3c   :  { %v4049_v8 = vmul.f32 1.442695, %v4048_v7 }
0x2c3e   :  { %6680 = vpow2.f32 %v4049_v8 }
0x2c41   :  { %v4082_v9 = vpop.xlane.xlu2 %4081 }
0x2c42   :  { %v4083_v10 = vsub.f32 %v4079_v5, %v4082_v9 }
0x2c44   :  { %v6681_v12 = vpop.eup %6680  ;;  %v4084_v13 = vmul.f32 1.442695, %v4083_v10 }
0x2c45   :  { %v4051_v14 = vsel %vm295_vm5, %v6681_v12, 0.0 }
0x2c46   :  { %6682 = vpow2.f32 %v4084_v13  ;;  %4052 = vadd.xlane.f32.xlu2 %v4051_v14 }
0x2c4c   :  { %v6683_v17 = vpop.eup %6682 }
0x2c4d   :  { %v4086_v18 = vsel %vm295_vm5, %v6683_v17, 0.0 }
0x2c4e   :  { %4087 = vadd.xlane.f32.xlu2 %v4086_v18  ;;  %v6482_v18 = vld [vmem:[#allocation7 + $0x1b8] sm:$0xff] }
0x2c4f   :  { %4396 = vmatpush.bf16.msrb.mxu2 %v6482_v18 }
0x2c53   :  { %4397 = vmatpush.bf16.msrb.mxu2 %v6481_v19  ;;  %v6496_v19 = vld [vmem:[#allocation2 + $0x1e8] sm:$0xff] }
0x2c57   :  { %4398 = vmatpush.bf16.msrb.mxu2 %v6480_v52 }
0x2cb9   :  { %v4053_v20 = vpop.xlane.xlu2 %4052 }
0x2cba   :  { %6684 = vrcp.f32 %v4053_v20  ;;  %v4065_v28 = vand.u32 2147483648, %v4053_v20  ;;  %v4063_v27 = vand.u32 2147483647, %v4053_v20  ;;  %vm4059_vm14 = vweird.f32 %v4053_v20 }
0x2cbc   :  { %v4066_v34 = vor.u32 1.1754944e-38, %v4065_v28  ;;  %vm4064_vm0 = vcmp.eq.f32.partialorder %v4063_v27, 8.507059e+37 }
0x2cc0   :  { %v6685_v24 = vpop.eup %6684 }
0x2cc1   :  { %v4055_v25 = vmul.f32 %v6685_v24, %v4053_v20  ;;  %v4088_v21 = vpop.xlane.xlu2 %4087  ;;  %vm4060_vm13 = vweird.f32 %v6685_v24  ;;  %v6479_v20 = vld [vmem:[#allocation7 + $0x1a0] sm:$0xff] }
0x2cc2   :  { %6686 = vrcp.f32 %v4088_v21  ;;  %vm4061_vm15 = vmor %vm4059_vm14, %vm4060_vm13  ;;  %v4100_v40 = vand.u32 2147483648, %v4088_v21  ;;  %v4098_v41 = vand.u32 2147483647, %v4088_v21  ;;  %vm4094_vm2 = vweird.f32 %v4088_v21  ;;  %4399 = vmatpush.bf16.msrb.mxu2 %v6479_v20  ;;  %v6495_v20 = vld [vmem:[#allocation2 + $0x1e0] sm:$0xff] }
0x2cc3   :  { %v4056_v26 = vsub.f32 1.0, %v4055_v25 }
0x2cc4   :  { %v4101_v44 = vor.u32 1.1754944e-38, %v4100_v40  ;;  %vm4099_vm4 = vcmp.eq.f32.partialorder %v4098_v41, 8.507059e+37 }
0x2cc5   :  { %v4057_v30 = vmul.f32 %v6685_v24, %v4056_v26 }
0x2cc7   :  { %v4058_v31 = vadd.f32 %v6685_v24, %v4057_v30 }
0x2cc8   :  { %v6687_v32 = vpop.eup %6686 }
0x2cc9   :  { %v4062_v35 = vsel %vm4061_vm15, %v6685_v24, %v4058_v31  ;;  %v4090_v36 = vmul.f32 %v6687_v32, %v4088_v21  ;;  %vm4095_vm1 = vweird.f32 %v6687_v32 }
0x2cca   :  { %v4067_v33 = vsel %vm4064_vm0, %v4066_v34, %v4062_v35  ;;  %vm4096_vm3 = vmor %vm4094_vm2, %vm4095_vm1 }
0x2ccb   :  { %v4068_v37 = vmul.f32 %v6681_v12, %v4067_v33  ;;  %v4091_v39 = vsub.f32 1.0, %v4090_v36  ;;  %v6478_v36 = vld [vmem:[#allocation7 + $0x198] sm:$0xff]  ;;  %v6477_v33 = vld [vmem:[#allocation7 + $0x190] sm:$0xff] }
0x2ccc   :  { %4400 = vmatpush.bf16.msrb.mxu2 %v6478_v36 }
0x2ccd   :  { %v4092_v38 = vmul.f32 %v6687_v32, %v4091_v39  ;;  %6028 = vmatmul.msk.f32.vlgmr.msra.gmra.mxu2 %vm295_vm5, %v4068_v37  ;;  %v6476_v37 = vld [vmem:[#allocation7 + $0x188] sm:$0xff]  ;;  %v6475_v39 = vld [vmem:[#allocation7 + $0x180] sm:$0xff] }
0x2ccf   :  { %v4093_v42 = vadd.f32 %v6687_v32, %v4092_v38 }
0x2cd0   :  { %4401 = vmatpush.bf16.msrb.mxu2 %v6477_v33 }
0x2cd1   :  { %v4097_v46 = vsel %vm4096_vm3, %v6687_v32, %v4093_v42 }
0x2cd2   :  { %v4102_v47 = vsel %vm4099_vm4, %v4101_v44, %v4097_v46 }
0x2cd3   :  { %v4103_v43 = vmul.f32 %v6683_v17, %v4102_v47 }
0x2cd4   :  { %4402 = vmatpush.bf16.msrb.mxu2 %v6476_v37 }
0x2cd5   :  { %6027 = vmatmul.msk.f32.vlgmr.msra.gmra.mxu1 %vm295_vm5, %v4103_v43  ;;  %v6490_v43 = vld [vmem:[#allocation10 + $0x1b8] sm:$0xff] }
0x2cd8   :  { %4403 = vmatpush.bf16.msrb.mxu2 %v6475_v39 }
0x2d50   :  { %v4148_v54 = vpop.f32.mrf.mxu2 }
0x2d52   :  { %v4125_v55 = vpop.f32.mrf.mxu1 }
0x2d53   :  { %v4149_v56 = vadd.f32 %v4148_v54, %v4125_v55  ;;  %v6487_v55 = vld [vmem:[#allocation10 + $0x1a0] sm:$0xff] }
0x2d55   :  { %v4152_v57 = vmin.f32 %v4149_v56, 0.0  ;;  %vm4151_vm6 = vcmp.gt.f32.partialorder %v4149_v56, 0.0 }
0x2d57   :  { %v4153_v58 = vmul.f32 1.442695, %v4152_v57 }
0x2d59   :  { %6688 = vpow2.f32 %v4153_v58 }
0x2d5f   :  { %v6689_v59 = vpop.eup %6688 }
0x2d60   :  { %v6029_v60 = vadd.f32 -1.0, %v6689_v59  ;;  %v6486_v59 = vld [vmem:[#allocation10 + $0x198] sm:$0xff] }
0x2d62   :  { %v4156_v29 = vsel %vm4151_vm6, %v4149_v56, %v6029_v60 }
0x2d63   :  { %v4157_v61 = vpack.c.bf16 %v4156_v29, %v4156_v29 }
0x2d65   :  { %4231 = vmatmul.bf16.vlgmr.msra.gmra.mxu3 %v4157_v61 }
0x2de8   :  { %v4232_v63 = vpop.f32.mrf.mxu3 }
0x2de9   :  { %4261 = vmatpush.xpose.msrb.mxu0 %v4232_v63  ;;  %4314 = vmatpush.msrb.mxu1 %v4232_v63  ;;  %v4243_v0 = vmul.f32 %v6566_v62, %v4232_v63  ;;  %v6485_v63 = vld [vmem:[#allocation10 + $0x190] sm:$0xff] }
0x2deb   :  { %4244 = vadd.xlane.f32.xlu1 %v4243_v0 }
0x2dec   :  { %4262 = vmatmul.f32.vlgmr.msrb.gmra.mxu0 %v4239_v1 }
0x2ded   :  { %4524 = vmatpush.bf16.msra.mxu0 %v6490_v43  ;;  %v6162_v43 = vld [vmem:[%s7251_s3 + $0xe] sm:$0x3] }
0x2dee   :  { %4635 = vmatpush.xpose.msrb.mxu3 %v6162_v43 }
0x2df0   :  { %v4234_v3 = vpop.f32.mrf.mxu3 }
0x2df1   :  { %4525 = vmatpush.bf16.msra.mxu0 %v6489_v48  ;;  %v6568_v48 = vld [vmem:[#allocation12 + $0x6] ss:$0 sm:$0xff] }
0x2df5   :  { %4526 = vmatpush.bf16.msra.mxu0 %v6488_v49 }
0x2df9   :  { %4527 = vmatpush.bf16.msra.mxu0 %v6487_v55 }
0x2dfd   :  { %4528 = vmatpush.bf16.msra.mxu0 %v6486_v59 }
0x2e01   :  { %4529 = vmatpush.bf16.msra.mxu0 %v6485_v63 }
0x2e5e   :  { %v4245_v5 = vpop.xlane.xlu1 %4244 }
0x2e69   :  { %v4263_v11 = vpop.f32.mrf.mxu0 }
0x2e6a   :  { %v4266_v4 = vperm.slane %v4263_v11, 0 }
0x2e6c   :  { %v4267_v6 = vadd.f32 %v4266_v4, %v4245_v5  ;;  %v6484_v4 = vld [vmem:[#allocation10 + $0x188] sm:$0xff] }
0x2e6d   :  { %4530 = vmatpush.bf16.msra.mxu0 %v6484_v4 }
0x2e6e   :  { %v4269_v45 = vmul.f32 0.01, %v4267_v6  ;;  %vm4268_vm7 = vcmp.gt.f32.partialorder %v4267_v6, 0.0 }
0x2e70   :  { %v4270_v7 = vsel %vm4268_vm7, %v4267_v6, %v4269_v45 }
0x2e71   :  { %v4271_v8 = vadd.f32 %v7200_v2, %v4270_v7  ;;  %v6483_v7 = vld [vmem:[#allocation10 + $0x180] sm:$0xff] }
0x2e72   :  { %4531 = vmatpush.bf16.msra.mxu0 %v6483_v7 }
0x2e73   :  { %v4272_v9 = vsel %vm295_vm5, %v4271_v8, -inf }
0x2e74   :  { %4273 = vmax.xlane.f32.xlu0 %v4272_v9 }
0x2ee7   :  { %v4274_v10 = vpop.xlane.xlu0 %4273 }
0x2ee8   :  { %v4275_v12 = vsub.f32 %v4271_v8, %v4274_v10 }
0x2eea   :  { %v4276_v13 = vmul.f32 1.442695, %v4275_v12  ;;  %v6498_v12 = vld [vmem:[#allocation2 + $0x1f8] sm:$0xff] }
0x2eeb   :  { %4603 = vmatpush.bf16.msra.mxu1 %v6498_v12 }
0x2eec   :  { %6690 = vpow2.f32 %v4276_v13 }
0x2ef2   :  { %v6691_v14 = vpop.eup %6690 }
0x2ef3   :  { %v4278_v17 = vsel %vm295_vm5, %v6691_v14, 0.0 }
0x2ef4   :  { %4279 = vadd.xlane.f32.xlu2 %v4278_v17 }
0x2f67   :  { %v4280_v23 = vpop.xlane.xlu2 %4279 }
0x2f68   :  { %6692 = vrcp.f32 %v4280_v23  ;;  %v4292_v26 = vand.u32 2147483648, %v4280_v23  ;;  %v4290_v30 = vand.u32 2147483647, %v4280_v23  ;;  %vm4286_vm9 = vweird.f32 %v4280_v23 }
0x2f6a   :  { %v4293_v31 = vor.u32 1.1754944e-38, %v4292_v26  ;;  %vm4291_vm11 = vcmp.eq.f32.partialorder %v4290_v30, 8.507059e+37  ;;  %v6494_v26 = vld [vmem:[#allocation2 + $0x1d8] sm:$0xff] }
0x2f6e   :  { %v6693_v24 = vpop.eup %6692 }
0x2f6f   :  { %v4282_v25 = vmul.f32 %v6693_v24, %v4280_v23  ;;  %vm4287_vm8 = vweird.f32 %v6693_v24 }
0x2f70   :  { %vm4288_vm10 = vmor %vm4286_vm9, %vm4287_vm8 }
0x2f71   :  { %v4283_v21 = vsub.f32 1.0, %v4282_v25 }
0x2f73   :  { %v4284_v28 = vmul.f32 %v6693_v24, %v4283_v21 }
0x2f75   :  { %v4285_v27 = vadd.f32 %v6693_v24, %v4284_v28 }
0x2f77   :  { %v4289_v32 = vsel %vm4288_vm10, %v6693_v24, %v4285_v27 }
0x2f78   :  { %v4294_v34 = vsel %vm4291_vm11, %v4293_v31, %v4289_v32 }
0x2f79   :  { %v4295_v35 = vmul.f32 %v6691_v14, %v4294_v34  ;;  %v6497_v14 = vld [vmem:[#allocation2 + $0x1f0] sm:$0xff] }
0x2f7a   :  { %4604 = vmatpush.bf16.msra.mxu1 %v6497_v14  ;;  %v6493_v34 = vld [vmem:[#allocation2 + $0x1d0] sm:$0xff] }
0x2f7b   :  { %6063 = vmatmul.msk.f32.vlgmr.msrb.gmra.mxu1 %vm295_vm5, %v4295_v35 }
0x2f7e   :  { %4605 = vmatpush.bf16.msra.mxu1 %v6496_v19  ;;  %v6506_v19 = vld [vmem:[#allocation4 + $0x1f8] sm:$0xff] }
0x2f82   :  { %4606 = vmatpush.bf16.msra.mxu1 %v6495_v20 }
0x2f86   :  { %4607 = vmatpush.bf16.msra.mxu1 %v6494_v26 }
0x2f8a   :  { %4608 = vmatpush.bf16.msra.mxu1 %v6493_v34 }
0x2ff8   :  { %v4316_v40 = vpop.f32.mrf.mxu1 }
0x2ff9   :  { %v4320_v38 = vmin.f32 %v4316_v40, 0.0  ;;  %vm4319_vm12 = vcmp.gt.f32.partialorder %v4316_v40, 0.0 }
0x2ffb   :  { %v4321_v41 = vmul.f32 1.442695, %v4320_v38 }
0x2ffd   :  { %6694 = vpow2.f32 %v4321_v41 }
0x3003   :  { %v6695_v42 = vpop.eup %6694 }
0x3004   :  { %v6064_v44 = vadd.f32 -1.0, %v6695_v42 }
0x3006   :  { %v4324_v46 = vsel %vm4319_vm12, %v4316_v40, %v6064_v44  ;;  %v6492_v40 = vld [vmem:[#allocation2 + $0x1c8] sm:$0xff] }
0x3007   :  { %v4325_v47 = vpack.c.bf16 %v4324_v46, %v4324_v46  ;;  %4609 = vmatpush.bf16.msra.mxu1 %v6492_v40 }
0x3009   :  { %4404 = vmatmul.bf16.vlgmr.msrb.gmra.mxu2 %v4325_v47  ;;  %v6491_v47 = vld [vmem:[#allocation2 + $0x1c0] sm:$0xff] }
0x300b   :  { %4610 = vmatpush.bf16.msra.mxu1 %v6491_v47 }
0x300f   :  { %4849 = vmatpush.bf16.msrb.mxu1 %v6506_v19 }
0x308c   :  { %v4405_v51 = vpop.f32.mrf.mxu2 }
0x308d   :  { %v7217_v53 = vadd.f32 %v6567_v50, %v4405_v51 }
0x308f   :  { %v4410_v54 = vmul.f32 0.70710677, %v7217_v53  ;;  %v4409_v41 = vmul.f32 0.5, %v7217_v53 }
0x3091   :  { %v4411_v56 = vmul.f32 %v4410_v54, %v4410_v54 }
0x3093   :  { %v4412_v57 = vmin.f32 %v4411_v56, 16.0 }
0x3094   :  { %v4407_v58 = vpop.f32.mrf.mxu2 }
0x3095   :  { %v4413_v60 = vmul.f32 2.1237322e-06, %v4412_v57  ;;  %v4424_v29 = vmul.f32 3.8918573e-05, %v4412_v57 }
0x3097   :  { %v4414_v61 = vadd.f32 0.00028619796, %v4413_v60  ;;  %v4425_v62 = vadd.f32 0.001143296, %v4424_v29 }
0x3099   :  { %v4415_v0 = vmul.f32 %v4414_v61, %v4412_v57  ;;  %v4426_v1 = vmul.f32 %v4425_v62, %v4412_v57 }
0x309b   :  { %v4427_v3 = vadd.f32 0.014752088, %v4426_v1  ;;  %v4416_v11 = vadd.f32 0.0036580483, %v4415_v0 }
0x309d   :  { %v4428_v5 = vmul.f32 %v4427_v3, %v4412_v57  ;;  %v4417_v45 = vmul.f32 %v4416_v11, %v4412_v57 }
0x309f   :  { %v4429_v6 = vadd.f32 0.112945676, %v4428_v5  ;;  %v4418_v10 = vadd.f32 0.05243302, %v4417_v45 }
0x30a1   :  { %v4430_v8 = vmul.f32 %v4429_v6, %v4412_v57  ;;  %v4419_v18 = vmul.f32 %v4418_v10, %v4412_v57 }
0x30a3   :  { %v4431_v9 = vadd.f32 0.4994258, %v4430_v8  ;;  %v4420_v52 = vadd.f32 0.18741608, %v4419_v18 }
0x30a5   :  { %v4432_v13 = vmul.f32 %v4431_v9, %v4412_v57  ;;  %v4421_v24 = vmul.f32 %v4420_v52, %v4412_v57  ;;  %v6163_v57 = vld [vmem:[%s7252_s4 + $0xe] sm:$0x3]  ;;  %v6505_v52 = vld [vmem:[#allocation4 + $0x1f0] sm:$0xff] }
0x30a6   :  { %4850 = vmatpush.bf16.msrb.mxu1 %v6505_v52 }
0x30a7   :  { %v4433_v17 = vadd.f32 1.0, %v4432_v13  ;;  %v4422_v30 = vadd.f32 1.1283791, %v4421_v24 }
0x30a9   :  { %6696 = vrcp.f32 %v4433_v17  ;;  %v4445_v28 = vand.u32 2147483648, %v4433_v17  ;;  %v4443_v31 = vand.u32 2147483647, %v4433_v17  ;;  %vm4439_vm14 = vweird.f32 %v4433_v17 }
0x30aa   :  { %v4423_v36 = vmul.f32 %v4422_v30, %v4410_v54 }
0x30ab   :  { %v4446_v35 = vor.u32 1.1754944e-38, %v4445_v28  ;;  %vm4444_vm0 = vcmp.eq.f32.partialorder %v4443_v31, 8.507059e+37 }
0x30af   :  { %v6697_v23 = vpop.eup %6696 }
0x30b0   :  { %v4435_v25 = vmul.f32 %v6697_v23, %v4433_v17  ;;  %vm4440_vm13 = vweird.f32 %v6697_v23 }
0x30b1   :  { %vm4441_vm15 = vmor %vm4439_vm14, %vm4440_vm13 }
0x30b2   :  { %v4436_v21 = vsub.f32 1.0, %v4435_v25 }
0x30b4   :  { %v4437_v27 = vmul.f32 %v6697_v23, %v4436_v21 }
0x30b6   :  { %v4438_v32 = vadd.f32 %v6697_v23, %v4437_v27 }
0x30b8   :  { %v4442_v33 = vsel %vm4441_vm15, %v6697_v23, %v4438_v32  ;;  %v6504_v23 = vld [vmem:[#allocation4 + $0x1e8] sm:$0xff] }
0x30b9   :  { %v4447_v37 = vsel %vm4444_vm0, %v4446_v35, %v4442_v33  ;;  %4851 = vmatpush.bf16.msrb.mxu1 %v6504_v23 }
0x30ba   :  { %v4448_v39 = vmul.f32 %v4447_v37, %v4423_v36 }
0x30bc   :  { %v6097_v38 = vclamps-f32 %v4448_v39, 1.0 }
0x30be   :  { %v4451_v42 = vadd.f32 1.0, %v6097_v38 }
0x30c0   :  { %v4452_v44 = vmul.f32 %v4451_v42, %v4409_v41 }
0x30c2   :  { %v4453_v46 = vpack.c.bf16 %v4452_v44, %v4452_v44 }
0x30c4   :  { %4532 = vmatmul.bf16.vlgmr.msra.gmra.mxu0 %v4453_v46 }
0x3141   :  { %v4533_v50 = vpop.f32.mrf.mxu0 }
0x3142   :  { %v4534_v51 = vadd.f32 %v6568_v48, %v4533_v50  ;;  %v6503_v48 = vld [vmem:[#allocation4 + $0x1e0] sm:$0xff]  ;;  %v6502_v50 = vld [vmem:[#allocation4 + $0x1d8] sm:$0xff] }
0x3143   :  { %4852 = vmatpush.bf16.msrb.mxu1 %v6503_v48 }
0x3144   :  { %v4537_v49 = vpack.c.bf16 %v4534_v51, %v4534_v51  ;;  %v6501_v51 = vld [vmem:[#allocation4 + $0x1d0] sm:$0xff] }
0x3146   :  { %4611 = vmatmul.bf16.vlgmr.msra.gmra.mxu1 %v4537_v49  ;;  %v6500_v49 = vld [vmem:[#allocation4 + $0x1c8] sm:$0xff] }
0x3147   :  { %4853 = vmatpush.bf16.msrb.mxu1 %v6502_v50 }
0x3149   :  { %v4535_v54 = vpop.f32.mrf.mxu0 }
0x314a   :  { %v6499_v54 = vld [vmem:[#allocation4 + $0x1c0] sm:$0xff] }
0x314b   :  { %4854 = vmatpush.bf16.msrb.mxu1 %v6501_v51  ;;  %v6519_v51 = vld [vmem:[#allocation10 + $0x1e0] sm:$0xff] }
0x314f   :  { %4855 = vmatpush.bf16.msrb.mxu1 %v6500_v49 }
0x3153   :  { %4856 = vmatpush.bf16.msrb.mxu1 %v6499_v54 }
0x31c3   :  { %v4612_v55 = vpop.f32.mrf.mxu1 }
0x31c4   :  { %v4695_v53 = vmul.f32 %v7005_v16, %v4612_v55  ;;  %v4730_v56 = vmul.f32 %v7003_v15, %v4612_v55  ;;  %4636 = vmatmul.f32.vlgmr.msrb.gmra.mxu3 %v4612_v55 }
0x31c5   :  { %4655 = vmatpush.xpose.msra.mxu3 %v4612_v55 }
0x31c6   :  { %4749 = vmatpush.msra.mxu2 %v4730_v56  ;;  %4772 = vmatpush.msrb.mxu0 %v4695_v53 }
0x31cb   :  { %v4614_v58 = vpop.f32.mrf.mxu1 }
0x31cc   :  { %4656 = vmatmul.f32.vlgmr.msra.gmra.mxu3 %v6163_v57 }
0x3247   :  { %v4637_v59 = vpop.f32.mrf.mxu3 }
0x3248   :  { %4697 = vperm.xlu2 %6545, %v4637_v59  }
0x324f   :  { %v4657_v60 = vpop.f32.mrf.mxu3 }
0x3250   :  { %6546 = vset.pattern.permute.xlu2 %v6908_v22  ;;  %v4700_v29 = vperm.slane %v4657_v60, 1  ;;  %v4665_v0 = vperm.slane %v4657_v60, 0 }
0x3251   :  { %4662 = vperm.xlu2 %6546, %v4637_v59  }
0x32a2   :  { %v4698_v16 = vpop.permute.xlu2 %4697 }
0x32a3   :  { %v4701_v61 = vadd.f32 %v4700_v29, %v4698_v16 }
0x32a5   :  { %vm4702_vm1 = vcmp.gt.f32.partialorder %v4701_v61, 0.0  ;;  %v4703_v15 = vmul.f32 0.01, %v4701_v61 }
0x32a7   :  { %v4704_v62 = vsel %vm4702_vm1, %v4701_v61, %v4703_v15  ;;  %v6569_v61 = vld [vmem:[%s7254_s6 + $0x7] ss:$0 sm:$0xff] }
0x32a8   :  { %v4705_v63 = vadd.f32 %v7200_v2, %v4704_v62 }
0x32aa   :  { %v4706_v1 = vsel %vm295_vm5, %v4705_v63, -inf }
0x32ab   :  { %v4663_v3 = vpop.permute.xlu2 %4662  ;;  %4707 = vmax.xlane.f32.xlu1 %v4706_v1 }
0x32ac   :  { %v4666_v11 = vadd.f32 %v4665_v0, %v4663_v3 }
0x32ae   :  { %vm4667_vm2 = vcmp.gt.f32.partialorder %v4666_v11, 0.0  ;;  %v4668_v4 = vmul.f32 0.01, %v4666_v11 }
0x32b0   :  { %v4669_v5 = vsel %vm4667_vm2, %v4666_v11, %v4668_v4 }
0x32b1   :  { %v4670_v22 = vadd.f32 %v7200_v2, %v4669_v5 }
0x32b3   :  { %v4671_v6 = vsel %vm295_vm5, %v4670_v22, -inf }
0x32b4   :  { %4672 = vmax.xlane.f32.xlu0 %v4671_v6 }
0x331e   :  { %v4708_v45 = vpop.xlane.xlu1 %4707 }
0x331f   :  { %v4709_v7 = vsub.f32 %v4705_v63, %v4708_v45  ;;  %v4865_v63 = vld [vmem:[#allocation6 + $0x7] sm:$0x1] }
0x3321   :  { %v4710_v8 = vmul.f32 1.442695, %v4709_v7 }
0x3323   :  { %6698 = vpow2.f32 %v4710_v8 }
0x3327   :  { %v4673_v9 = vpop.xlane.xlu0 %4672 }
0x3328   :  { %v4674_v10 = vsub.f32 %v4670_v22, %v4673_v9 }
0x3329   :  { %v6699_v12 = vpop.eup %6698 }
0x332a   :  { %v4675_v13 = vmul.f32 1.442695, %v4674_v10  ;;  %v4712_v14 = vsel %vm295_vm5, %v6699_v12, 0.0 }
0x332b   :  { %4713 = vadd.xlane.f32.xlu2 %v4712_v14  ;;  %v6513_v14 = vld [vmem:[#allocation7 + $0x1f0] sm:$0xff] }
0x332c   :  { %6700 = vpow2.f32 %v4675_v13  ;;  %v6514_v13 = vld [vmem:[#allocation7 + $0x1f8] sm:$0xff] }
0x332d   :  { %5022 = vmatpush.bf16.msra.mxu0 %v6514_v13 }
0x3331   :  { %5023 = vmatpush.bf16.msra.mxu0 %v6513_v14 }
0x3332   :  { %v6701_v17 = vpop.eup %6700 }
0x3333   :  { %v4677_v18 = vsel %vm295_vm5, %v6701_v17, 0.0 }
0x3334   :  { %4678 = vadd.xlane.f32.xlu1 %v4677_v18  ;;  %v6511_v18 = vld [vmem:[#allocation7 + $0x1e0] sm:$0xff] }
0x339e   :  { %v4714_v20 = vpop.xlane.xlu2 %4713 }
0x339f   :  { %6702 = vrcp.f32 %v4714_v20  ;;  %v4726_v28 = vand.u32 2147483648, %v4714_v20  ;;  %v4724_v27 = vand.u32 2147483647, %v4714_v20  ;;  %vm4720_vm4 = vweird.f32 %v4714_v20 }
0x33a1   :  { %v4727_v32 = vor.u32 1.1754944e-38, %v4726_v28  ;;  %vm4725_vm7 = vcmp.eq.f32.partialorder %v4724_v27, 8.507059e+37 }
0x33a5   :  { %v6703_v24 = vpop.eup %6702 }
0x33a6   :  { %v4716_v25 = vmul.f32 %v6703_v24, %v4714_v20  ;;  %vm4721_vm3 = vweird.f32 %v6703_v24 }
0x33a7   :  { %v4679_v21 = vpop.xlane.xlu1 %4678  ;;  %vm4722_vm6 = vmor %vm4720_vm4, %vm4721_vm3 }
0x33a8   :  { %v4717_v26 = vsub.f32 1.0, %v4716_v25  ;;  %6704 = vrcp.f32 %v4679_v21  ;;  %v4691_v40 = vand.u32 2147483648, %v4679_v21  ;;  %v4689_v41 = vand.u32 2147483647, %v4679_v21 }
0x33a9   :  { %vm4685_vm9 = vweird.f32 %v4679_v21 }
0x33aa   :  { %v4718_v30 = vmul.f32 %v6703_v24, %v4717_v26  ;;  %v4692_v44 = vor.u32 1.1754944e-38, %v4691_v40  ;;  %vm4690_vm11 = vcmp.eq.f32.partialorder %v4689_v41, 8.507059e+37 }
0x33ac   :  { %v4719_v31 = vadd.f32 %v6703_v24, %v4718_v30 }
0x33ae   :  { %v6705_v34 = vpop.eup %6704  ;;  %v4723_v35 = vsel %vm4722_vm6, %v6703_v24, %v4719_v31  ;;  %v6510_v31 = vld [vmem:[#allocation7 + $0x1d8] sm:$0xff] }
0x33af   :  { %v4728_v36 = vsel %vm4725_vm7, %v4727_v32, %v4723_v35  ;;  %v4681_v33 = vmul.f32 %v6705_v34, %v4679_v21  ;;  %vm4686_vm8 = vweird.f32 %v6705_v34  ;;  %v6509_v32 = vld [vmem:[#allocation7 + $0x1d0] sm:$0xff]  ;;  %v6507_v35 = vld [vmem:[#allocation7 + $0x1c0] sm:$0xff] }
0x33b0   :  { %v4729_v37 = vmul.f32 %v6699_v12, %v4728_v36  ;;  %vm4687_vm10 = vmor %vm4685_vm9, %vm4686_vm8 }
0x33b1   :  { %v4682_v39 = vsub.f32 1.0, %v4681_v33 }
0x33b2   :  { %6164 = vmatmul.msk.f32.vlgmr.msra.gmra.mxu2 %vm295_vm5, %v4729_v37 }
0x33b3   :  { %v4683_v38 = vmul.f32 %v6705_v34, %v4682_v39 }
0x33b5   :  { %v4684_v42 = vadd.f32 %v6705_v34, %v4683_v38 }
0x33b7   :  { %v4688_v46 = vsel %vm4687_vm10, %v6705_v34, %v4684_v42  ;;  %v6508_v34 = vld [vmem:[#allocation7 + $0x1c8] sm:$0xff]  ;;  %v6522_v42 = vld [vmem:[#allocation10 + $0x1f8] sm:$0xff] }
0x33b8   :  { %v4693_v47 = vsel %vm4690_vm11, %v4692_v44, %v4688_v46  ;;  %v6521_v44 = vld [vmem:[#allocation10 + $0x1f0] sm:$0xff]  ;;  %v6570_v46 = vld [vmem:[#allocation9 + $0x7] ss:$0 sm:$0xff] }
0x33b9   :  { %v4694_v43 = vmul.f32 %v6701_v17, %v4693_v47  ;;  %v6512_v17 = vld [vmem:[#allocation7 + $0x1e8] sm:$0xff] }
0x33ba   :  { %5024 = vmatpush.bf16.msra.mxu0 %v6512_v17 }
0x33bb   :  { %6165 = vmatmul.msk.f32.vlgmr.msrb.gmra.mxu0 %vm295_vm5, %v4694_v43  ;;  %v6520_v43 = vld [vmem:[#allocation10 + $0x1e8] sm:$0xff] }
0x33be   :  { %5025 = vmatpush.bf16.msra.mxu0 %v6511_v18 }
0x33c2   :  { %5026 = vmatpush.bf16.msra.mxu0 %v6510_v31 }
0x33c6   :  { %5027 = vmatpush.bf16.msra.mxu0 %v6509_v32 }
0x33ca   :  { %5028 = vmatpush.bf16.msra.mxu0 %v6508_v34 }
0x33ce   :  { %5029 = vmatpush.bf16.msra.mxu0 %v6507_v35 }
0x3435   :  { %v4751_v55 = vpop.f32.mrf.mxu2 }
0x3438   :  { %v4774_v53 = vpop.f32.mrf.mxu0 }
0x3439   :  { %v4775_v56 = vadd.f32 %v4774_v53, %v4751_v55  ;;  %v6518_v53 = vld [vmem:[#allocation10 + $0x1d8] sm:$0xff] }
0x343b   :  { %v4778_v57 = vmin.f32 %v4775_v56, 0.0  ;;  %vm4777_vm12 = vcmp.gt.f32.partialorder %v4775_v56, 0.0 }
0x343d   :  { %v4779_v58 = vmul.f32 1.442695, %v4778_v57 }
0x343f   :  { %6706 = vpow2.f32 %v4779_v58 }
0x3445   :  { %v6707_v59 = vpop.eup %6706 }
0x3446   :  { %v6166_v60 = vadd.f32 -1.0, %v6707_v59 }
0x3448   :  { %v4782_v29 = vsel %vm4777_vm12, %v4775_v56, %v6166_v60  ;;  %v6517_v60 = vld [vmem:[#allocation10 + $0x1d0] sm:$0xff] }
0x3449   :  { %v4783_v16 = vpack.c.bf16 %v4782_v29, %v4782_v29 }
0x344b   :  { %4857 = vmatmul.bf16.vlgmr.msrb.gmra.mxu1 %v4783_v16 }
0x34c8   :  { %v4858_v15 = vpop.f32.mrf.mxu1 }
0x34c9   :  { %4887 = vmatpush.xpose.msrb.mxu3 %v4858_v15  ;;  %4940 = vmatpush.msrb.mxu2 %v4858_v15  ;;  %v4869_v62 = vmul.f32 %v6569_v61, %v4858_v15 }
0x34cb   :  { %4870 = vadd.xlane.f32.xlu0 %v4869_v62  ;;  %v6516_v62 = vld [vmem:[#allocation10 + $0x1c8] sm:$0xff] }
0x34cc   :  { %4888 = vmatmul.f32.vlgmr.msrb.gmra.mxu3 %v4865_v63 }
0x34cd   :  { %5150 = vmatpush.bf16.msra.mxu3 %v6522_v42 }
0x34d0   :  { %v4860_v0 = vpop.f32.mrf.mxu1 }
0x34d1   :  { %5151 = vmatpush.bf16.msra.mxu3 %v6521_v44 }
0x34d5   :  { %5152 = vmatpush.bf16.msra.mxu3 %v6520_v43 }
0x34d9   :  { %5153 = vmatpush.bf16.msra.mxu3 %v6519_v51 }
0x34dd   :  { %5154 = vmatpush.bf16.msra.mxu3 %v6518_v53 }
0x34e1   :  { %5155 = vmatpush.bf16.msra.mxu3 %v6517_v60 }
0x34e5   :  { %5156 = vmatpush.bf16.msra.mxu3 %v6516_v62 }
0x353e   :  { %v4871_v11 = vpop.xlane.xlu0 %4870 }
0x354f   :  { %v4889_v1 = vpop.f32.mrf.mxu3 }
0x3550   :  { %v4892_v3 = vperm.slane %v4889_v1, 0 }
0x3552   :  { %v4893_v4 = vadd.f32 %v4892_v3, %v4871_v11  ;;  %v6515_v3 = vld [vmem:[#allocation10 + $0x1c0] sm:$0xff] }
0x3553   :  { %5157 = vmatpush.bf16.msra.mxu3 %v6515_v3 }
0x3554   :  { %v4895_v5 = vmul.f32 0.01, %v4893_v4  ;;  %vm4894_vm13 = vcmp.gt.f32.partialorder %v4893_v4, 0.0 }
0x3556   :  { %v4896_v22 = vsel %vm4894_vm13, %v4893_v4, %v4895_v5 }
0x3557   :  { %v4897_v6 = vadd.f32 %v7200_v2, %v4896_v22 }
0x3559   :  { %v4898_v45 = vsel %vm295_vm5, %v4897_v6, -inf }
0x355a   :  { %4899 = vmax.xlane.f32.xlu1 %v4898_v45 }
0x35cd   :  { %v4900_v7 = vpop.xlane.xlu1 %4899 }
0x35ce   :  { %v4901_v8 = vsub.f32 %v4897_v6, %v4900_v7 }
0x35d0   :  { %v4902_v9 = vmul.f32 1.442695, %v4901_v8 }
0x35d2   :  { %6708 = vpow2.f32 %v4902_v9 }
0x35d8   :  { %v6709_v10 = vpop.eup %6708 }
0x35d9   :  { %v4904_v12 = vsel %vm295_vm5, %v6709_v10, 0.0 }
0x35da   :  { %4905 = vadd.xlane.f32.xlu0 %v4904_v12 }
0x364d   :  { %v4906_v19 = vpop.xlane.xlu0 %4905 }
0x364e   :  { %6710 = vrcp.f32 %v4906_v19  ;;  %v4918_v23 = vand.u32 2147483648, %v4906_v19  ;;  %v4916_v25 = vand.u32 2147483647, %v4906_v19  ;;  %vm4912_vm15 = vweird.f32 %v4906_v19 }
0x3650   :  { %v4919_v26 = vor.u32 1.1754944e-38, %v4918_v23  ;;  %vm4917_vm1 = vcmp.eq.f32.partialorder %v4916_v25, 8.507059e+37 }
0x3654   :  { %v6711_v2 = vpop.eup %6710 }
0x3655   :  { %v4908_v52 = vmul.f32 %v6711_v2, %v4906_v19  ;;  %vm4913_vm14 = vweird.f32 %v6711_v2 }
0x3656   :  { %vm4914_vm0 = vmor %vm4912_vm15, %vm4913_vm14 }
0x3657   :  { %v4909_v20 = vsub.f32 1.0, %v4908_v52 }
0x3659   :  { %v4910_v24 = vmul.f32 %v6711_v2, %v4909_v20 }
0x365b   :  { %v4911_v21 = vadd.f32 %v6711_v2, %v4910_v24 }
0x365d   :  { %v4915_v28 = vsel %vm4914_vm0, %v6711_v2, %v4911_v21 }
0x365e   :  { %v4920_v30 = vsel %vm4917_vm1, %v4919_v26, %v4915_v28 }
0x365f   :  { %v4921_v27 = vmul.f32 %v6709_v10, %v4920_v30 }
0x3661   :  { %6200 = vmatmul.msk.f32.vlgmr.msrb.gmra.mxu2 %vm295_vm5, %v4921_v27  ;;  %v6571_v27 = vld [vmem:[#allocation12 + $0x7] ss:$0 sm:$0xff] }
0x36e4   :  { %v4942_v36 = vpop.f32.mrf.mxu2 }
0x36e5   :  { %v4946_v33 = vmin.f32 %v4942_v36, 0.0  ;;  %vm4945_vm2 = vcmp.gt.f32.partialorder %v4942_v36, 0.0 }
0x36e7   :  { %v4947_v37 = vmul.f32 1.442695, %v4946_v33 }
0x36e9   :  { %6712 = vpow2.f32 %v4947_v37 }
0x36ef   :  { %v6713_v39 = vpop.eup %6712 }
0x36f0   :  { %v6201_v40 = vadd.f32 -1.0, %v6713_v39 }
0x36f2   :  { %v4950_v38 = vsel %vm4945_vm2, %v4942_v36, %v6201_v40 }
0x36f3   :  { %v4951_v41 = vpack.c.bf16 %v4950_v38, %v4950_v38 }
0x36f5   :  { %5030 = vmatmul.bf16.vlgmr.msra.gmra.mxu0 %v4951_v41 }
0x3772   :  { %v5031_v47 = vpop.f32.mrf.mxu0 }
0x3773   :  { %v5032_v48 = vadd.f32 %v6570_v46, %v5031_v47 }
0x3775   :  { %v5036_v50 = vmul.f32 0.70710677, %v5032_v48  ;;  %v5035_v21 = vmul.f32 0.5, %v5032_v48 }
0x3777   :  { %v5037_v49 = vmul.f32 %v5036_v50, %v5036_v50 }
0x3779   :  { %v5038_v54 = vmin.f32 %v5037_v49, 16.0 }
0x377a   :  { %v5033_v55 = vpop.f32.mrf.mxu0 }
0x377b   :  { %v5039_v56 = vmul.f32 2.1237322e-06, %v5038_v54  ;;  %v5050_v57 = vmul.f32 3.8918573e-05, %v5038_v54 }
0x377d   :  { %v5040_v58 = vadd.f32 0.00028619796, %v5039_v56  ;;  %v5051_v59 = vadd.f32 0.001143296, %v5050_v57 }
0x377f   :  { %v5041_v29 = vmul.f32 %v5040_v58, %v5038_v54  ;;  %v5052_v16 = vmul.f32 %v5051_v59, %v5038_v54 }
0x3781   :  { %v5053_v61 = vadd.f32 0.014752088, %v5052_v16  ;;  %v5042_v15 = vadd.f32 0.0036580483, %v5041_v29 }
0x3783   :  { %v5054_v63 = vmul.f32 %v5053_v61, %v5038_v54  ;;  %v5043_v1 = vmul.f32 %v5042_v15, %v5038_v54 }
0x3785   :  { %v5055_v0 = vadd.f32 0.112945676, %v5054_v63  ;;  %v5044_v5 = vadd.f32 0.05243302, %v5043_v1 }
0x3787   :  { %v5056_v11 = vmul.f32 %v5055_v0, %v5038_v54  ;;  %v5045_v45 = vmul.f32 %v5044_v5, %v5038_v54 }
0x3789   :  { %v5057_v4 = vadd.f32 0.4994258, %v5056_v11  ;;  %v5046_v7 = vadd.f32 0.18741608, %v5045_v45 }
0x378b   :  { %v5058_v22 = vmul.f32 %v5057_v4, %v5038_v54  ;;  %v5047_v9 = vmul.f32 %v5046_v7, %v5038_v54 }
0x378d   :  { %v5059_v6 = vadd.f32 1.0, %v5058_v22  ;;  %v5048_v14 = vadd.f32 1.1283791, %v5047_v9 }
0x378f   :  { %6714 = vrcp.f32 %v5059_v6  ;;  %v5071_v13 = vand.u32 2147483648, %v5059_v6  ;;  %v5069_v18 = vand.u32 2147483647, %v5059_v6  ;;  %vm5065_vm3 = vweird.f32 %v5059_v6 }
0x3790   :  { %v5049_v52 = vmul.f32 %v5048_v14, %v5036_v50 }
0x3791   :  { %v5072_v2 = vor.u32 1.1754944e-38, %v5071_v13  ;;  %vm5070_vm6 = vcmp.eq.f32.partialorder %v5069_v18, 8.507059e+37 }
0x3795   :  { %v6715_v8 = vpop.eup %6714 }
0x3796   :  { %v5061_v10 = vmul.f32 %v6715_v8, %v5059_v6  ;;  %vm5066_vm5 = vweird.f32 %v6715_v8 }
0x3797   :  { %vm5067_vm4 = vmor %vm5065_vm3, %vm5066_vm5 }
0x3798   :  { %v5062_v12 = vsub.f32 1.0, %v5061_v10 }
0x379a   :  { %v5063_v17 = vmul.f32 %v6715_v8, %v5062_v12 }
0x379c   :  { %v5064_v19 = vadd.f32 %v6715_v8, %v5063_v17 }
0x379e   :  { %v5068_v20 = vsel %vm5067_vm4, %v6715_v8, %v5064_v19 }
0x379f   :  { %v5073_v23 = vsel %vm5070_vm6, %v5072_v2, %v5068_v20 }
0x37a0   :  { %v5074_v24 = vmul.f32 %v5073_v23, %v5049_v52 }
0x37a2   :  { %v6234_v25 = vclamps-f32 %v5074_v24, 1.0 }
0x37a4   :  { %v5077_v26 = vadd.f32 1.0, %v6234_v25 }
0x37a6   :  { %v5078_v28 = vmul.f32 %v5077_v26, %v5035_v21 }
0x37a8   :  { %v5079_v30 = vpack.c.bf16 %v5078_v28, %v5078_v28 }
0x37aa   :  { %5158 = vmatmul.bf16.vlgmr.msra.gmra.mxu3 %v5079_v30 }
0x382d   :  { %v5159_v31 = vpop.f32.mrf.mxu3 }
0x382e   :  { %v5160_v32 = vadd.f32 %v6571_v27, %v5159_v31 }
0x3830   :  { %5163 = vst [vmem:[%s7260_s12] sm:$0xff] %v5160_v32 }
0x3835   :  { %v5161_v34 = vpop.f32.mrf.mxu3 }
0x3836   :  { %5168 = vsyncpa [#allocation3], 1 }
0x3837   :  { %5169 = vsyncpa [#allocation5], 1 }
0x3838   :  { %5170 = vsyncpa [#allocation8], 1 }
0x3839   :  { %5171 = vsyncpa [#allocation11], 1 }

</bundles_post_ra>
